<compile_context>
chip_gen: v7x
topology: tpu7x:2x2x1
jax: 0.10.0
libtpu: 0.0.40
codegen_flags: <defaults>
</compile_context>

<pallas_src>
import jax
import jax.numpy as jnp
from jax import lax
from jax.experimental import pallas as pl
from jax.experimental.pallas import tpu as pltpu

# ----------------------------- configuration -----------------------------
E = 32          # joint (output) embedding dim
DV = 32         # vision transformer width
DT = 32         # text transformer width
HEADS = 2       # attention heads (both towers)
PATCH = 8       # ViT patch size
IMG = 16        # frame spatial size
C_IN = 3        # image channels
L_CTX = 8       # text context length
VOCAB = 64      # vocabulary size
A_CLS = 3       # number of classes
N_DESC = 2      # descriptors per class (cfg.TRAINER.OST.N)
B = 2           # batch (videos)
T = 2           # frames per video

GRID_P = IMG // PATCH
NTOK = 1 + GRID_P * GRID_P          # CLS + patches
PATCH_DIM = C_IN * PATCH * PATCH    # 48


# ------------------------- in-kernel math helpers -------------------------
def _ln(x, g, b):
    mu = jnp.mean(x, axis=-1, keepdims=True)
    xc = x - mu
    var = jnp.mean(xc * xc, axis=-1, keepdims=True)
    return xc * lax.rsqrt(var + 1e-5) * g + b


def _apply_block(x, blk, mask):
    """Residual attention block on a 2-D (L, D) tile; everything stays in VMEM."""
    (ln1g, ln1b, inw, inb, outw, outb,
     ln2g, ln2b, fcw, fcb, pjw, pjb) = blk
    L, D = x.shape
    dh = D // HEADS
    scale = float(dh) ** -0.5

    # --- multi-head self-attention (QK^T*scale + mask + softmax + PV fused) ---
    xa = _ln(x, ln1g, ln1b)
    qkv = jnp.dot(xa, inw, preferred_element_type=jnp.float32) + inb      # (L, 3D)
    attn = jnp.zeros((L, D), jnp.float32)
    for h in range(HEADS):
        q = qkv[:, h * dh:(h + 1) * dh]
        k = qkv[:, D + h * dh:D + (h + 1) * dh]
        v = qkv[:, 2 * D + h * dh:2 * D + (h + 1) * dh]
        s = lax.dot_general(q, k, (((1,), (1,)), ((), ())),
                            preferred_element_type=jnp.float32) * scale    # (L, L)
        if mask is not None:
            s = s + mask
        m = jnp.max(s, axis=-1, keepdims=True)
        e = jnp.exp(s - m)
        p = e * pl.reciprocal(jnp.sum(e, axis=-1, keepdims=True), approx=True)
        oh = jnp.dot(p, v, preferred_element_type=jnp.float32)             # (L, dh)
        # head-merge folded into the output projection: [o0|o1] @ W == sum_h oh @ W[h]
        attn = attn + jnp.dot(oh, outw[h * dh:(h + 1) * dh, :],
                              preferred_element_type=jnp.float32)
    x = x + attn + outb

    # --- MLP: fc -> QuickGELU -> proj, with residual ---
    xm = _ln(x, ln2g, ln2b)
    hmid = jnp.dot(xm, fcw, preferred_element_type=jnp.float32) + fcb      # (L, 4D)
    hmid = hmid * jax.nn.sigmoid(1.702 * hmid)
    return x + jnp.dot(hmid, pjw, preferred_element_type=jnp.float32) + pjb


# ------------------------------ fused kernels ------------------------------
def _image_tower_kernel(*refs):
    (tok_ref, augw_ref, pos_ref, lnpre_g, lnpre_b,
     *blk_refs, lnpost_g, lnpost_b, vproj_ref, o_ref) = refs
    blk = tuple(r[...] for r in blk_refs)
    augw = augw_ref[...]
    pos = pos_ref[...]
    gpre, bpre = lnpre_g[...], lnpre_b[...]
    gpost, bpost = lnpost_g[...], lnpost_b[...]
    vproj = vproj_ref[...]
    for f in range(tok_ref.shape[0]):                       # frames in this grid step
        # patch embedding; row 0 of tok_ref is a selector that picks the class
        # embedding through the augmented weight, so no in-kernel concat needed.
        x = jnp.dot(tok_ref[f], augw, preferred_element_type=jnp.float32) + pos
        x = _ln(x, gpre, bpre)
        x = _apply_block(x, blk, mask=None)
        cls = _ln(x[0:1, :], gpost, bpost)                  # (1, DV)
        feat = jnp.dot(cls, vproj, preferred_element_type=jnp.float32)     # (1, E)
        # fused L2 normalisation (matches x / x.norm(): no epsilon)
        o_ref[f] = feat * lax.rsqrt(jnp.sum(feat * feat, axis=-1, keepdims=True))


def _text_tower_kernel(*refs):
    (x_ref, pos_ref, *blk_refs, lnf_g, lnf_b, eot_ref, tproj_ref, o_ref) = refs
    blk = tuple(r[...] for r in blk_refs)
    pos = pos_ref[...]
    gf, bf = lnf_g[...], lnf_b[...]
    tproj = tproj_ref[...]
    L = pos.shape[0]
    # causal mask built in-kernel (hoisted out of the per-sequence loop)
    row = lax.broadcasted_iota(jnp.int32, (L, L), 0)
    col = lax.broadcasted_iota(jnp.int32, (L, L), 1)
    mask = jnp.where(col <= row, 0.0, -1e9).astype(jnp.float32)
    for s in range(x_ref.shape[0]):                         # sequences in this step
        x = x_ref[s] + pos                                  # (L, DT)
        x = _apply_block(x, blk, mask=mask)
        x = _ln(x, gf, bf)
        pooled = jnp.dot(eot_ref[s], x, preferred_element_type=jnp.float32)  # EOT pool (1, DT)
        feat = jnp.dot(pooled, tproj, preferred_element_type=jnp.float32)    # (1, E)
        o_ref[s] = feat * lax.rsqrt(jnp.sum(feat * feat, axis=-1, keepdims=True))


# ------------------------------ tower wrappers -----------------------------
def _full_spec(shape):
    zeros = (0,) * len(shape)
    return pl.BlockSpec(tuple(shape), lambda i: zeros)


def image_tower(kp, frames):
    """frames: (Bn, C, H, W) NCHW -> (Bn, E), already L2-normalised."""
    Bn = frames.shape[0]
    patches = (frames.reshape(Bn, C_IN, GRID_P, PATCH, GRID_P, PATCH)
               .transpose(0, 2, 4, 1, 3, 5)
               .reshape(Bn, GRID_P * GRID_P, PATCH_DIM))
    # augment with a selector column so row 0 picks up the class embedding
    patch_rows = jnp.concatenate(
        [patches, jnp.zeros((Bn, GRID_P * GRID_P, 1), jnp.float32)], axis=-1)
    cls_rows = jnp.zeros((Bn, 1, PATCH_DIM + 1), jnp.float32).at[:, :, -1].set(1.0)
    tok_in = jnp.concatenate([cls_rows, patch_rows], axis=1)       # (Bn, NTOK, PD+1)

    steps = 2 if Bn % 2 == 0 else 1          # "parallel" grid axis (both TCs on v7x)
    fps = Bn // steps
    weights = [kp['v_augw'], kp['v_pos'], kp['v_ln_pre_g'], kp['v_ln_pre_b'],
               *kp['v_blk'], kp['v_ln_post_g'], kp['v_ln_post_b'], kp['v_proj']]
    out = pl.pallas_call(
        _image_tower_kernel,
        out_shape=jax.ShapeDtypeStruct((Bn, 1, E), jnp.float32),
        grid=(steps,),
        in_specs=[pl.BlockSpec((fps, NTOK, PATCH_DIM + 1), lambda i: (i, 0, 0))]
                 + [_full_spec(w.shape) for w in weights],
        out_specs=pl.BlockSpec((fps, 1, E), lambda i: (i, 0, 0)),
        compiler_params=pltpu.CompilerParams(dimension_semantics=("parallel",)),
    )(tok_in, *weights)
    return out.reshape(Bn, E)


def text_tower(kp, tokens):
    """tokens: (S, L) int32 -> (S, E), already L2-normalised."""
    S = tokens.shape[0]
    x_emb = kp['t_tok'][tokens]                                    # gather (JAX glue)
    eot_oh = jax.nn.one_hot(jnp.argmax(tokens, axis=-1), L_CTX,
                            dtype=jnp.float32).reshape(S, 1, L_CTX)
    steps = 2 if S % 2 == 0 else 1
    sps = S // steps
    weights = [kp['t_pos'], *kp['t_blk'], kp['t_ln_final_g'], kp['t_ln_final_b']]
    out = pl.pallas_call(
        _text_tower_kernel,
        out_shape=jax.ShapeDtypeStruct((S, 1, E), jnp.float32),
        grid=(steps,),
        in_specs=[pl.BlockSpec((sps, L_CTX, DT), lambda i: (i, 0, 0))]
                 + [_full_spec(w.shape) for w in weights]
                 + [pl.BlockSpec((sps, 1, L_CTX), lambda i: (i, 0, 0)),
                    _full_spec(kp['t_proj'].shape)],
        out_specs=pl.BlockSpec((sps, 1, E), lambda i: (i, 0, 0)),
        compiler_params=pltpu.CompilerParams(dimension_semantics=("parallel",)),
    )(x_emb, *weights, eot_oh, kp['t_proj'])
    return out.reshape(S, E)


# -------------------------------- OST.forward ------------------------------
def ost_forward(kp, des_spatial_token, des_temporal_token, image, label_id):
    logit_scale = jnp.exp(kp['logit_scale'])
    b, t, c, h, w = image.shape
    frames = image.reshape(b * t, c, h, w)
    image_features = image_tower(kp, frames).reshape(b, t, E)      # L2-normalised in-kernel

    local_spatial = des_spatial_token[label_id].reshape(-1, L_CTX)   # (b*N, L)
    local_temporal = des_temporal_token[label_id].reshape(-1, L_CTX)
    # both text_encoder() calls merged into one fused pallas_call
    d = text_tower(kp, jnp.concatenate([local_spatial, local_temporal], axis=0))
    half = b * N_DESC
    descriptor_spatial = d[:half].reshape(b, N_DESC, E)
    descriptor_temporal = d[half:].reshape(b, N_DESC, E)
    # TODO(synk): Sinkhorn / OptimalDescriptorSolver is only used by
    # OST.inference()/get_logit(), not by OST.forward(), so it is omitted.
    return image_features, descriptor_spatial, descriptor_temporal, logit_scale


# --------------------------------- parameters -------------------------------
def _init_block(key, D):
    ks = jax.random.split(key, 4)

    def nrm(k, shape, scale=0.02):
        return (scale * jax.random.normal(k, shape)).astype(jnp.float32)

    ones = jnp.ones((D,), jnp.float32)
    zeros = jnp.zeros((D,), jnp.float32)
    return {
        'ln1': (ones, zeros),
        'in_w': nrm(ks[0], (3 * D, D)),
        'in_b': jnp.zeros((3 * D,), jnp.float32),
        'out_w': nrm(ks[1], (D, D)),
        'out_b': zeros,
        'ln2': (ones, zeros),
        'fc_w': nrm(ks[2], (4 * D, D)),
        'fc_b': jnp.zeros((4 * D,), jnp.float32),
        'proj_w': nrm(ks[3], (D, 4 * D)),
        'proj_b': zeros,
    }


def init_params(key):
    ks = jax.random.split(key, 10)

    def nrm(k, shape, scale=0.02):
        return (scale * jax.random.normal(k, shape)).astype(jnp.float32)

    return {
        # vision tower
        'v_conv1': nrm(ks[0], (DV, C_IN, PATCH, PATCH)),
        'v_cls': nrm(ks[1], (DV,)),
        'v_pos': nrm(ks[2], (NTOK, DV)),
        'v_ln_pre': (jnp.ones((DV,), jnp.float32), jnp.zeros((DV,), jnp.float32)),
        'v_blk': _init_block(ks[3], DV),
        'v_ln_post': (jnp.ones((DV,), jnp.float32), jnp.zeros((DV,), jnp.float32)),
        'v_proj': nrm(ks[4], (DV, E)),
        # text tower
        't_tok': nrm(ks[5], (VOCAB, DT)),
        't_pos': nrm(ks[6], (L_CTX, DT)),
        't_blk': _init_block(ks[7], DT),
        't_ln_final': (jnp.ones((DT,), jnp.float32), jnp.zeros((DT,), jnp.float32)),
        't_proj': nrm(ks[8], (DT, E)),
        # CLIP logit scale init: log(1/0.07)
        'logit_scale': jnp.asarray(jnp.log(1.0 / 0.07), jnp.float32),
    }


def prepare_params(p):
    """One-time conversion of PyTorch-layout params into kernel layout
    (pre-transposed (K,N) weights, (1,N) biases, conv folded into an augmented
    matmul weight), so no transposes run in the jitted hot path."""
    def r2(v):
        return v.reshape(1, -1).astype(jnp.float32)

    def blk(bb):
        return (r2(bb['ln1'][0]), r2(bb['ln1'][1]),
                bb['in_w'].T, r2(bb['in_b']),
                bb['out_w'].T, r2(bb['out_b']),
                r2(bb['ln2'][0]), r2(bb['ln2'][1]),
                bb['fc_w'].T, r2(bb['fc_b']),
                bb['proj_w'].T, r2(bb['proj_b']))

    wpatch_t = p['v_conv1'].reshape(DV, -1).T                      # (48, DV)
    return {
        'v_augw': jnp.concatenate([wpatch_t, p['v_cls'][None, :]], axis=0),
        'v_pos': p['v_pos'],
        'v_ln_pre_g': r2(p['v_ln_pre'][0]), 'v_ln_pre_b': r2(p['v_ln_pre'][1]),
        'v_blk': blk(p['v_blk']),
        'v_ln_post_g': r2(p['v_ln_post'][0]), 'v_ln_post_b': r2(p['v_ln_post'][1]),
        'v_proj': p['v_proj'],
        't_tok': p['t_tok'],
        't_pos': p['t_pos'],
        't_blk': blk(p['t_blk']),
        't_ln_final_g': r2(p['t_ln_final'][0]), 't_ln_final_b': r2(p['t_ln_final'][1]),
        't_proj': p['t_proj'],
        'logit_scale': p['logit_scale'],
    }


# ------------------------------------ main ----------------------------------
if __name__ == "__main__":
    key = jax.random.PRNGKey(0)
    (k_img, k_lab, k_sp, k_tp, k_e1, k_e2, k_par) = jax.random.split(key, 7)

    image = jax.random.normal(k_img, (B, T, C_IN, IMG, IMG), dtype=jnp.float32)
    label_id = jax.random.randint(k_lab, (B,), 0, A_CLS)

    def make_tokens(k_tok, k_eot):
        rows = A_CLS * N_DESC
        toks = jax.random.randint(k_tok, (rows, L_CTX), 1, VOCAB - 2)
        eot_pos = jax.random.randint(k_eot, (rows,), 2, L_CTX)
        toks = toks.at[jnp.arange(rows), eot_pos].set(VOCAB - 1)   # EOT = argmax
        toks = toks.at[:, 0].set(VOCAB - 2)                        # SOT token
        return toks

    # rearrange '(a n) d -> a n d' with n = N
    des_spatial_token = make_tokens(k_sp, k_e1).reshape(A_CLS, N_DESC, L_CTX)
    des_temporal_token = make_tokens(k_tp, k_e2).reshape(A_CLS, N_DESC, L_CTX)

    kernel_params = prepare_params(init_params(k_par))

    fwd = jax.jit(ost_forward)
    image_features, descr_spatial, descr_temporal, logit_scale = fwd(
        kernel_params, des_spatial_token, des_temporal_token, image, label_id)

    jax.block_until_ready((image_features, descr_spatial, descr_temporal,
                           logit_scale))
    assert image_features.shape == (B, T, E)
    assert descr_spatial.shape == (B, N_DESC, E)
    assert descr_temporal.shape == (B, N_DESC, E)
    assert bool(jnp.all(jnp.isfinite(image_features)))
    print("KERNEL_OK")
</pallas_src>

<mosaic_0001>
module attributes {stable_mosaic.version = 11 : i64} {
  func.func @_image_tower_kernel(%arg0: i32, %arg1: memref<2x5x193xf32, #tpu.memory_space<vmem>>, %arg2: memref<193x32xf32, #tpu.memory_space<vmem>>, %arg3: memref<5x32xf32, #tpu.memory_space<vmem>>, %arg4: memref<1x32xf32, #tpu.memory_space<vmem>>, %arg5: memref<1x32xf32, #tpu.memory_space<vmem>>, %arg6: memref<1x32xf32, #tpu.memory_space<vmem>>, %arg7: memref<1x32xf32, #tpu.memory_space<vmem>>, %arg8: memref<32x96xf32, #tpu.memory_space<vmem>>, %arg9: memref<1x96xf32, #tpu.memory_space<vmem>>, %arg10: memref<32x32xf32, #tpu.memory_space<vmem>>, %arg11: memref<1x32xf32, #tpu.memory_space<vmem>>, %arg12: memref<1x32xf32, #tpu.memory_space<vmem>>, %arg13: memref<1x32xf32, #tpu.memory_space<vmem>>, %arg14: memref<32x128xf32, #tpu.memory_space<vmem>>, %arg15: memref<1x128xf32, #tpu.memory_space<vmem>>, %arg16: memref<128x32xf32, #tpu.memory_space<vmem>>, %arg17: memref<1x32xf32, #tpu.memory_space<vmem>>, %arg18: memref<1x32xf32, #tpu.memory_space<vmem>>, %arg19: memref<1x32xf32, #tpu.memory_space<vmem>>, %arg20: memref<32x32xf32, #tpu.memory_space<vmem>>, %arg21: memref<2x1x32xf32, #tpu.memory_space<vmem>>) attributes {dimension_semantics = [#tpu.dimension_semantics<parallel>], iteration_bounds = array<i64: 2>, scalar_prefetch = 0 : i64, scratch_operands = 0 : i64, tpu.core_type = #tpu.core_type<tc>, window_params = [{transform_indices = @transform_0, window_bounds = array<i64: 2, 5, 193>}, {pipeline_mode = #tpu.pipeline_mode<synchronous>, transform_indices = @transform_1, window_bounds = array<i64: 193, 32>}, {pipeline_mode = #tpu.pipeline_mode<synchronous>, transform_indices = @transform_2, window_bounds = array<i64: 5, 32>}, {pipeline_mode = #tpu.pipeline_mode<synchronous>, transform_indices = @transform_3, window_bounds = array<i64: 1, 32>}, {pipeline_mode = #tpu.pipeline_mode<synchronous>, transform_indices = @transform_4, window_bounds = array<i64: 1, 32>}, {pipeline_mode = #tpu.pipeline_mode<synchronous>, transform_indices = @transform_5, window_bounds = array<i64: 1, 32>}, {pipeline_mode = #tpu.pipeline_mode<synchronous>, transform_indices = @transform_6, window_bounds = array<i64: 1, 32>}, {pipeline_mode = #tpu.pipeline_mode<synchronous>, transform_indices = @transform_7, window_bounds = array<i64: 32, 96>}, {pipeline_mode = #tpu.pipeline_mode<synchronous>, transform_indices = @transform_8, window_bounds = array<i64: 1, 96>}, {pipeline_mode = #tpu.pipeline_mode<synchronous>, transform_indices = @transform_9, window_bounds = array<i64: 32, 32>}, {pipeline_mode = #tpu.pipeline_mode<synchronous>, transform_indices = @transform_10, window_bounds = array<i64: 1, 32>}, {pipeline_mode = #tpu.pipeline_mode<synchronous>, transform_indices = @transform_11, window_bounds = array<i64: 1, 32>}, {pipeline_mode = #tpu.pipeline_mode<synchronous>, transform_indices = @transform_12, window_bounds = array<i64: 1, 32>}, {pipeline_mode = #tpu.pipeline_mode<synchronous>, transform_indices = @transform_13, window_bounds = array<i64: 32, 128>}, {pipeline_mode = #tpu.pipeline_mode<synchronous>, transform_indices = @transform_14, window_bounds = array<i64: 1, 128>}, {pipeline_mode = #tpu.pipeline_mode<synchronous>, transform_indices = @transform_15, window_bounds = array<i64: 128, 32>}, {pipeline_mode = #tpu.pipeline_mode<synchronous>, transform_indices = @transform_16, window_bounds = array<i64: 1, 32>}, {pipeline_mode = #tpu.pipeline_mode<synchronous>, transform_indices = @transform_17, window_bounds = array<i64: 1, 32>}, {pipeline_mode = #tpu.pipeline_mode<synchronous>, transform_indices = @transform_18, window_bounds = array<i64: 1, 32>}, {pipeline_mode = #tpu.pipeline_mode<synchronous>, transform_indices = @transform_19, window_bounds = array<i64: 32, 32>}, {transform_indices = @transform_20, window_bounds = array<i64: 2, 1, 32>}]} {
    %c0 = arith.constant 0 : index
    %c0_0 = arith.constant 0 : index
    %0 = vector.load %arg6[%c0, %c0_0] : memref<1x32xf32, #tpu.memory_space<vmem>>, vector<1x32xf32>
    %c0_1 = arith.constant 0 : index
    %c0_2 = arith.constant 0 : index
    %1 = vector.load %arg7[%c0_1, %c0_2] : memref<1x32xf32, #tpu.memory_space<vmem>>, vector<1x32xf32>
    %c0_3 = arith.constant 0 : index
    %c0_4 = arith.constant 0 : index
    %2 = vector.load %arg8[%c0_3, %c0_4] : memref<32x96xf32, #tpu.memory_space<vmem>>, vector<32x96xf32>
    %c0_5 = arith.constant 0 : index
    %c0_6 = arith.constant 0 : index
    %3 = vector.load %arg9[%c0_5, %c0_6] : memref<1x96xf32, #tpu.memory_space<vmem>>, vector<1x96xf32>
    %c0_7 = arith.constant 0 : index
    %c0_8 = arith.constant 0 : index
    %4 = vector.load %arg10[%c0_7, %c0_8] : memref<32x32xf32, #tpu.memory_space<vmem>>, vector<32x32xf32>
    %c0_9 = arith.constant 0 : index
    %c0_10 = arith.constant 0 : index
    %5 = vector.load %arg11[%c0_9, %c0_10] : memref<1x32xf32, #tpu.memory_space<vmem>>, vector<1x32xf32>
    %c0_11 = arith.constant 0 : index
    %c0_12 = arith.constant 0 : index
    %6 = vector.load %arg12[%c0_11, %c0_12] : memref<1x32xf32, #tpu.memory_space<vmem>>, vector<1x32xf32>
    %c0_13 = arith.constant 0 : index
    %c0_14 = arith.constant 0 : index
    %7 = vector.load %arg13[%c0_13, %c0_14] : memref<1x32xf32, #tpu.memory_space<vmem>>, vector<1x32xf32>
    %c0_15 = arith.constant 0 : index
    %c0_16 = arith.constant 0 : index
    %8 = vector.load %arg14[%c0_15, %c0_16] : memref<32x128xf32, #tpu.memory_space<vmem>>, vector<32x128xf32>
    %c0_17 = arith.constant 0 : index
    %c0_18 = arith.constant 0 : index
    %9 = vector.load %arg15[%c0_17, %c0_18] : memref<1x128xf32, #tpu.memory_space<vmem>>, vector<1x128xf32>
    %c0_19 = arith.constant 0 : index
    %c0_20 = arith.constant 0 : index
    %10 = vector.load %arg16[%c0_19, %c0_20] : memref<128x32xf32, #tpu.memory_space<vmem>>, vector<128x32xf32>
    %c0_21 = arith.constant 0 : index
    %c0_22 = arith.constant 0 : index
    %11 = vector.load %arg17[%c0_21, %c0_22] : memref<1x32xf32, #tpu.memory_space<vmem>>, vector<1x32xf32>
    %c0_23 = arith.constant 0 : index
    %c0_24 = arith.constant 0 : index
    %12 = vector.load %arg2[%c0_23, %c0_24] : memref<193x32xf32, #tpu.memory_space<vmem>>, vector<193x32xf32>
    %c0_25 = arith.constant 0 : index
    %c0_26 = arith.constant 0 : index
    %13 = vector.load %arg3[%c0_25, %c0_26] : memref<5x32xf32, #tpu.memory_space<vmem>>, vector<5x32xf32>
    %c0_27 = arith.constant 0 : index
    %c0_28 = arith.constant 0 : index
    %14 = vector.load %arg4[%c0_27, %c0_28] : memref<1x32xf32, #tpu.memory_space<vmem>>, vector<1x32xf32>
    %c0_29 = arith.constant 0 : index
    %c0_30 = arith.constant 0 : index
    %15 = vector.load %arg5[%c0_29, %c0_30] : memref<1x32xf32, #tpu.memory_space<vmem>>, vector<1x32xf32>
    %c0_31 = arith.constant 0 : index
    %c0_32 = arith.constant 0 : index
    %16 = vector.load %arg18[%c0_31, %c0_32] : memref<1x32xf32, #tpu.memory_space<vmem>>, vector<1x32xf32>
    %c0_33 = arith.constant 0 : index
    %c0_34 = arith.constant 0 : index
    %17 = vector.load %arg19[%c0_33, %c0_34] : memref<1x32xf32, #tpu.memory_space<vmem>>, vector<1x32xf32>
    %c0_35 = arith.constant 0 : index
    %c0_36 = arith.constant 0 : index
    %18 = vector.load %arg20[%c0_35, %c0_36] : memref<32x32xf32, #tpu.memory_space<vmem>>, vector<32x32xf32>
    %c0_37 = arith.constant 0 : index
    %c0_38 = arith.constant 0 : index
    %c0_39 = arith.constant 0 : index
    %19 = vector.load %arg1[%c0_37, %c0_38, %c0_39] : memref<2x5x193xf32, #tpu.memory_space<vmem>>, vector<1x5x193xf32>
    %20 = vector.shape_cast %19 : vector<1x5x193xf32> to vector<5x193xf32>
    %cst = arith.constant dense<0.000000e+00> : vector<5x32xf32>
    %21 = tpu.matmul %20, %12, %cst {dimension_numbers = #tpu.dot_dimension_numbers<[1], [0], [0], [1], [0, 0, 1, 1], [], []>} : vector<5x193xf32>, vector<193x32xf32>, vector<5x32xf32> -> vector<5x32xf32>
    %22 = arith.addf %21, %13 : vector<5x32xf32>
    %cst_40 = arith.constant dense<0.000000e+00> : vector<5xf32>
    %23 = vector.multi_reduction <add>, %22, %cst_40 [1] : vector<5x32xf32> to vector<5xf32>
    %24 = vector.shape_cast %23 : vector<5xf32> to vector<5x1xf32>
    %cst_41 = arith.constant 3.200000e+01 : f32
    %25 = vector.broadcast %cst_41 : f32 to vector<5x1xf32>
    %26 = arith.divf %24, %25 : vector<5x1xf32>
    %27 = vector.broadcast %26 : vector<5x1xf32> to vector<5x32xf32>
    %28 = arith.subf %22, %27 : vector<5x32xf32>
    %29 = arith.mulf %28, %28 : vector<5x32xf32>
    %cst_42 = arith.constant dense<0.000000e+00> : vector<5xf32>
    %30 = vector.multi_reduction <add>, %29, %cst_42 [1] : vector<5x32xf32> to vector<5xf32>
    %31 = vector.shape_cast %30 : vector<5xf32> to vector<5x1xf32>
    %cst_43 = arith.constant 3.200000e+01 : f32
    %32 = vector.broadcast %cst_43 : f32 to vector<5x1xf32>
    %33 = arith.divf %31, %32 : vector<5x1xf32>
    %cst_44 = arith.constant 9.99999974E-6 : f32
    %34 = vector.broadcast %cst_44 : f32 to vector<5x1xf32>
    %35 = arith.addf %33, %34 : vector<5x1xf32>
    %36 = math.rsqrt %35 : vector<5x1xf32>
    %37 = vector.broadcast %36 : vector<5x1xf32> to vector<5x32xf32>
    %38 = arith.mulf %28, %37 : vector<5x32xf32>
    %39 = vector.broadcast %14 : vector<1x32xf32> to vector<5x32xf32>
    %40 = arith.mulf %38, %39 : vector<5x32xf32>
    %41 = vector.broadcast %15 : vector<1x32xf32> to vector<5x32xf32>
    %42 = arith.addf %40, %41 : vector<5x32xf32>
    %cst_45 = arith.constant dense<0.000000e+00> : vector<5xf32>
    %43 = vector.multi_reduction <add>, %42, %cst_45 [1] : vector<5x32xf32> to vector<5xf32>
    %44 = vector.shape_cast %43 : vector<5xf32> to vector<5x1xf32>
    %cst_46 = arith.constant 3.200000e+01 : f32
    %45 = vector.broadcast %cst_46 : f32 to vector<5x1xf32>
    %46 = arith.divf %44, %45 : vector<5x1xf32>
    %47 = vector.broadcast %46 : vector<5x1xf32> to vector<5x32xf32>
    %48 = arith.subf %42, %47 : vector<5x32xf32>
    %49 = arith.mulf %48, %48 : vector<5x32xf32>
    %cst_47 = arith.constant dense<0.000000e+00> : vector<5xf32>
    %50 = vector.multi_reduction <add>, %49, %cst_47 [1] : vector<5x32xf32> to vector<5xf32>
    %51 = vector.shape_cast %50 : vector<5xf32> to vector<5x1xf32>
    %cst_48 = arith.constant 3.200000e+01 : f32
    %52 = vector.broadcast %cst_48 : f32 to vector<5x1xf32>
    %53 = arith.divf %51, %52 : vector<5x1xf32>
    %cst_49 = arith.constant 9.99999974E-6 : f32
    %54 = vector.broadcast %cst_49 : f32 to vector<5x1xf32>
    %55 = arith.addf %53, %54 : vector<5x1xf32>
    %56 = math.rsqrt %55 : vector<5x1xf32>
    %57 = vector.broadcast %56 : vector<5x1xf32> to vector<5x32xf32>
    %58 = arith.mulf %48, %57 : vector<5x32xf32>
    %59 = vector.broadcast %0 : vector<1x32xf32> to vector<5x32xf32>
    %60 = arith.mulf %58, %59 : vector<5x32xf32>
    %61 = vector.broadcast %1 : vector<1x32xf32> to vector<5x32xf32>
    %62 = arith.addf %60, %61 : vector<5x32xf32>
    %cst_50 = arith.constant dense<0.000000e+00> : vector<5x96xf32>
    %63 = tpu.matmul %62, %2, %cst_50 {dimension_numbers = #tpu.dot_dimension_numbers<[1], [0], [0], [1], [0, 0, 1, 1], [], []>} : vector<5x32xf32>, vector<32x96xf32>, vector<5x96xf32> -> vector<5x96xf32>
    %64 = vector.broadcast %3 : vector<1x96xf32> to vector<5x96xf32>
    %65 = arith.addf %63, %64 : vector<5x96xf32>
    %cst_51 = arith.constant 0.000000e+00 : f32
    %66 = vector.broadcast %cst_51 : f32 to vector<5x32xf32>
    %67 = vector.extract_strided_slice %65 {offsets = [0, 0], sizes = [5, 16], strides = [1, 1]} : vector<5x96xf32> to vector<5x16xf32>
    %68 = vector.extract_strided_slice %65 {offsets = [0, 32], sizes = [5, 16], strides = [1, 1]} : vector<5x96xf32> to vector<5x16xf32>
    %69 = vector.extract_strided_slice %65 {offsets = [0, 64], sizes = [5, 16], strides = [1, 1]} : vector<5x96xf32> to vector<5x16xf32>
    %cst_52 = arith.constant dense<0.000000e+00> : vector<5x5xf32>
    %70 = tpu.matmul %67, %68, %cst_52 {dimension_numbers = #tpu.dot_dimension_numbers<[1], [1], [0], [0], [0, 0, 1, 0], [], []>} : vector<5x16xf32>, vector<5x16xf32>, vector<5x5xf32> -> vector<5x5xf32>
    %cst_53 = arith.constant 2.500000e-01 : f32
    %71 = vector.broadcast %cst_53 : f32 to vector<5x5xf32>
    %72 = arith.mulf %70, %71 : vector<5x5xf32>
    %cst_54 = arith.constant dense<0xFF800000> : vector<5xf32>
    %73 = vector.multi_reduction <maximumf>, %72, %cst_54 [1] : vector<5x5xf32> to vector<5xf32>
    %74 = vector.shape_cast %73 : vector<5xf32> to vector<5x1xf32>
    %75 = vector.broadcast %74 : vector<5x1xf32> to vector<5x5xf32>
    %76 = arith.subf %72, %75 : vector<5x5xf32>
    %77 = math.exp %76 : vector<5x5xf32>
    %cst_55 = arith.constant dense<0.000000e+00> : vector<5xf32>
    %78 = vector.multi_reduction <add>, %77, %cst_55 [1] : vector<5x5xf32> to vector<5xf32>
    %79 = vector.shape_cast %78 : vector<5xf32> to vector<5x1xf32>
    %80 = tpu.reciprocal %79 {approx = true} : vector<5x1xf32> -> vector<5x1xf32>
    %81 = vector.broadcast %80 : vector<5x1xf32> to vector<5x5xf32>
    %82 = arith.mulf %77, %81 : vector<5x5xf32>
    %cst_56 = arith.constant dense<0.000000e+00> : vector<5x16xf32>
    %83 = tpu.matmul %82, %69, %cst_56 {dimension_numbers = #tpu.dot_dimension_numbers<[1], [0], [0], [1], [0, 0, 1, 1], [], []>} : vector<5x5xf32>, vector<5x16xf32>, vector<5x16xf32> -> vector<5x16xf32>
    %84 = vector.extract_strided_slice %4 {offsets = [0, 0], sizes = [16, 32], strides = [1, 1]} : vector<32x32xf32> to vector<16x32xf32>
    %cst_57 = arith.constant dense<0.000000e+00> : vector<5x32xf32>
    %85 = tpu.matmul %83, %84, %cst_57 {dimension_numbers = #tpu.dot_dimension_numbers<[1], [0], [0], [1], [0, 0, 1, 1], [], []>} : vector<5x16xf32>, vector<16x32xf32>, vector<5x32xf32> -> vector<5x32xf32>
    %86 = arith.addf %66, %85 : vector<5x32xf32>
    %87 = vector.extract_strided_slice %65 {offsets = [0, 16], sizes = [5, 16], strides = [1, 1]} : vector<5x96xf32> to vector<5x16xf32>
    %88 = vector.extract_strided_slice %65 {offsets = [0, 48], sizes = [5, 16], strides = [1, 1]} : vector<5x96xf32> to vector<5x16xf32>
    %89 = vector.extract_strided_slice %65 {offsets = [0, 80], sizes = [5, 16], strides = [1, 1]} : vector<5x96xf32> to vector<5x16xf32>
    %cst_58 = arith.constant dense<0.000000e+00> : vector<5x5xf32>
    %90 = tpu.matmul %87, %88, %cst_58 {dimension_numbers = #tpu.dot_dimension_numbers<[1], [1], [0], [0], [0, 0, 1, 0], [], []>} : vector<5x16xf32>, vector<5x16xf32>, vector<5x5xf32> -> vector<5x5xf32>
    %cst_59 = arith.constant 2.500000e-01 : f32
    %91 = vector.broadcast %cst_59 : f32 to vector<5x5xf32>
    %92 = arith.mulf %90, %91 : vector<5x5xf32>
    %cst_60 = arith.constant dense<0xFF800000> : vector<5xf32>
    %93 = vector.multi_reduction <maximumf>, %92, %cst_60 [1] : vector<5x5xf32> to vector<5xf32>
    %94 = vector.shape_cast %93 : vector<5xf32> to vector<5x1xf32>
    %95 = vector.broadcast %94 : vector<5x1xf32> to vector<5x5xf32>
    %96 = arith.subf %92, %95 : vector<5x5xf32>
    %97 = math.exp %96 : vector<5x5xf32>
    %cst_61 = arith.constant dense<0.000000e+00> : vector<5xf32>
    %98 = vector.multi_reduction <add>, %97, %cst_61 [1] : vector<5x5xf32> to vector<5xf32>
    %99 = vector.shape_cast %98 : vector<5xf32> to vector<5x1xf32>
    %100 = tpu.reciprocal %99 {approx = true} : vector<5x1xf32> -> vector<5x1xf32>
    %101 = vector.broadcast %100 : vector<5x1xf32> to vector<5x5xf32>
    %102 = arith.mulf %97, %101 : vector<5x5xf32>
    %cst_62 = arith.constant dense<0.000000e+00> : vector<5x16xf32>
    %103 = tpu.matmul %102, %89, %cst_62 {dimension_numbers = #tpu.dot_dimension_numbers<[1], [0], [0], [1], [0, 0, 1, 1], [], []>} : vector<5x5xf32>, vector<5x16xf32>, vector<5x16xf32> -> vector<5x16xf32>
    %104 = vector.extract_strided_slice %4 {offsets = [16, 0], sizes = [16, 32], strides = [1, 1]} : vector<32x32xf32> to vector<16x32xf32>
    %cst_63 = arith.constant dense<0.000000e+00> : vector<5x32xf32>
    %105 = tpu.matmul %103, %104, %cst_63 {dimension_numbers = #tpu.dot_dimension_numbers<[1], [0], [0], [1], [0, 0, 1, 1], [], []>} : vector<5x16xf32>, vector<16x32xf32>, vector<5x32xf32> -> vector<5x32xf32>
    %106 = arith.addf %86, %105 : vector<5x32xf32>
    %107 = arith.addf %42, %106 : vector<5x32xf32>
    %108 = vector.broadcast %5 : vector<1x32xf32> to vector<5x32xf32>
    %109 = arith.addf %107, %108 : vector<5x32xf32>
    %cst_64 = arith.constant dense<0.000000e+00> : vector<5xf32>
    %110 = vector.multi_reduction <add>, %109, %cst_64 [1] : vector<5x32xf32> to vector<5xf32>
    %111 = vector.shape_cast %110 : vector<5xf32> to vector<5x1xf32>
    %cst_65 = arith.constant 3.200000e+01 : f32
    %112 = vector.broadcast %cst_65 : f32 to vector<5x1xf32>
    %113 = arith.divf %111, %112 : vector<5x1xf32>
    %114 = vector.broadcast %113 : vector<5x1xf32> to vector<5x32xf32>
    %115 = arith.subf %109, %114 : vector<5x32xf32>
    %116 = arith.mulf %115, %115 : vector<5x32xf32>
    %cst_66 = arith.constant dense<0.000000e+00> : vector<5xf32>
    %117 = vector.multi_reduction <add>, %116, %cst_66 [1] : vector<5x32xf32> to vector<5xf32>
    %118 = vector.shape_cast %117 : vector<5xf32> to vector<5x1xf32>
    %cst_67 = arith.constant 3.200000e+01 : f32
    %119 = vector.broadcast %cst_67 : f32 to vector<5x1xf32>
    %120 = arith.divf %118, %119 : vector<5x1xf32>
    %cst_68 = arith.constant 9.99999974E-6 : f32
    %121 = vector.broadcast %cst_68 : f32 to vector<5x1xf32>
    %122 = arith.addf %120, %121 : vector<5x1xf32>
    %123 = math.rsqrt %122 : vector<5x1xf32>
    %124 = vector.broadcast %123 : vector<5x1xf32> to vector<5x32xf32>
    %125 = arith.mulf %115, %124 : vector<5x32xf32>
    %126 = vector.broadcast %6 : vector<1x32xf32> to vector<5x32xf32>
    %127 = arith.mulf %125, %126 : vector<5x32xf32>
    %128 = vector.broadcast %7 : vector<1x32xf32> to vector<5x32xf32>
    %129 = arith.addf %127, %128 : vector<5x32xf32>
    %cst_69 = arith.constant dense<0.000000e+00> : vector<5x128xf32>
    %130 = tpu.matmul %129, %8, %cst_69 {dimension_numbers = #tpu.dot_dimension_numbers<[1], [0], [0], [1], [0, 0, 1, 1], [], []>} : vector<5x32xf32>, vector<32x128xf32>, vector<5x128xf32> -> vector<5x128xf32>
    %131 = vector.broadcast %9 : vector<1x128xf32> to vector<5x128xf32>
    %132 = arith.addf %130, %131 : vector<5x128xf32>
    %cst_70 = arith.constant 1.702000e+00 : f32
    %133 = vector.broadcast %cst_70 : f32 to vector<5x128xf32>
    %134 = arith.mulf %133, %132 : vector<5x128xf32>
    %135 = arith.negf %134 : vector<5x128xf32>
    %136 = math.exp %135 : vector<5x128xf32>
    %cst_71 = arith.constant 1.000000e+00 : f32
    %137 = vector.broadcast %cst_71 : f32 to vector<5x128xf32>
    %138 = arith.addf %137, %136 : vector<5x128xf32>
    %139 = arith.divf %137, %138 : vector<5x128xf32>
    %140 = arith.mulf %132, %139 : vector<5x128xf32>
    %cst_72 = arith.constant dense<0.000000e+00> : vector<5x32xf32>
    %141 = tpu.matmul %140, %10, %cst_72 {dimension_numbers = #tpu.dot_dimension_numbers<[1], [0], [0], [1], [0, 0, 1, 1], [], []>} : vector<5x128xf32>, vector<128x32xf32>, vector<5x32xf32> -> vector<5x32xf32>
    %142 = arith.addf %109, %141 : vector<5x32xf32>
    %143 = vector.broadcast %11 : vector<1x32xf32> to vector<5x32xf32>
    %144 = arith.addf %142, %143 : vector<5x32xf32>
    %145 = vector.extract_strided_slice %144 {offsets = [0, 0], sizes = [1, 32], strides = [1, 1]} : vector<5x32xf32> to vector<1x32xf32>
    %cst_73 = arith.constant dense<0.000000e+00> : vector<1xf32>
    %146 = vector.multi_reduction <add>, %145, %cst_73 [1] : vector<1x32xf32> to vector<1xf32>
    %147 = vector.shape_cast %146 : vector<1xf32> to vector<1x1xf32>
    %cst_74 = arith.constant 3.200000e+01 : f32
    %148 = vector.broadcast %cst_74 : f32 to vector<1x1xf32>
    %149 = arith.divf %147, %148 : vector<1x1xf32>
    %150 = vector.broadcast %149 : vector<1x1xf32> to vector<1x32xf32>
    %151 = arith.subf %145, %150 : vector<1x32xf32>
    %152 = arith.mulf %151, %151 : vector<1x32xf32>
    %cst_75 = arith.constant dense<0.000000e+00> : vector<1xf32>
    %153 = vector.multi_reduction <add>, %152, %cst_75 [1] : vector<1x32xf32> to vector<1xf32>
    %154 = vector.shape_cast %153 : vector<1xf32> to vector<1x1xf32>
    %cst_76 = arith.constant 3.200000e+01 : f32
    %155 = vector.broadcast %cst_76 : f32 to vector<1x1xf32>
    %156 = arith.divf %154, %155 : vector<1x1xf32>
    %cst_77 = arith.constant 9.99999974E-6 : f32
    %157 = vector.broadcast %cst_77 : f32 to vector<1x1xf32>
    %158 = arith.addf %156, %157 : vector<1x1xf32>
    %159 = math.rsqrt %158 : vector<1x1xf32>
    %160 = vector.broadcast %159 : vector<1x1xf32> to vector<1x32xf32>
    %161 = arith.mulf %151, %160 : vector<1x32xf32>
    %162 = arith.mulf %161, %16 : vector<1x32xf32>
    %163 = arith.addf %162, %17 : vector<1x32xf32>
    %cst_78 = arith.constant dense<0.000000e+00> : vector<1x32xf32>
    %164 = tpu.matmul %163, %18, %cst_78 {dimension_numbers = #tpu.dot_dimension_numbers<[1], [0], [0], [1], [0, 0, 1, 1], [], []>} : vector<1x32xf32>, vector<32x32xf32>, vector<1x32xf32> -> vector<1x32xf32>
    %165 = arith.mulf %164, %164 : vector<1x32xf32>
    %cst_79 = arith.constant dense<0.000000e+00> : vector<1xf32>
    %166 = vector.multi_reduction <add>, %165, %cst_79 [1] : vector<1x32xf32> to vector<1xf32>
    %167 = vector.shape_cast %166 : vector<1xf32> to vector<1x1xf32>
    %168 = math.rsqrt %167 : vector<1x1xf32>
    %169 = vector.broadcast %168 : vector<1x1xf32> to vector<1x32xf32>
    %170 = arith.mulf %164, %169 : vector<1x32xf32>
    %c0_80 = arith.constant 0 : index
    %c0_81 = arith.constant 0 : index
    %c0_82 = arith.constant 0 : index
    %171 = vector.load %arg21[%c0_80, %c0_81, %c0_82] : memref<2x1x32xf32, #tpu.memory_space<vmem>>, vector<1x1x32xf32>
    %172 = vector.shape_cast %171 : vector<1x1x32xf32> to vector<1x32xf32>
    %173 = vector.shape_cast %170 : vector<1x32xf32> to vector<1x1x32xf32>
    tpu.vector_store %arg21[%c0_80, %c0_81, %c0_82], %173 {strides = array<i32>} : memref<2x1x32xf32, #tpu.memory_space<vmem>>, vector<1x1x32xf32>,
    %c1 = arith.constant 1 : index
    %c0_83 = arith.constant 0 : index
    %c0_84 = arith.constant 0 : index
    %174 = vector.load %arg1[%c1, %c0_83, %c0_84] : memref<2x5x193xf32, #tpu.memory_space<vmem>>, vector<1x5x193xf32>
    %175 = vector.shape_cast %174 : vector<1x5x193xf32> to vector<5x193xf32>
    %cst_85 = arith.constant dense<0.000000e+00> : vector<5x32xf32>
    %176 = tpu.matmul %175, %12, %cst_85 {dimension_numbers = #tpu.dot_dimension_numbers<[1], [0], [0], [1], [0, 0, 1, 1], [], []>} : vector<5x193xf32>, vector<193x32xf32>, vector<5x32xf32> -> vector<5x32xf32>
    %177 = arith.addf %176, %13 : vector<5x32xf32>
    %cst_86 = arith.constant dense<0.000000e+00> : vector<5xf32>
    %178 = vector.multi_reduction <add>, %177, %cst_86 [1] : vector<5x32xf32> to vector<5xf32>
    %179 = vector.shape_cast %178 : vector<5xf32> to vector<5x1xf32>
    %cst_87 = arith.constant 3.200000e+01 : f32
    %180 = vector.broadcast %cst_87 : f32 to vector<5x1xf32>
    %181 = arith.divf %179, %180 : vector<5x1xf32>
    %182 = vector.broadcast %181 : vector<5x1xf32> to vector<5x32xf32>
    %183 = arith.subf %177, %182 : vector<5x32xf32>
    %184 = arith.mulf %183, %183 : vector<5x32xf32>
    %cst_88 = arith.constant dense<0.000000e+00> : vector<5xf32>
    %185 = vector.multi_reduction <add>, %184, %cst_88 [1] : vector<5x32xf32> to vector<5xf32>
    %186 = vector.shape_cast %185 : vector<5xf32> to vector<5x1xf32>
    %cst_89 = arith.constant 3.200000e+01 : f32
    %187 = vector.broadcast %cst_89 : f32 to vector<5x1xf32>
    %188 = arith.divf %186, %187 : vector<5x1xf32>
    %cst_90 = arith.constant 9.99999974E-6 : f32
    %189 = vector.broadcast %cst_90 : f32 to vector<5x1xf32>
    %190 = arith.addf %188, %189 : vector<5x1xf32>
    %191 = math.rsqrt %190 : vector<5x1xf32>
    %192 = vector.broadcast %191 : vector<5x1xf32> to vector<5x32xf32>
    %193 = arith.mulf %183, %192 : vector<5x32xf32>
    %194 = vector.broadcast %14 : vector<1x32xf32> to vector<5x32xf32>
    %195 = arith.mulf %193, %194 : vector<5x32xf32>
    %196 = vector.broadcast %15 : vector<1x32xf32> to vector<5x32xf32>
    %197 = arith.addf %195, %196 : vector<5x32xf32>
    %cst_91 = arith.constant dense<0.000000e+00> : vector<5xf32>
    %198 = vector.multi_reduction <add>, %197, %cst_91 [1] : vector<5x32xf32> to vector<5xf32>
    %199 = vector.shape_cast %198 : vector<5xf32> to vector<5x1xf32>
    %cst_92 = arith.constant 3.200000e+01 : f32
    %200 = vector.broadcast %cst_92 : f32 to vector<5x1xf32>
    %201 = arith.divf %199, %200 : vector<5x1xf32>
    %202 = vector.broadcast %201 : vector<5x1xf32> to vector<5x32xf32>
    %203 = arith.subf %197, %202 : vector<5x32xf32>
    %204 = arith.mulf %203, %203 : vector<5x32xf32>
    %cst_93 = arith.constant dense<0.000000e+00> : vector<5xf32>
    %205 = vector.multi_reduction <add>, %204, %cst_93 [1] : vector<5x32xf32> to vector<5xf32>
    %206 = vector.shape_cast %205 : vector<5xf32> to vector<5x1xf32>
    %cst_94 = arith.constant 3.200000e+01 : f32
    %207 = vector.broadcast %cst_94 : f32 to vector<5x1xf32>
    %208 = arith.divf %206, %207 : vector<5x1xf32>
    %cst_95 = arith.constant 9.99999974E-6 : f32
    %209 = vector.broadcast %cst_95 : f32 to vector<5x1xf32>
    %210 = arith.addf %208, %209 : vector<5x1xf32>
    %211 = math.rsqrt %210 : vector<5x1xf32>
    %212 = vector.broadcast %211 : vector<5x1xf32> to vector<5x32xf32>
    %213 = arith.mulf %203, %212 : vector<5x32xf32>
    %214 = vector.broadcast %0 : vector<1x32xf32> to vector<5x32xf32>
    %215 = arith.mulf %213, %214 : vector<5x32xf32>
    %216 = vector.broadcast %1 : vector<1x32xf32> to vector<5x32xf32>
    %217 = arith.addf %215, %216 : vector<5x32xf32>
    %cst_96 = arith.constant dense<0.000000e+00> : vector<5x96xf32>
    %218 = tpu.matmul %217, %2, %cst_96 {dimension_numbers = #tpu.dot_dimension_numbers<[1], [0], [0], [1], [0, 0, 1, 1], [], []>} : vector<5x32xf32>, vector<32x96xf32>, vector<5x96xf32> -> vector<5x96xf32>
    %219 = vector.broadcast %3 : vector<1x96xf32> to vector<5x96xf32>
    %220 = arith.addf %218, %219 : vector<5x96xf32>
    %cst_97 = arith.constant 0.000000e+00 : f32
    %221 = vector.broadcast %cst_97 : f32 to vector<5x32xf32>
    %222 = vector.extract_strided_slice %220 {offsets = [0, 0], sizes = [5, 16], strides = [1, 1]} : vector<5x96xf32> to vector<5x16xf32>
    %223 = vector.extract_strided_slice %220 {offsets = [0, 32], sizes = [5, 16], strides = [1, 1]} : vector<5x96xf32> to vector<5x16xf32>
    %224 = vector.extract_strided_slice %220 {offsets = [0, 64], sizes = [5, 16], strides = [1, 1]} : vector<5x96xf32> to vector<5x16xf32>
    %cst_98 = arith.constant dense<0.000000e+00> : vector<5x5xf32>
    %225 = tpu.matmul %222, %223, %cst_98 {dimension_numbers = #tpu.dot_dimension_numbers<[1], [1], [0], [0], [0, 0, 1, 0], [], []>} : vector<5x16xf32>, vector<5x16xf32>, vector<5x5xf32> -> vector<5x5xf32>
    %cst_99 = arith.constant 2.500000e-01 : f32
    %226 = vector.broadcast %cst_99 : f32 to vector<5x5xf32>
    %227 = arith.mulf %225, %226 : vector<5x5xf32>
    %cst_100 = arith.constant dense<0xFF800000> : vector<5xf32>
    %228 = vector.multi_reduction <maximumf>, %227, %cst_100 [1] : vector<5x5xf32> to vector<5xf32>
    %229 = vector.shape_cast %228 : vector<5xf32> to vector<5x1xf32>
    %230 = vector.broadcast %229 : vector<5x1xf32> to vector<5x5xf32>
    %231 = arith.subf %227, %230 : vector<5x5xf32>
    %232 = math.exp %231 : vector<5x5xf32>
    %cst_101 = arith.constant dense<0.000000e+00> : vector<5xf32>
    %233 = vector.multi_reduction <add>, %232, %cst_101 [1] : vector<5x5xf32> to vector<5xf32>
    %234 = vector.shape_cast %233 : vector<5xf32> to vector<5x1xf32>
    %235 = tpu.reciprocal %234 {approx = true} : vector<5x1xf32> -> vector<5x1xf32>
    %236 = vector.broadcast %235 : vector<5x1xf32> to vector<5x5xf32>
    %237 = arith.mulf %232, %236 : vector<5x5xf32>
    %cst_102 = arith.constant dense<0.000000e+00> : vector<5x16xf32>
    %238 = tpu.matmul %237, %224, %cst_102 {dimension_numbers = #tpu.dot_dimension_numbers<[1], [0], [0], [1], [0, 0, 1, 1], [], []>} : vector<5x5xf32>, vector<5x16xf32>, vector<5x16xf32> -> vector<5x16xf32>
    %239 = vector.extract_strided_slice %4 {offsets = [0, 0], sizes = [16, 32], strides = [1, 1]} : vector<32x32xf32> to vector<16x32xf32>
    %cst_103 = arith.constant dense<0.000000e+00> : vector<5x32xf32>
    %240 = tpu.matmul %238, %239, %cst_103 {dimension_numbers = #tpu.dot_dimension_numbers<[1], [0], [0], [1], [0, 0, 1, 1], [], []>} : vector<5x16xf32>, vector<16x32xf32>, vector<5x32xf32> -> vector<5x32xf32>
    %241 = arith.addf %221, %240 : vector<5x32xf32>
    %242 = vector.extract_strided_slice %220 {offsets = [0, 16], sizes = [5, 16], strides = [1, 1]} : vector<5x96xf32> to vector<5x16xf32>
    %243 = vector.extract_strided_slice %220 {offsets = [0, 48], sizes = [5, 16], strides = [1, 1]} : vector<5x96xf32> to vector<5x16xf32>
    %244 = vector.extract_strided_slice %220 {offsets = [0, 80], sizes = [5, 16], strides = [1, 1]} : vector<5x96xf32> to vector<5x16xf32>
    %cst_104 = arith.constant dense<0.000000e+00> : vector<5x5xf32>
    %245 = tpu.matmul %242, %243, %cst_104 {dimension_numbers = #tpu.dot_dimension_numbers<[1], [1], [0], [0], [0, 0, 1, 0], [], []>} : vector<5x16xf32>, vector<5x16xf32>, vector<5x5xf32> -> vector<5x5xf32>
    %cst_105 = arith.constant 2.500000e-01 : f32
    %246 = vector.broadcast %cst_105 : f32 to vector<5x5xf32>
    %247 = arith.mulf %245, %246 : vector<5x5xf32>
    %cst_106 = arith.constant dense<0xFF800000> : vector<5xf32>
    %248 = vector.multi_reduction <maximumf>, %247, %cst_106 [1] : vector<5x5xf32> to vector<5xf32>
    %249 = vector.shape_cast %248 : vector<5xf32> to vector<5x1xf32>
    %250 = vector.broadcast %249 : vector<5x1xf32> to vector<5x5xf32>
    %251 = arith.subf %247, %250 : vector<5x5xf32>
    %252 = math.exp %251 : vector<5x5xf32>
    %cst_107 = arith.constant dense<0.000000e+00> : vector<5xf32>
    %253 = vector.multi_reduction <add>, %252, %cst_107 [1] : vector<5x5xf32> to vector<5xf32>
    %254 = vector.shape_cast %253 : vector<5xf32> to vector<5x1xf32>
    %255 = tpu.reciprocal %254 {approx = true} : vector<5x1xf32> -> vector<5x1xf32>
    %256 = vector.broadcast %255 : vector<5x1xf32> to vector<5x5xf32>
    %257 = arith.mulf %252, %256 : vector<5x5xf32>
    %cst_108 = arith.constant dense<0.000000e+00> : vector<5x16xf32>
    %258 = tpu.matmul %257, %244, %cst_108 {dimension_numbers = #tpu.dot_dimension_numbers<[1], [0], [0], [1], [0, 0, 1, 1], [], []>} : vector<5x5xf32>, vector<5x16xf32>, vector<5x16xf32> -> vector<5x16xf32>
    %259 = vector.extract_strided_slice %4 {offsets = [16, 0], sizes = [16, 32], strides = [1, 1]} : vector<32x32xf32> to vector<16x32xf32>
    %cst_109 = arith.constant dense<0.000000e+00> : vector<5x32xf32>
    %260 = tpu.matmul %258, %259, %cst_109 {dimension_numbers = #tpu.dot_dimension_numbers<[1], [0], [0], [1], [0, 0, 1, 1], [], []>} : vector<5x16xf32>, vector<16x32xf32>, vector<5x32xf32> -> vector<5x32xf32>
    %261 = arith.addf %241, %260 : vector<5x32xf32>
    %262 = arith.addf %197, %261 : vector<5x32xf32>
    %263 = vector.broadcast %5 : vector<1x32xf32> to vector<5x32xf32>
    %264 = arith.addf %262, %263 : vector<5x32xf32>
    %cst_110 = arith.constant dense<0.000000e+00> : vector<5xf32>
    %265 = vector.multi_reduction <add>, %264, %cst_110 [1] : vector<5x32xf32> to vector<5xf32>
    %266 = vector.shape_cast %265 : vector<5xf32> to vector<5x1xf32>
    %cst_111 = arith.constant 3.200000e+01 : f32
    %267 = vector.broadcast %cst_111 : f32 to vector<5x1xf32>
    %268 = arith.divf %266, %267 : vector<5x1xf32>
    %269 = vector.broadcast %268 : vector<5x1xf32> to vector<5x32xf32>
    %270 = arith.subf %264, %269 : vector<5x32xf32>
    %271 = arith.mulf %270, %270 : vector<5x32xf32>
    %cst_112 = arith.constant dense<0.000000e+00> : vector<5xf32>
    %272 = vector.multi_reduction <add>, %271, %cst_112 [1] : vector<5x32xf32> to vector<5xf32>
    %273 = vector.shape_cast %272 : vector<5xf32> to vector<5x1xf32>
    %cst_113 = arith.constant 3.200000e+01 : f32
    %274 = vector.broadcast %cst_113 : f32 to vector<5x1xf32>
    %275 = arith.divf %273, %274 : vector<5x1xf32>
    %cst_114 = arith.constant 9.99999974E-6 : f32
    %276 = vector.broadcast %cst_114 : f32 to vector<5x1xf32>
    %277 = arith.addf %275, %276 : vector<5x1xf32>
    %278 = math.rsqrt %277 : vector<5x1xf32>
    %279 = vector.broadcast %278 : vector<5x1xf32> to vector<5x32xf32>
    %280 = arith.mulf %270, %279 : vector<5x32xf32>
    %281 = vector.broadcast %6 : vector<1x32xf32> to vector<5x32xf32>
    %282 = arith.mulf %280, %281 : vector<5x32xf32>
    %283 = vector.broadcast %7 : vector<1x32xf32> to vector<5x32xf32>
    %284 = arith.addf %282, %283 : vector<5x32xf32>
    %cst_115 = arith.constant dense<0.000000e+00> : vector<5x128xf32>
    %285 = tpu.matmul %284, %8, %cst_115 {dimension_numbers = #tpu.dot_dimension_numbers<[1], [0], [0], [1], [0, 0, 1, 1], [], []>} : vector<5x32xf32>, vector<32x128xf32>, vector<5x128xf32> -> vector<5x128xf32>
    %286 = vector.broadcast %9 : vector<1x128xf32> to vector<5x128xf32>
    %287 = arith.addf %285, %286 : vector<5x128xf32>
    %cst_116 = arith.constant 1.702000e+00 : f32
    %288 = vector.broadcast %cst_116 : f32 to vector<5x128xf32>
    %289 = arith.mulf %288, %287 : vector<5x128xf32>
    %290 = arith.negf %289 : vector<5x128xf32>
    %291 = math.exp %290 : vector<5x128xf32>
    %cst_117 = arith.constant 1.000000e+00 : f32
    %292 = vector.broadcast %cst_117 : f32 to vector<5x128xf32>
    %293 = arith.addf %292, %291 : vector<5x128xf32>
    %294 = arith.divf %292, %293 : vector<5x128xf32>
    %295 = arith.mulf %287, %294 : vector<5x128xf32>
    %cst_118 = arith.constant dense<0.000000e+00> : vector<5x32xf32>
    %296 = tpu.matmul %295, %10, %cst_118 {dimension_numbers = #tpu.dot_dimension_numbers<[1], [0], [0], [1], [0, 0, 1, 1], [], []>} : vector<5x128xf32>, vector<128x32xf32>, vector<5x32xf32> -> vector<5x32xf32>
    %297 = arith.addf %264, %296 : vector<5x32xf32>
    %298 = vector.broadcast %11 : vector<1x32xf32> to vector<5x32xf32>
    %299 = arith.addf %297, %298 : vector<5x32xf32>
    %300 = vector.extract_strided_slice %299 {offsets = [0, 0], sizes = [1, 32], strides = [1, 1]} : vector<5x32xf32> to vector<1x32xf32>
    %cst_119 = arith.constant dense<0.000000e+00> : vector<1xf32>
    %301 = vector.multi_reduction <add>, %300, %cst_119 [1] : vector<1x32xf32> to vector<1xf32>
    %302 = vector.shape_cast %301 : vector<1xf32> to vector<1x1xf32>
    %cst_120 = arith.constant 3.200000e+01 : f32
    %303 = vector.broadcast %cst_120 : f32 to vector<1x1xf32>
    %304 = arith.divf %302, %303 : vector<1x1xf32>
    %305 = vector.broadcast %304 : vector<1x1xf32> to vector<1x32xf32>
    %306 = arith.subf %300, %305 : vector<1x32xf32>
    %307 = arith.mulf %306, %306 : vector<1x32xf32>
    %cst_121 = arith.constant dense<0.000000e+00> : vector<1xf32>
    %308 = vector.multi_reduction <add>, %307, %cst_121 [1] : vector<1x32xf32> to vector<1xf32>
    %309 = vector.shape_cast %308 : vector<1xf32> to vector<1x1xf32>
    %cst_122 = arith.constant 3.200000e+01 : f32
    %310 = vector.broadcast %cst_122 : f32 to vector<1x1xf32>
    %311 = arith.divf %309, %310 : vector<1x1xf32>
    %cst_123 = arith.constant 9.99999974E-6 : f32
    %312 = vector.broadcast %cst_123 : f32 to vector<1x1xf32>
    %313 = arith.addf %311, %312 : vector<1x1xf32>
    %314 = math.rsqrt %313 : vector<1x1xf32>
    %315 = vector.broadcast %314 : vector<1x1xf32> to vector<1x32xf32>
    %316 = arith.mulf %306, %315 : vector<1x32xf32>
    %317 = arith.mulf %316, %16 : vector<1x32xf32>
    %318 = arith.addf %317, %17 : vector<1x32xf32>
    %cst_124 = arith.constant dense<0.000000e+00> : vector<1x32xf32>
    %319 = tpu.matmul %318, %18, %cst_124 {dimension_numbers = #tpu.dot_dimension_numbers<[1], [0], [0], [1], [0, 0, 1, 1], [], []>} : vector<1x32xf32>, vector<32x32xf32>, vector<1x32xf32> -> vector<1x32xf32>
    %320 = arith.mulf %319, %319 : vector<1x32xf32>
    %cst_125 = arith.constant dense<0.000000e+00> : vector<1xf32>
    %321 = vector.multi_reduction <add>, %320, %cst_125 [1] : vector<1x32xf32> to vector<1xf32>
    %322 = vector.shape_cast %321 : vector<1xf32> to vector<1x1xf32>
    %323 = math.rsqrt %322 : vector<1x1xf32>
    %324 = vector.broadcast %323 : vector<1x1xf32> to vector<1x32xf32>
    %325 = arith.mulf %319, %324 : vector<1x32xf32>
    %c1_126 = arith.constant 1 : index
    %c0_127 = arith.constant 0 : index
    %c0_128 = arith.constant 0 : index
    %326 = vector.load %arg21[%c1_126, %c0_127, %c0_128] : memref<2x1x32xf32, #tpu.memory_space<vmem>>, vector<1x1x32xf32>
    %327 = vector.shape_cast %326 : vector<1x1x32xf32> to vector<1x32xf32>
    %328 = vector.shape_cast %325 : vector<1x32xf32> to vector<1x1x32xf32>
    tpu.vector_store %arg21[%c1_126, %c0_127, %c0_128], %328 {strides = array<i32>} : memref<2x1x32xf32, #tpu.memory_space<vmem>>, vector<1x1x32xf32>,
    return
  }
  func.func @transform_0(%arg0: i32) -> (i32, i32, i32) {
    %c0_i32 = arith.constant 0 : i32
    %c0_i32_0 = arith.constant 0 : i32
    %c0_i32_1 = arith.constant 0 : i32
    return %arg0, %c0_i32, %c0_i32_0 : i32, i32, i32
  }
  func.func @transform_1(%arg0: i32) -> (i32, i32) {
    %c0_i32 = arith.constant 0 : i32
    %c0_i32_0 = arith.constant 0 : i32
    %c0_i32_1 = arith.constant 0 : i32
    return %c0_i32, %c0_i32_0 : i32, i32
  }
  func.func @transform_2(%arg0: i32) -> (i32, i32) {
    %c0_i32 = arith.constant 0 : i32
    %c0_i32_0 = arith.constant 0 : i32
    %c0_i32_1 = arith.constant 0 : i32
    return %c0_i32, %c0_i32_0 : i32, i32
  }
  func.func @transform_3(%arg0: i32) -> (i32, i32) {
    %c0_i32 = arith.constant 0 : i32
    %c0_i32_0 = arith.constant 0 : i32
    %c0_i32_1 = arith.constant 0 : i32
    return %c0_i32, %c0_i32_0 : i32, i32
  }
  func.func @transform_4(%arg0: i32) -> (i32, i32) {
    %c0_i32 = arith.constant 0 : i32
    %c0_i32_0 = arith.constant 0 : i32
    %c0_i32_1 = arith.constant 0 : i32
    return %c0_i32, %c0_i32_0 : i32, i32
  }
  func.func @transform_5(%arg0: i32) -> (i32, i32) {
    %c0_i32 = arith.constant 0 : i32
    %c0_i32_0 = arith.constant 0 : i32
    %c0_i32_1 = arith.constant 0 : i32
    return %c0_i32, %c0_i32_0 : i32, i32
  }
  func.func @transform_6(%arg0: i32) -> (i32, i32) {
    %c0_i32 = arith.constant 0 : i32
    %c0_i32_0 = arith.constant 0 : i32
    %c0_i32_1 = arith.constant 0 : i32
    return %c0_i32, %c0_i32_0 : i32, i32
  }
  func.func @transform_7(%arg0: i32) -> (i32, i32) {
    %c0_i32 = arith.constant 0 : i32
    %c0_i32_0 = arith.constant 0 : i32
    %c0_i32_1 = arith.constant 0 : i32
    return %c0_i32, %c0_i32_0 : i32, i32
  }
  func.func @transform_8(%arg0: i32) -> (i32, i32) {
    %c0_i32 = arith.constant 0 : i32
    %c0_i32_0 = arith.constant 0 : i32
    %c0_i32_1 = arith.constant 0 : i32
    return %c0_i32, %c0_i32_0 : i32, i32
  }
  func.func @transform_9(%arg0: i32) -> (i32, i32) {
    %c0_i32 = arith.constant 0 : i32
    %c0_i32_0 = arith.constant 0 : i32
    %c0_i32_1 = arith.constant 0 : i32
    return %c0_i32, %c0_i32_0 : i32, i32
  }
  func.func @transform_10(%arg0: i32) -> (i32, i32) {
    %c0_i32 = arith.constant 0 : i32
    %c0_i32_0 = arith.constant 0 : i32
    %c0_i32_1 = arith.constant 0 : i32
    return %c0_i32, %c0_i32_0 : i32, i32
  }
  func.func @transform_11(%arg0: i32) -> (i32, i32) {
    %c0_i32 = arith.constant 0 : i32
    %c0_i32_0 = arith.constant 0 : i32
    %c0_i32_1 = arith.constant 0 : i32
    return %c0_i32, %c0_i32_0 : i32, i32
  }
  func.func @transform_12(%arg0: i32) -> (i32, i32) {
    %c0_i32 = arith.constant 0 : i32
    %c0_i32_0 = arith.constant 0 : i32
    %c0_i32_1 = arith.constant 0 : i32
    return %c0_i32, %c0_i32_0 : i32, i32
  }
  func.func @transform_13(%arg0: i32) -> (i32, i32) {
    %c0_i32 = arith.constant 0 : i32
    %c0_i32_0 = arith.constant 0 : i32
    %c0_i32_1 = arith.constant 0 : i32
    return %c0_i32, %c0_i32_0 : i32, i32
  }
  func.func @transform_14(%arg0: i32) -> (i32, i32) {
    %c0_i32 = arith.constant 0 : i32
    %c0_i32_0 = arith.constant 0 : i32
    %c0_i32_1 = arith.constant 0 : i32
    return %c0_i32, %c0_i32_0 : i32, i32
  }
  func.func @transform_15(%arg0: i32) -> (i32, i32) {
    %c0_i32 = arith.constant 0 : i32
    %c0_i32_0 = arith.constant 0 : i32
    %c0_i32_1 = arith.constant 0 : i32
    return %c0_i32, %c0_i32_0 : i32, i32
  }
  func.func @transform_16(%arg0: i32) -> (i32, i32) {
    %c0_i32 = arith.constant 0 : i32
    %c0_i32_0 = arith.constant 0 : i32
    %c0_i32_1 = arith.constant 0 : i32
    return %c0_i32, %c0_i32_0 : i32, i32
  }
  func.func @transform_17(%arg0: i32) -> (i32, i32) {
    %c0_i32 = arith.constant 0 : i32
    %c0_i32_0 = arith.constant 0 : i32
    %c0_i32_1 = arith.constant 0 : i32
    return %c0_i32, %c0_i32_0 : i32, i32
  }
  func.func @transform_18(%arg0: i32) -> (i32, i32) {
    %c0_i32 = arith.constant 0 : i32
    %c0_i32_0 = arith.constant 0 : i32
    %c0_i32_1 = arith.constant 0 : i32
    return %c0_i32, %c0_i32_0 : i32, i32
  }
  func.func @transform_19(%arg0: i32) -> (i32, i32) {
    %c0_i32 = arith.constant 0 : i32
    %c0_i32_0 = arith.constant 0 : i32
    %c0_i32_1 = arith.constant 0 : i32
    return %c0_i32, %c0_i32_0 : i32, i32
  }
  func.func @transform_20(%arg0: i32) -> (i32, i32, i32) {
    %c0_i32 = arith.constant 0 : i32
    %c0_i32_0 = arith.constant 0 : i32
    %c0_i32_1 = arith.constant 0 : i32
    return %arg0, %c0_i32, %c0_i32_0 : i32, i32, i32
  }
}

module attributes {stable_mosaic.version = 11 : i64} {
  func.func @_text_tower_kernel(%arg0: i32, %arg1: memref<4x8x32xf32, #tpu.memory_space<vmem>>, %arg2: memref<8x32xf32, #tpu.memory_space<vmem>>, %arg3: memref<1x32xf32, #tpu.memory_space<vmem>>, %arg4: memref<1x32xf32, #tpu.memory_space<vmem>>, %arg5: memref<32x96xf32, #tpu.memory_space<vmem>>, %arg6: memref<1x96xf32, #tpu.memory_space<vmem>>, %arg7: memref<32x32xf32, #tpu.memory_space<vmem>>, %arg8: memref<1x32xf32, #tpu.memory_space<vmem>>, %arg9: memref<1x32xf32, #tpu.memory_space<vmem>>, %arg10: memref<1x32xf32, #tpu.memory_space<vmem>>, %arg11: memref<32x128xf32, #tpu.memory_space<vmem>>, %arg12: memref<1x128xf32, #tpu.memory_space<vmem>>, %arg13: memref<128x32xf32, #tpu.memory_space<vmem>>, %arg14: memref<1x32xf32, #tpu.memory_space<vmem>>, %arg15: memref<1x32xf32, #tpu.memory_space<vmem>>, %arg16: memref<1x32xf32, #tpu.memory_space<vmem>>, %arg17: memref<4x1x8xf32, #tpu.memory_space<vmem>>, %arg18: memref<32x32xf32, #tpu.memory_space<vmem>>, %arg19: memref<4x1x32xf32, #tpu.memory_space<vmem>>) attributes {dimension_semantics = [#tpu.dimension_semantics<parallel>], iteration_bounds = array<i64: 2>, scalar_prefetch = 0 : i64, scratch_operands = 0 : i64, tpu.core_type = #tpu.core_type<tc>, window_params = [{transform_indices = @transform_0, window_bounds = array<i64: 4, 8, 32>}, {pipeline_mode = #tpu.pipeline_mode<synchronous>, transform_indices = @transform_1, window_bounds = array<i64: 8, 32>}, {pipeline_mode = #tpu.pipeline_mode<synchronous>, transform_indices = @transform_2, window_bounds = array<i64: 1, 32>}, {pipeline_mode = #tpu.pipeline_mode<synchronous>, transform_indices = @transform_3, window_bounds = array<i64: 1, 32>}, {pipeline_mode = #tpu.pipeline_mode<synchronous>, transform_indices = @transform_4, window_bounds = array<i64: 32, 96>}, {pipeline_mode = #tpu.pipeline_mode<synchronous>, transform_indices = @transform_5, window_bounds = array<i64: 1, 96>}, {pipeline_mode = #tpu.pipeline_mode<synchronous>, transform_indices = @transform_6, window_bounds = array<i64: 32, 32>}, {pipeline_mode = #tpu.pipeline_mode<synchronous>, transform_indices = @transform_7, window_bounds = array<i64: 1, 32>}, {pipeline_mode = #tpu.pipeline_mode<synchronous>, transform_indices = @transform_8, window_bounds = array<i64: 1, 32>}, {pipeline_mode = #tpu.pipeline_mode<synchronous>, transform_indices = @transform_9, window_bounds = array<i64: 1, 32>}, {pipeline_mode = #tpu.pipeline_mode<synchronous>, transform_indices = @transform_10, window_bounds = array<i64: 32, 128>}, {pipeline_mode = #tpu.pipeline_mode<synchronous>, transform_indices = @transform_11, window_bounds = array<i64: 1, 128>}, {pipeline_mode = #tpu.pipeline_mode<synchronous>, transform_indices = @transform_12, window_bounds = array<i64: 128, 32>}, {pipeline_mode = #tpu.pipeline_mode<synchronous>, transform_indices = @transform_13, window_bounds = array<i64: 1, 32>}, {pipeline_mode = #tpu.pipeline_mode<synchronous>, transform_indices = @transform_14, window_bounds = array<i64: 1, 32>}, {pipeline_mode = #tpu.pipeline_mode<synchronous>, transform_indices = @transform_15, window_bounds = array<i64: 1, 32>}, {transform_indices = @transform_16, window_bounds = array<i64: 4, 1, 8>}, {pipeline_mode = #tpu.pipeline_mode<synchronous>, transform_indices = @transform_17, window_bounds = array<i64: 32, 32>}, {transform_indices = @transform_18, window_bounds = array<i64: 4, 1, 32>}]} {
    %c0 = arith.constant 0 : index
    %c0_0 = arith.constant 0 : index
    %0 = vector.load %arg3[%c0, %c0_0] : memref<1x32xf32, #tpu.memory_space<vmem>>, vector<1x32xf32>
    %c0_1 = arith.constant 0 : index
    %c0_2 = arith.constant 0 : index
    %1 = vector.load %arg4[%c0_1, %c0_2] : memref<1x32xf32, #tpu.memory_space<vmem>>, vector<1x32xf32>
    %c0_3 = arith.constant 0 : index
    %c0_4 = arith.constant 0 : index
    %2 = vector.load %arg5[%c0_3, %c0_4] : memref<32x96xf32, #tpu.memory_space<vmem>>, vector<32x96xf32>
    %c0_5 = arith.constant 0 : index
    %c0_6 = arith.constant 0 : index
    %3 = vector.load %arg6[%c0_5, %c0_6] : memref<1x96xf32, #tpu.memory_space<vmem>>, vector<1x96xf32>
    %c0_7 = arith.constant 0 : index
    %c0_8 = arith.constant 0 : index
    %4 = vector.load %arg7[%c0_7, %c0_8] : memref<32x32xf32, #tpu.memory_space<vmem>>, vector<32x32xf32>
    %c0_9 = arith.constant 0 : index
    %c0_10 = arith.constant 0 : index
    %5 = vector.load %arg8[%c0_9, %c0_10] : memref<1x32xf32, #tpu.memory_space<vmem>>, vector<1x32xf32>
    %c0_11 = arith.constant 0 : index
    %c0_12 = arith.constant 0 : index
    %6 = vector.load %arg9[%c0_11, %c0_12] : memref<1x32xf32, #tpu.memory_space<vmem>>, vector<1x32xf32>
    %c0_13 = arith.constant 0 : index
    %c0_14 = arith.constant 0 : index
    %7 = vector.load %arg10[%c0_13, %c0_14] : memref<1x32xf32, #tpu.memory_space<vmem>>, vector<1x32xf32>
    %c0_15 = arith.constant 0 : index
    %c0_16 = arith.constant 0 : index
    %8 = vector.load %arg11[%c0_15, %c0_16] : memref<32x128xf32, #tpu.memory_space<vmem>>, vector<32x128xf32>
    %c0_17 = arith.constant 0 : index
    %c0_18 = arith.constant 0 : index
    %9 = vector.load %arg12[%c0_17, %c0_18] : memref<1x128xf32, #tpu.memory_space<vmem>>, vector<1x128xf32>
    %c0_19 = arith.constant 0 : index
    %c0_20 = arith.constant 0 : index
    %10 = vector.load %arg13[%c0_19, %c0_20] : memref<128x32xf32, #tpu.memory_space<vmem>>, vector<128x32xf32>
    %c0_21 = arith.constant 0 : index
    %c0_22 = arith.constant 0 : index
    %11 = vector.load %arg14[%c0_21, %c0_22] : memref<1x32xf32, #tpu.memory_space<vmem>>, vector<1x32xf32>
    %c0_23 = arith.constant 0 : index
    %c0_24 = arith.constant 0 : index
    %12 = vector.load %arg2[%c0_23, %c0_24] : memref<8x32xf32, #tpu.memory_space<vmem>>, vector<8x32xf32>
    %c0_25 = arith.constant 0 : index
    %c0_26 = arith.constant 0 : index
    %13 = vector.load %arg15[%c0_25, %c0_26] : memref<1x32xf32, #tpu.memory_space<vmem>>, vector<1x32xf32>
    %c0_27 = arith.constant 0 : index
    %c0_28 = arith.constant 0 : index
    %14 = vector.load %arg16[%c0_27, %c0_28] : memref<1x32xf32, #tpu.memory_space<vmem>>, vector<1x32xf32>
    %c0_29 = arith.constant 0 : index
    %c0_30 = arith.constant 0 : index
    %15 = vector.load %arg18[%c0_29, %c0_30] : memref<32x32xf32, #tpu.memory_space<vmem>>, vector<32x32xf32>
    %16 = tpu.iota {dimensions = array<i32: 0>} : vector<8x8xi32>
    %17 = tpu.iota {dimensions = array<i32: 1>} : vector<8x8xi32>
    %18 = arith.cmpi sle, %17, %16 : vector<8x8xi32>
    %cst = arith.constant 0.000000e+00 : f32
    %cst_31 = arith.constant -1.000000e+09 : f32
    %19 = vector.broadcast %cst : f32 to vector<8x8xf32>
    %20 = vector.broadcast %cst_31 : f32 to vector<8x8xf32>
    %21 = arith.select %18, %19, %20 : vector<8x8xi1>, vector<8x8xf32>
    %c0_32 = arith.constant 0 : index
    %c0_33 = arith.constant 0 : index
    %c0_34 = arith.constant 0 : index
    %22 = vector.load %arg1[%c0_32, %c0_33, %c0_34] : memref<4x8x32xf32, #tpu.memory_space<vmem>>, vector<1x8x32xf32>
    %23 = vector.shape_cast %22 : vector<1x8x32xf32> to vector<8x32xf32>
    %24 = arith.addf %23, %12 : vector<8x32xf32>
    %cst_35 = arith.constant dense<0.000000e+00> : vector<8xf32>
    %25 = vector.multi_reduction <add>, %24, %cst_35 [1] : vector<8x32xf32> to vector<8xf32>
    %26 = vector.shape_cast %25 : vector<8xf32> to vector<8x1xf32>
    %cst_36 = arith.constant 3.200000e+01 : f32
    %27 = vector.broadcast %cst_36 : f32 to vector<8x1xf32>
    %28 = arith.divf %26, %27 : vector<8x1xf32>
    %29 = vector.broadcast %28 : vector<8x1xf32> to vector<8x32xf32>
    %30 = arith.subf %24, %29 : vector<8x32xf32>
    %31 = arith.mulf %30, %30 : vector<8x32xf32>
    %cst_37 = arith.constant dense<0.000000e+00> : vector<8xf32>
    %32 = vector.multi_reduction <add>, %31, %cst_37 [1] : vector<8x32xf32> to vector<8xf32>
    %33 = vector.shape_cast %32 : vector<8xf32> to vector<8x1xf32>
    %cst_38 = arith.constant 3.200000e+01 : f32
    %34 = vector.broadcast %cst_38 : f32 to vector<8x1xf32>
    %35 = arith.divf %33, %34 : vector<8x1xf32>
    %cst_39 = arith.constant 9.99999974E-6 : f32
    %36 = vector.broadcast %cst_39 : f32 to vector<8x1xf32>
    %37 = arith.addf %35, %36 : vector<8x1xf32>
    %38 = math.rsqrt %37 : vector<8x1xf32>
    %39 = vector.broadcast %38 : vector<8x1xf32> to vector<8x32xf32>
    %40 = arith.mulf %30, %39 : vector<8x32xf32>
    %41 = vector.broadcast %0 : vector<1x32xf32> to vector<8x32xf32>
    %42 = arith.mulf %40, %41 : vector<8x32xf32>
    %43 = vector.broadcast %1 : vector<1x32xf32> to vector<8x32xf32>
    %44 = arith.addf %42, %43 : vector<8x32xf32>
    %cst_40 = arith.constant dense<0.000000e+00> : vector<8x96xf32>
    %45 = tpu.matmul %44, %2, %cst_40 {dimension_numbers = #tpu.dot_dimension_numbers<[1], [0], [0], [1], [0, 0, 1, 1], [], []>} : vector<8x32xf32>, vector<32x96xf32>, vector<8x96xf32> -> vector<8x96xf32>
    %46 = vector.broadcast %3 : vector<1x96xf32> to vector<8x96xf32>
    %47 = arith.addf %45, %46 : vector<8x96xf32>
    %cst_41 = arith.constant 0.000000e+00 : f32
    %48 = vector.broadcast %cst_41 : f32 to vector<8x32xf32>
    %49 = vector.extract_strided_slice %47 {offsets = [0, 0], sizes = [8, 16], strides = [1, 1]} : vector<8x96xf32> to vector<8x16xf32>
    %50 = vector.extract_strided_slice %47 {offsets = [0, 32], sizes = [8, 16], strides = [1, 1]} : vector<8x96xf32> to vector<8x16xf32>
    %51 = vector.extract_strided_slice %47 {offsets = [0, 64], sizes = [8, 16], strides = [1, 1]} : vector<8x96xf32> to vector<8x16xf32>
    %cst_42 = arith.constant dense<0.000000e+00> : vector<8x8xf32>
    %52 = tpu.matmul %49, %50, %cst_42 {dimension_numbers = #tpu.dot_dimension_numbers<[1], [1], [0], [0], [0, 0, 1, 0], [], []>} : vector<8x16xf32>, vector<8x16xf32>, vector<8x8xf32> -> vector<8x8xf32>
    %cst_43 = arith.constant 2.500000e-01 : f32
    %53 = vector.broadcast %cst_43 : f32 to vector<8x8xf32>
    %54 = arith.mulf %52, %53 : vector<8x8xf32>
    %55 = arith.addf %54, %21 : vector<8x8xf32>
    %cst_44 = arith.constant dense<0xFF800000> : vector<8xf32>
    %56 = vector.multi_reduction <maximumf>, %55, %cst_44 [1] : vector<8x8xf32> to vector<8xf32>
    %57 = vector.shape_cast %56 : vector<8xf32> to vector<8x1xf32>
    %58 = vector.broadcast %57 : vector<8x1xf32> to vector<8x8xf32>
    %59 = arith.subf %55, %58 : vector<8x8xf32>
    %60 = math.exp %59 : vector<8x8xf32>
    %cst_45 = arith.constant dense<0.000000e+00> : vector<8xf32>
    %61 = vector.multi_reduction <add>, %60, %cst_45 [1] : vector<8x8xf32> to vector<8xf32>
    %62 = vector.shape_cast %61 : vector<8xf32> to vector<8x1xf32>
    %63 = tpu.reciprocal %62 {approx = true} : vector<8x1xf32> -> vector<8x1xf32>
    %64 = vector.broadcast %63 : vector<8x1xf32> to vector<8x8xf32>
    %65 = arith.mulf %60, %64 : vector<8x8xf32>
    %cst_46 = arith.constant dense<0.000000e+00> : vector<8x16xf32>
    %66 = tpu.matmul %65, %51, %cst_46 {dimension_numbers = #tpu.dot_dimension_numbers<[1], [0], [0], [1], [0, 0, 1, 1], [], []>} : vector<8x8xf32>, vector<8x16xf32>, vector<8x16xf32> -> vector<8x16xf32>
    %67 = vector.extract_strided_slice %4 {offsets = [0, 0], sizes = [16, 32], strides = [1, 1]} : vector<32x32xf32> to vector<16x32xf32>
    %cst_47 = arith.constant dense<0.000000e+00> : vector<8x32xf32>
    %68 = tpu.matmul %66, %67, %cst_47 {dimension_numbers = #tpu.dot_dimension_numbers<[1], [0], [0], [1], [0, 0, 1, 1], [], []>} : vector<8x16xf32>, vector<16x32xf32>, vector<8x32xf32> -> vector<8x32xf32>
    %69 = arith.addf %48, %68 : vector<8x32xf32>
    %70 = vector.extract_strided_slice %47 {offsets = [0, 16], sizes = [8, 16], strides = [1, 1]} : vector<8x96xf32> to vector<8x16xf32>
    %71 = vector.extract_strided_slice %47 {offsets = [0, 48], sizes = [8, 16], strides = [1, 1]} : vector<8x96xf32> to vector<8x16xf32>
    %72 = vector.extract_strided_slice %47 {offsets = [0, 80], sizes = [8, 16], strides = [1, 1]} : vector<8x96xf32> to vector<8x16xf32>
    %cst_48 = arith.constant dense<0.000000e+00> : vector<8x8xf32>
    %73 = tpu.matmul %70, %71, %cst_48 {dimension_numbers = #tpu.dot_dimension_numbers<[1], [1], [0], [0], [0, 0, 1, 0], [], []>} : vector<8x16xf32>, vector<8x16xf32>, vector<8x8xf32> -> vector<8x8xf32>
    %cst_49 = arith.constant 2.500000e-01 : f32
    %74 = vector.broadcast %cst_49 : f32 to vector<8x8xf32>
    %75 = arith.mulf %73, %74 : vector<8x8xf32>
    %76 = arith.addf %75, %21 : vector<8x8xf32>
    %cst_50 = arith.constant dense<0xFF800000> : vector<8xf32>
    %77 = vector.multi_reduction <maximumf>, %76, %cst_50 [1] : vector<8x8xf32> to vector<8xf32>
    %78 = vector.shape_cast %77 : vector<8xf32> to vector<8x1xf32>
    %79 = vector.broadcast %78 : vector<8x1xf32> to vector<8x8xf32>
    %80 = arith.subf %76, %79 : vector<8x8xf32>
    %81 = math.exp %80 : vector<8x8xf32>
    %cst_51 = arith.constant dense<0.000000e+00> : vector<8xf32>
    %82 = vector.multi_reduction <add>, %81, %cst_51 [1] : vector<8x8xf32> to vector<8xf32>
    %83 = vector.shape_cast %82 : vector<8xf32> to vector<8x1xf32>
    %84 = tpu.reciprocal %83 {approx = true} : vector<8x1xf32> -> vector<8x1xf32>
    %85 = vector.broadcast %84 : vector<8x1xf32> to vector<8x8xf32>
    %86 = arith.mulf %81, %85 : vector<8x8xf32>
    %cst_52 = arith.constant dense<0.000000e+00> : vector<8x16xf32>
    %87 = tpu.matmul %86, %72, %cst_52 {dimension_numbers = #tpu.dot_dimension_numbers<[1], [0], [0], [1], [0, 0, 1, 1], [], []>} : vector<8x8xf32>, vector<8x16xf32>, vector<8x16xf32> -> vector<8x16xf32>
    %88 = vector.extract_strided_slice %4 {offsets = [16, 0], sizes = [16, 32], strides = [1, 1]} : vector<32x32xf32> to vector<16x32xf32>
    %cst_53 = arith.constant dense<0.000000e+00> : vector<8x32xf32>
    %89 = tpu.matmul %87, %88, %cst_53 {dimension_numbers = #tpu.dot_dimension_numbers<[1], [0], [0], [1], [0, 0, 1, 1], [], []>} : vector<8x16xf32>, vector<16x32xf32>, vector<8x32xf32> -> vector<8x32xf32>
    %90 = arith.addf %69, %89 : vector<8x32xf32>
    %91 = arith.addf %24, %90 : vector<8x32xf32>
    %92 = vector.broadcast %5 : vector<1x32xf32> to vector<8x32xf32>
    %93 = arith.addf %91, %92 : vector<8x32xf32>
    %cst_54 = arith.constant dense<0.000000e+00> : vector<8xf32>
    %94 = vector.multi_reduction <add>, %93, %cst_54 [1] : vector<8x32xf32> to vector<8xf32>
    %95 = vector.shape_cast %94 : vector<8xf32> to vector<8x1xf32>
    %cst_55 = arith.constant 3.200000e+01 : f32
    %96 = vector.broadcast %cst_55 : f32 to vector<8x1xf32>
    %97 = arith.divf %95, %96 : vector<8x1xf32>
    %98 = vector.broadcast %97 : vector<8x1xf32> to vector<8x32xf32>
    %99 = arith.subf %93, %98 : vector<8x32xf32>
    %100 = arith.mulf %99, %99 : vector<8x32xf32>
    %cst_56 = arith.constant dense<0.000000e+00> : vector<8xf32>
    %101 = vector.multi_reduction <add>, %100, %cst_56 [1] : vector<8x32xf32> to vector<8xf32>
    %102 = vector.shape_cast %101 : vector<8xf32> to vector<8x1xf32>
    %cst_57 = arith.constant 3.200000e+01 : f32
    %103 = vector.broadcast %cst_57 : f32 to vector<8x1xf32>
    %104 = arith.divf %102, %103 : vector<8x1xf32>
    %cst_58 = arith.constant 9.99999974E-6 : f32
    %105 = vector.broadcast %cst_58 : f32 to vector<8x1xf32>
    %106 = arith.addf %104, %105 : vector<8x1xf32>
    %107 = math.rsqrt %106 : vector<8x1xf32>
    %108 = vector.broadcast %107 : vector<8x1xf32> to vector<8x32xf32>
    %109 = arith.mulf %99, %108 : vector<8x32xf32>
    %110 = vector.broadcast %6 : vector<1x32xf32> to vector<8x32xf32>
    %111 = arith.mulf %109, %110 : vector<8x32xf32>
    %112 = vector.broadcast %7 : vector<1x32xf32> to vector<8x32xf32>
    %113 = arith.addf %111, %112 : vector<8x32xf32>
    %cst_59 = arith.constant dense<0.000000e+00> : vector<8x128xf32>
    %114 = tpu.matmul %113, %8, %cst_59 {dimension_numbers = #tpu.dot_dimension_numbers<[1], [0], [0], [1], [0, 0, 1, 1], [], []>} : vector<8x32xf32>, vector<32x128xf32>, vector<8x128xf32> -> vector<8x128xf32>
    %115 = vector.broadcast %9 : vector<1x128xf32> to vector<8x128xf32>
    %116 = arith.addf %114, %115 : vector<8x128xf32>
    %cst_60 = arith.constant 1.702000e+00 : f32
    %117 = vector.broadcast %cst_60 : f32 to vector<8x128xf32>
    %118 = arith.mulf %117, %116 : vector<8x128xf32>
    %119 = arith.negf %118 : vector<8x128xf32>
    %120 = math.exp %119 : vector<8x128xf32>
    %cst_61 = arith.constant 1.000000e+00 : f32
    %121 = vector.broadcast %cst_61 : f32 to vector<8x128xf32>
    %122 = arith.addf %121, %120 : vector<8x128xf32>
    %123 = arith.divf %121, %122 : vector<8x128xf32>
    %124 = arith.mulf %116, %123 : vector<8x128xf32>
    %cst_62 = arith.constant dense<0.000000e+00> : vector<8x32xf32>
    %125 = tpu.matmul %124, %10, %cst_62 {dimension_numbers = #tpu.dot_dimension_numbers<[1], [0], [0], [1], [0, 0, 1, 1], [], []>} : vector<8x128xf32>, vector<128x32xf32>, vector<8x32xf32> -> vector<8x32xf32>
    %126 = arith.addf %93, %125 : vector<8x32xf32>
    %127 = vector.broadcast %11 : vector<1x32xf32> to vector<8x32xf32>
    %128 = arith.addf %126, %127 : vector<8x32xf32>
    %cst_63 = arith.constant dense<0.000000e+00> : vector<8xf32>
    %129 = vector.multi_reduction <add>, %128, %cst_63 [1] : vector<8x32xf32> to vector<8xf32>
    %130 = vector.shape_cast %129 : vector<8xf32> to vector<8x1xf32>
    %cst_64 = arith.constant 3.200000e+01 : f32
    %131 = vector.broadcast %cst_64 : f32 to vector<8x1xf32>
    %132 = arith.divf %130, %131 : vector<8x1xf32>
    %133 = vector.broadcast %132 : vector<8x1xf32> to vector<8x32xf32>
    %134 = arith.subf %128, %133 : vector<8x32xf32>
    %135 = arith.mulf %134, %134 : vector<8x32xf32>
    %cst_65 = arith.constant dense<0.000000e+00> : vector<8xf32>
    %136 = vector.multi_reduction <add>, %135, %cst_65 [1] : vector<8x32xf32> to vector<8xf32>
    %137 = vector.shape_cast %136 : vector<8xf32> to vector<8x1xf32>
    %cst_66 = arith.constant 3.200000e+01 : f32
    %138 = vector.broadcast %cst_66 : f32 to vector<8x1xf32>
    %139 = arith.divf %137, %138 : vector<8x1xf32>
    %cst_67 = arith.constant 9.99999974E-6 : f32
    %140 = vector.broadcast %cst_67 : f32 to vector<8x1xf32>
    %141 = arith.addf %139, %140 : vector<8x1xf32>
    %142 = math.rsqrt %141 : vector<8x1xf32>
    %143 = vector.broadcast %142 : vector<8x1xf32> to vector<8x32xf32>
    %144 = arith.mulf %134, %143 : vector<8x32xf32>
    %145 = vector.broadcast %13 : vector<1x32xf32> to vector<8x32xf32>
    %146 = arith.mulf %144, %145 : vector<8x32xf32>
    %147 = vector.broadcast %14 : vector<1x32xf32> to vector<8x32xf32>
    %148 = arith.addf %146, %147 : vector<8x32xf32>
    %c0_68 = arith.constant 0 : index
    %c0_69 = arith.constant 0 : index
    %c0_70 = arith.constant 0 : index
    %149 = vector.load %arg17[%c0_68, %c0_69, %c0_70] : memref<4x1x8xf32, #tpu.memory_space<vmem>>, vector<1x1x8xf32>
    %150 = vector.shape_cast %149 : vector<1x1x8xf32> to vector<1x8xf32>
    %cst_71 = arith.constant dense<0.000000e+00> : vector<1x32xf32>
    %151 = tpu.matmul %150, %148, %cst_71 {dimension_numbers = #tpu.dot_dimension_numbers<[1], [0], [0], [1], [0, 0, 1, 1], [], []>} : vector<1x8xf32>, vector<8x32xf32>, vector<1x32xf32> -> vector<1x32xf32>
    %cst_72 = arith.constant dense<0.000000e+00> : vector<1x32xf32>
    %152 = tpu.matmul %151, %15, %cst_72 {dimension_numbers = #tpu.dot_dimension_numbers<[1], [0], [0], [1], [0, 0, 1, 1], [], []>} : vector<1x32xf32>, vector<32x32xf32>, vector<1x32xf32> -> vector<1x32xf32>
    %153 = arith.mulf %152, %152 : vector<1x32xf32>
    %cst_73 = arith.constant dense<0.000000e+00> : vector<1xf32>
    %154 = vector.multi_reduction <add>, %153, %cst_73 [1] : vector<1x32xf32> to vector<1xf32>
    %155 = vector.shape_cast %154 : vector<1xf32> to vector<1x1xf32>
    %156 = math.rsqrt %155 : vector<1x1xf32>
    %157 = vector.broadcast %156 : vector<1x1xf32> to vector<1x32xf32>
    %158 = arith.mulf %152, %157 : vector<1x32xf32>
    %c0_74 = arith.constant 0 : index
    %c0_75 = arith.constant 0 : index
    %c0_76 = arith.constant 0 : index
    %159 = vector.load %arg19[%c0_74, %c0_75, %c0_76] : memref<4x1x32xf32, #tpu.memory_space<vmem>>, vector<1x1x32xf32>
    %160 = vector.shape_cast %159 : vector<1x1x32xf32> to vector<1x32xf32>
    %161 = vector.shape_cast %158 : vector<1x32xf32> to vector<1x1x32xf32>
    tpu.vector_store %arg19[%c0_74, %c0_75, %c0_76], %161 {strides = array<i32>} : memref<4x1x32xf32, #tpu.memory_space<vmem>>, vector<1x1x32xf32>,
    %c1 = arith.constant 1 : index
    %c0_77 = arith.constant 0 : index
    %c0_78 = arith.constant 0 : index
    %162 = vector.load %arg1[%c1, %c0_77, %c0_78] : memref<4x8x32xf32, #tpu.memory_space<vmem>>, vector<1x8x32xf32>
    %163 = vector.shape_cast %162 : vector<1x8x32xf32> to vector<8x32xf32>
    %164 = arith.addf %163, %12 : vector<8x32xf32>
    %cst_79 = arith.constant dense<0.000000e+00> : vector<8xf32>
    %165 = vector.multi_reduction <add>, %164, %cst_79 [1] : vector<8x32xf32> to vector<8xf32>
    %166 = vector.shape_cast %165 : vector<8xf32> to vector<8x1xf32>
    %cst_80 = arith.constant 3.200000e+01 : f32
    %167 = vector.broadcast %cst_80 : f32 to vector<8x1xf32>
    %168 = arith.divf %166, %167 : vector<8x1xf32>
    %169 = vector.broadcast %168 : vector<8x1xf32> to vector<8x32xf32>
    %170 = arith.subf %164, %169 : vector<8x32xf32>
    %171 = arith.mulf %170, %170 : vector<8x32xf32>
    %cst_81 = arith.constant dense<0.000000e+00> : vector<8xf32>
    %172 = vector.multi_reduction <add>, %171, %cst_81 [1] : vector<8x32xf32> to vector<8xf32>
    %173 = vector.shape_cast %172 : vector<8xf32> to vector<8x1xf32>
    %cst_82 = arith.constant 3.200000e+01 : f32
    %174 = vector.broadcast %cst_82 : f32 to vector<8x1xf32>
    %175 = arith.divf %173, %174 : vector<8x1xf32>
    %cst_83 = arith.constant 9.99999974E-6 : f32
    %176 = vector.broadcast %cst_83 : f32 to vector<8x1xf32>
    %177 = arith.addf %175, %176 : vector<8x1xf32>
    %178 = math.rsqrt %177 : vector<8x1xf32>
    %179 = vector.broadcast %178 : vector<8x1xf32> to vector<8x32xf32>
    %180 = arith.mulf %170, %179 : vector<8x32xf32>
    %181 = vector.broadcast %0 : vector<1x32xf32> to vector<8x32xf32>
    %182 = arith.mulf %180, %181 : vector<8x32xf32>
    %183 = vector.broadcast %1 : vector<1x32xf32> to vector<8x32xf32>
    %184 = arith.addf %182, %183 : vector<8x32xf32>
    %cst_84 = arith.constant dense<0.000000e+00> : vector<8x96xf32>
    %185 = tpu.matmul %184, %2, %cst_84 {dimension_numbers = #tpu.dot_dimension_numbers<[1], [0], [0], [1], [0, 0, 1, 1], [], []>} : vector<8x32xf32>, vector<32x96xf32>, vector<8x96xf32> -> vector<8x96xf32>
    %186 = vector.broadcast %3 : vector<1x96xf32> to vector<8x96xf32>
    %187 = arith.addf %185, %186 : vector<8x96xf32>
    %cst_85 = arith.constant 0.000000e+00 : f32
    %188 = vector.broadcast %cst_85 : f32 to vector<8x32xf32>
    %189 = vector.extract_strided_slice %187 {offsets = [0, 0], sizes = [8, 16], strides = [1, 1]} : vector<8x96xf32> to vector<8x16xf32>
    %190 = vector.extract_strided_slice %187 {offsets = [0, 32], sizes = [8, 16], strides = [1, 1]} : vector<8x96xf32> to vector<8x16xf32>
    %191 = vector.extract_strided_slice %187 {offsets = [0, 64], sizes = [8, 16], strides = [1, 1]} : vector<8x96xf32> to vector<8x16xf32>
    %cst_86 = arith.constant dense<0.000000e+00> : vector<8x8xf32>
    %192 = tpu.matmul %189, %190, %cst_86 {dimension_numbers = #tpu.dot_dimension_numbers<[1], [1], [0], [0], [0, 0, 1, 0], [], []>} : vector<8x16xf32>, vector<8x16xf32>, vector<8x8xf32> -> vector<8x8xf32>
    %cst_87 = arith.constant 2.500000e-01 : f32
    %193 = vector.broadcast %cst_87 : f32 to vector<8x8xf32>
    %194 = arith.mulf %192, %193 : vector<8x8xf32>
    %195 = arith.addf %194, %21 : vector<8x8xf32>
    %cst_88 = arith.constant dense<0xFF800000> : vector<8xf32>
    %196 = vector.multi_reduction <maximumf>, %195, %cst_88 [1] : vector<8x8xf32> to vector<8xf32>
    %197 = vector.shape_cast %196 : vector<8xf32> to vector<8x1xf32>
    %198 = vector.broadcast %197 : vector<8x1xf32> to vector<8x8xf32>
    %199 = arith.subf %195, %198 : vector<8x8xf32>
    %200 = math.exp %199 : vector<8x8xf32>
    %cst_89 = arith.constant dense<0.000000e+00> : vector<8xf32>
    %201 = vector.multi_reduction <add>, %200, %cst_89 [1] : vector<8x8xf32> to vector<8xf32>
    %202 = vector.shape_cast %201 : vector<8xf32> to vector<8x1xf32>
    %203 = tpu.reciprocal %202 {approx = true} : vector<8x1xf32> -> vector<8x1xf32>
    %204 = vector.broadcast %203 : vector<8x1xf32> to vector<8x8xf32>
    %205 = arith.mulf %200, %204 : vector<8x8xf32>
    %cst_90 = arith.constant dense<0.000000e+00> : vector<8x16xf32>
    %206 = tpu.matmul %205, %191, %cst_90 {dimension_numbers = #tpu.dot_dimension_numbers<[1], [0], [0], [1], [0, 0, 1, 1], [], []>} : vector<8x8xf32>, vector<8x16xf32>, vector<8x16xf32> -> vector<8x16xf32>
    %207 = vector.extract_strided_slice %4 {offsets = [0, 0], sizes = [16, 32], strides = [1, 1]} : vector<32x32xf32> to vector<16x32xf32>
    %cst_91 = arith.constant dense<0.000000e+00> : vector<8x32xf32>
    %208 = tpu.matmul %206, %207, %cst_91 {dimension_numbers = #tpu.dot_dimension_numbers<[1], [0], [0], [1], [0, 0, 1, 1], [], []>} : vector<8x16xf32>, vector<16x32xf32>, vector<8x32xf32> -> vector<8x32xf32>
    %209 = arith.addf %188, %208 : vector<8x32xf32>
    %210 = vector.extract_strided_slice %187 {offsets = [0, 16], sizes = [8, 16], strides = [1, 1]} : vector<8x96xf32> to vector<8x16xf32>
    %211 = vector.extract_strided_slice %187 {offsets = [0, 48], sizes = [8, 16], strides = [1, 1]} : vector<8x96xf32> to vector<8x16xf32>
    %212 = vector.extract_strided_slice %187 {offsets = [0, 80], sizes = [8, 16], strides = [1, 1]} : vector<8x96xf32> to vector<8x16xf32>
    %cst_92 = arith.constant dense<0.000000e+00> : vector<8x8xf32>
    %213 = tpu.matmul %210, %211, %cst_92 {dimension_numbers = #tpu.dot_dimension_numbers<[1], [1], [0], [0], [0, 0, 1, 0], [], []>} : vector<8x16xf32>, vector<8x16xf32>, vector<8x8xf32> -> vector<8x8xf32>
    %cst_93 = arith.constant 2.500000e-01 : f32
    %214 = vector.broadcast %cst_93 : f32 to vector<8x8xf32>
    %215 = arith.mulf %213, %214 : vector<8x8xf32>
    %216 = arith.addf %215, %21 : vector<8x8xf32>
    %cst_94 = arith.constant dense<0xFF800000> : vector<8xf32>
    %217 = vector.multi_reduction <maximumf>, %216, %cst_94 [1] : vector<8x8xf32> to vector<8xf32>
    %218 = vector.shape_cast %217 : vector<8xf32> to vector<8x1xf32>
    %219 = vector.broadcast %218 : vector<8x1xf32> to vector<8x8xf32>
    %220 = arith.subf %216, %219 : vector<8x8xf32>
    %221 = math.exp %220 : vector<8x8xf32>
    %cst_95 = arith.constant dense<0.000000e+00> : vector<8xf32>
    %222 = vector.multi_reduction <add>, %221, %cst_95 [1] : vector<8x8xf32> to vector<8xf32>
    %223 = vector.shape_cast %222 : vector<8xf32> to vector<8x1xf32>
    %224 = tpu.reciprocal %223 {approx = true} : vector<8x1xf32> -> vector<8x1xf32>
    %225 = vector.broadcast %224 : vector<8x1xf32> to vector<8x8xf32>
    %226 = arith.mulf %221, %225 : vector<8x8xf32>
    %cst_96 = arith.constant dense<0.000000e+00> : vector<8x16xf32>
    %227 = tpu.matmul %226, %212, %cst_96 {dimension_numbers = #tpu.dot_dimension_numbers<[1], [0], [0], [1], [0, 0, 1, 1], [], []>} : vector<8x8xf32>, vector<8x16xf32>, vector<8x16xf32> -> vector<8x16xf32>
    %228 = vector.extract_strided_slice %4 {offsets = [16, 0], sizes = [16, 32], strides = [1, 1]} : vector<32x32xf32> to vector<16x32xf32>
    %cst_97 = arith.constant dense<0.000000e+00> : vector<8x32xf32>
    %229 = tpu.matmul %227, %228, %cst_97 {dimension_numbers = #tpu.dot_dimension_numbers<[1], [0], [0], [1], [0, 0, 1, 1], [], []>} : vector<8x16xf32>, vector<16x32xf32>, vector<8x32xf32> -> vector<8x32xf32>
    %230 = arith.addf %209, %229 : vector<8x32xf32>
    %231 = arith.addf %164, %230 : vector<8x32xf32>
    %232 = vector.broadcast %5 : vector<1x32xf32> to vector<8x32xf32>
    %233 = arith.addf %231, %232 : vector<8x32xf32>
    %cst_98 = arith.constant dense<0.000000e+00> : vector<8xf32>
    %234 = vector.multi_reduction <add>, %233, %cst_98 [1] : vector<8x32xf32> to vector<8xf32>
    %235 = vector.shape_cast %234 : vector<8xf32> to vector<8x1xf32>
    %cst_99 = arith.constant 3.200000e+01 : f32
    %236 = vector.broadcast %cst_99 : f32 to vector<8x1xf32>
    %237 = arith.divf %235, %236 : vector<8x1xf32>
    %238 = vector.broadcast %237 : vector<8x1xf32> to vector<8x32xf32>
    %239 = arith.subf %233, %238 : vector<8x32xf32>
    %240 = arith.mulf %239, %239 : vector<8x32xf32>
    %cst_100 = arith.constant dense<0.000000e+00> : vector<8xf32>
    %241 = vector.multi_reduction <add>, %240, %cst_100 [1] : vector<8x32xf32> to vector<8xf32>
    %242 = vector.shape_cast %241 : vector<8xf32> to vector<8x1xf32>
    %cst_101 = arith.constant 3.200000e+01 : f32
    %243 = vector.broadcast %cst_101 : f32 to vector<8x1xf32>
    %244 = arith.divf %242, %243 : vector<8x1xf32>
    %cst_102 = arith.constant 9.99999974E-6 : f32
    %245 = vector.broadcast %cst_102 : f32 to vector<8x1xf32>
    %246 = arith.addf %244, %245 : vector<8x1xf32>
    %247 = math.rsqrt %246 : vector<8x1xf32>
    %248 = vector.broadcast %247 : vector<8x1xf32> to vector<8x32xf32>
    %249 = arith.mulf %239, %248 : vector<8x32xf32>
    %250 = vector.broadcast %6 : vector<1x32xf32> to vector<8x32xf32>
    %251 = arith.mulf %249, %250 : vector<8x32xf32>
    %252 = vector.broadcast %7 : vector<1x32xf32> to vector<8x32xf32>
    %253 = arith.addf %251, %252 : vector<8x32xf32>
    %cst_103 = arith.constant dense<0.000000e+00> : vector<8x128xf32>
    %254 = tpu.matmul %253, %8, %cst_103 {dimension_numbers = #tpu.dot_dimension_numbers<[1], [0], [0], [1], [0, 0, 1, 1], [], []>} : vector<8x32xf32>, vector<32x128xf32>, vector<8x128xf32> -> vector<8x128xf32>
    %255 = vector.broadcast %9 : vector<1x128xf32> to vector<8x128xf32>
    %256 = arith.addf %254, %255 : vector<8x128xf32>
    %cst_104 = arith.constant 1.702000e+00 : f32
    %257 = vector.broadcast %cst_104 : f32 to vector<8x128xf32>
    %258 = arith.mulf %257, %256 : vector<8x128xf32>
    %259 = arith.negf %258 : vector<8x128xf32>
    %260 = math.exp %259 : vector<8x128xf32>
    %cst_105 = arith.constant 1.000000e+00 : f32
    %261 = vector.broadcast %cst_105 : f32 to vector<8x128xf32>
    %262 = arith.addf %261, %260 : vector<8x128xf32>
    %263 = arith.divf %261, %262 : vector<8x128xf32>
    %264 = arith.mulf %256, %263 : vector<8x128xf32>
    %cst_106 = arith.constant dense<0.000000e+00> : vector<8x32xf32>
    %265 = tpu.matmul %264, %10, %cst_106 {dimension_numbers = #tpu.dot_dimension_numbers<[1], [0], [0], [1], [0, 0, 1, 1], [], []>} : vector<8x128xf32>, vector<128x32xf32>, vector<8x32xf32> -> vector<8x32xf32>
    %266 = arith.addf %233, %265 : vector<8x32xf32>
    %267 = vector.broadcast %11 : vector<1x32xf32> to vector<8x32xf32>
    %268 = arith.addf %266, %267 : vector<8x32xf32>
    %cst_107 = arith.constant dense<0.000000e+00> : vector<8xf32>
    %269 = vector.multi_reduction <add>, %268, %cst_107 [1] : vector<8x32xf32> to vector<8xf32>
    %270 = vector.shape_cast %269 : vector<8xf32> to vector<8x1xf32>
    %cst_108 = arith.constant 3.200000e+01 : f32
    %271 = vector.broadcast %cst_108 : f32 to vector<8x1xf32>
    %272 = arith.divf %270, %271 : vector<8x1xf32>
    %273 = vector.broadcast %272 : vector<8x1xf32> to vector<8x32xf32>
    %274 = arith.subf %268, %273 : vector<8x32xf32>
    %275 = arith.mulf %274, %274 : vector<8x32xf32>
    %cst_109 = arith.constant dense<0.000000e+00> : vector<8xf32>
    %276 = vector.multi_reduction <add>, %275, %cst_109 [1] : vector<8x32xf32> to vector<8xf32>
    %277 = vector.shape_cast %276 : vector<8xf32> to vector<8x1xf32>
    %cst_110 = arith.constant 3.200000e+01 : f32
    %278 = vector.broadcast %cst_110 : f32 to vector<8x1xf32>
    %279 = arith.divf %277, %278 : vector<8x1xf32>
    %cst_111 = arith.constant 9.99999974E-6 : f32
    %280 = vector.broadcast %cst_111 : f32 to vector<8x1xf32>
    %281 = arith.addf %279, %280 : vector<8x1xf32>
    %282 = math.rsqrt %281 : vector<8x1xf32>
    %283 = vector.broadcast %282 : vector<8x1xf32> to vector<8x32xf32>
    %284 = arith.mulf %274, %283 : vector<8x32xf32>
    %285 = vector.broadcast %13 : vector<1x32xf32> to vector<8x32xf32>
    %286 = arith.mulf %284, %285 : vector<8x32xf32>
    %287 = vector.broadcast %14 : vector<1x32xf32> to vector<8x32xf32>
    %288 = arith.addf %286, %287 : vector<8x32xf32>
    %c1_112 = arith.constant 1 : index
    %c0_113 = arith.constant 0 : index
    %c0_114 = arith.constant 0 : index
    %289 = vector.load %arg17[%c1_112, %c0_113, %c0_114] : memref<4x1x8xf32, #tpu.memory_space<vmem>>, vector<1x1x8xf32>
    %290 = vector.shape_cast %289 : vector<1x1x8xf32> to vector<1x8xf32>
    %cst_115 = arith.constant dense<0.000000e+00> : vector<1x32xf32>
    %291 = tpu.matmul %290, %288, %cst_115 {dimension_numbers = #tpu.dot_dimension_numbers<[1], [0], [0], [1], [0, 0, 1, 1], [], []>} : vector<1x8xf32>, vector<8x32xf32>, vector<1x32xf32> -> vector<1x32xf32>
    %cst_116 = arith.constant dense<0.000000e+00> : vector<1x32xf32>
    %292 = tpu.matmul %291, %15, %cst_116 {dimension_numbers = #tpu.dot_dimension_numbers<[1], [0], [0], [1], [0, 0, 1, 1], [], []>} : vector<1x32xf32>, vector<32x32xf32>, vector<1x32xf32> -> vector<1x32xf32>
    %293 = arith.mulf %292, %292 : vector<1x32xf32>
    %cst_117 = arith.constant dense<0.000000e+00> : vector<1xf32>
    %294 = vector.multi_reduction <add>, %293, %cst_117 [1] : vector<1x32xf32> to vector<1xf32>
    %295 = vector.shape_cast %294 : vector<1xf32> to vector<1x1xf32>
    %296 = math.rsqrt %295 : vector<1x1xf32>
    %297 = vector.broadcast %296 : vector<1x1xf32> to vector<1x32xf32>
    %298 = arith.mulf %292, %297 : vector<1x32xf32>
    %c1_118 = arith.constant 1 : index
    %c0_119 = arith.constant 0 : index
    %c0_120 = arith.constant 0 : index
    %299 = vector.load %arg19[%c1_118, %c0_119, %c0_120] : memref<4x1x32xf32, #tpu.memory_space<vmem>>, vector<1x1x32xf32>
    %300 = vector.shape_cast %299 : vector<1x1x32xf32> to vector<1x32xf32>
    %301 = vector.shape_cast %298 : vector<1x32xf32> to vector<1x1x32xf32>
    tpu.vector_store %arg19[%c1_118, %c0_119, %c0_120], %301 {strides = array<i32>} : memref<4x1x32xf32, #tpu.memory_space<vmem>>, vector<1x1x32xf32>,
    %c2 = arith.constant 2 : index
    %c0_121 = arith.constant 0 : index
    %c0_122 = arith.constant 0 : index
    %302 = vector.load %arg1[%c2, %c0_121, %c0_122] : memref<4x8x32xf32, #tpu.memory_space<vmem>>, vector<1x8x32xf32>
    %303 = vector.shape_cast %302 : vector<1x8x32xf32> to vector<8x32xf32>
    %304 = arith.addf %303, %12 : vector<8x32xf32>
    %cst_123 = arith.constant dense<0.000000e+00> : vector<8xf32>
    %305 = vector.multi_reduction <add>, %304, %cst_123 [1] : vector<8x32xf32> to vector<8xf32>
    %306 = vector.shape_cast %305 : vector<8xf32> to vector<8x1xf32>
    %cst_124 = arith.constant 3.200000e+01 : f32
    %307 = vector.broadcast %cst_124 : f32 to vector<8x1xf32>
    %308 = arith.divf %306, %307 : vector<8x1xf32>
    %309 = vector.broadcast %308 : vector<8x1xf32> to vector<8x32xf32>
    %310 = arith.subf %304, %309 : vector<8x32xf32>
    %311 = arith.mulf %310, %310 : vector<8x32xf32>
    %cst_125 = arith.constant dense<0.000000e+00> : vector<8xf32>
    %312 = vector.multi_reduction <add>, %311, %cst_125 [1] : vector<8x32xf32> to vector<8xf32>
    %313 = vector.shape_cast %312 : vector<8xf32> to vector<8x1xf32>
    %cst_126 = arith.constant 3.200000e+01 : f32
    %314 = vector.broadcast %cst_126 : f32 to vector<8x1xf32>
    %315 = arith.divf %313, %314 : vector<8x1xf32>
    %cst_127 = arith.constant 9.99999974E-6 : f32
    %316 = vector.broadcast %cst_127 : f32 to vector<8x1xf32>
    %317 = arith.addf %315, %316 : vector<8x1xf32>
    %318 = math.rsqrt %317 : vector<8x1xf32>
    %319 = vector.broadcast %318 : vector<8x1xf32> to vector<8x32xf32>
    %320 = arith.mulf %310, %319 : vector<8x32xf32>
    %321 = vector.broadcast %0 : vector<1x32xf32> to vector<8x32xf32>
    %322 = arith.mulf %320, %321 : vector<8x32xf32>
    %323 = vector.broadcast %1 : vector<1x32xf32> to vector<8x32xf32>
    %324 = arith.addf %322, %323 : vector<8x32xf32>
    %cst_128 = arith.constant dense<0.000000e+00> : vector<8x96xf32>
    %325 = tpu.matmul %324, %2, %cst_128 {dimension_numbers = #tpu.dot_dimension_numbers<[1], [0], [0], [1], [0, 0, 1, 1], [], []>} : vector<8x32xf32>, vector<32x96xf32>, vector<8x96xf32> -> vector<8x96xf32>
    %326 = vector.broadcast %3 : vector<1x96xf32> to vector<8x96xf32>
    %327 = arith.addf %325, %326 : vector<8x96xf32>
    %cst_129 = arith.constant 0.000000e+00 : f32
    %328 = vector.broadcast %cst_129 : f32 to vector<8x32xf32>
    %329 = vector.extract_strided_slice %327 {offsets = [0, 0], sizes = [8, 16], strides = [1, 1]} : vector<8x96xf32> to vector<8x16xf32>
    %330 = vector.extract_strided_slice %327 {offsets = [0, 32], sizes = [8, 16], strides = [1, 1]} : vector<8x96xf32> to vector<8x16xf32>
    %331 = vector.extract_strided_slice %327 {offsets = [0, 64], sizes = [8, 16], strides = [1, 1]} : vector<8x96xf32> to vector<8x16xf32>
    %cst_130 = arith.constant dense<0.000000e+00> : vector<8x8xf32>
    %332 = tpu.matmul %329, %330, %cst_130 {dimension_numbers = #tpu.dot_dimension_numbers<[1], [1], [0], [0], [0, 0, 1, 0], [], []>} : vector<8x16xf32>, vector<8x16xf32>, vector<8x8xf32> -> vector<8x8xf32>
    %cst_131 = arith.constant 2.500000e-01 : f32
    %333 = vector.broadcast %cst_131 : f32 to vector<8x8xf32>
    %334 = arith.mulf %332, %333 : vector<8x8xf32>
    %335 = arith.addf %334, %21 : vector<8x8xf32>
    %cst_132 = arith.constant dense<0xFF800000> : vector<8xf32>
    %336 = vector.multi_reduction <maximumf>, %335, %cst_132 [1] : vector<8x8xf32> to vector<8xf32>
    %337 = vector.shape_cast %336 : vector<8xf32> to vector<8x1xf32>
    %338 = vector.broadcast %337 : vector<8x1xf32> to vector<8x8xf32>
    %339 = arith.subf %335, %338 : vector<8x8xf32>
    %340 = math.exp %339 : vector<8x8xf32>
    %cst_133 = arith.constant dense<0.000000e+00> : vector<8xf32>
    %341 = vector.multi_reduction <add>, %340, %cst_133 [1] : vector<8x8xf32> to vector<8xf32>
    %342 = vector.shape_cast %341 : vector<8xf32> to vector<8x1xf32>
    %343 = tpu.reciprocal %342 {approx = true} : vector<8x1xf32> -> vector<8x1xf32>
    %344 = vector.broadcast %343 : vector<8x1xf32> to vector<8x8xf32>
    %345 = arith.mulf %340, %344 : vector<8x8xf32>
    %cst_134 = arith.constant dense<0.000000e+00> : vector<8x16xf32>
    %346 = tpu.matmul %345, %331, %cst_134 {dimension_numbers = #tpu.dot_dimension_numbers<[1], [0], [0], [1], [0, 0, 1, 1], [], []>} : vector<8x8xf32>, vector<8x16xf32>, vector<8x16xf32> -> vector<8x16xf32>
    %347 = vector.extract_strided_slice %4 {offsets = [0, 0], sizes = [16, 32], strides = [1, 1]} : vector<32x32xf32> to vector<16x32xf32>
    %cst_135 = arith.constant dense<0.000000e+00> : vector<8x32xf32>
    %348 = tpu.matmul %346, %347, %cst_135 {dimension_numbers = #tpu.dot_dimension_numbers<[1], [0], [0], [1], [0, 0, 1, 1], [], []>} : vector<8x16xf32>, vector<16x32xf32>, vector<8x32xf32> -> vector<8x32xf32>
    %349 = arith.addf %328, %348 : vector<8x32xf32>
    %350 = vector.extract_strided_slice %327 {offsets = [0, 16], sizes = [8, 16], strides = [1, 1]} : vector<8x96xf32> to vector<8x16xf32>
    %351 = vector.extract_strided_slice %327 {offsets = [0, 48], sizes = [8, 16], strides = [1, 1]} : vector<8x96xf32> to vector<8x16xf32>
    %352 = vector.extract_strided_slice %327 {offsets = [0, 80], sizes = [8, 16], strides = [1, 1]} : vector<8x96xf32> to vector<8x16xf32>
    %cst_136 = arith.constant dense<0.000000e+00> : vector<8x8xf32>
    %353 = tpu.matmul %350, %351, %cst_136 {dimension_numbers = #tpu.dot_dimension_numbers<[1], [1], [0], [0], [0, 0, 1, 0], [], []>} : vector<8x16xf32>, vector<8x16xf32>, vector<8x8xf32> -> vector<8x8xf32>
    %cst_137 = arith.constant 2.500000e-01 : f32
    %354 = vector.broadcast %cst_137 : f32 to vector<8x8xf32>
    %355 = arith.mulf %353, %354 : vector<8x8xf32>
    %356 = arith.addf %355, %21 : vector<8x8xf32>
    %cst_138 = arith.constant dense<0xFF800000> : vector<8xf32>
    %357 = vector.multi_reduction <maximumf>, %356, %cst_138 [1] : vector<8x8xf32> to vector<8xf32>
    %358 = vector.shape_cast %357 : vector<8xf32> to vector<8x1xf32>
    %359 = vector.broadcast %358 : vector<8x1xf32> to vector<8x8xf32>
    %360 = arith.subf %356, %359 : vector<8x8xf32>
    %361 = math.exp %360 : vector<8x8xf32>
    %cst_139 = arith.constant dense<0.000000e+00> : vector<8xf32>
    %362 = vector.multi_reduction <add>, %361, %cst_139 [1] : vector<8x8xf32> to vector<8xf32>
    %363 = vector.shape_cast %362 : vector<8xf32> to vector<8x1xf32>
    %364 = tpu.reciprocal %363 {approx = true} : vector<8x1xf32> -> vector<8x1xf32>
    %365 = vector.broadcast %364 : vector<8x1xf32> to vector<8x8xf32>
    %366 = arith.mulf %361, %365 : vector<8x8xf32>
    %cst_140 = arith.constant dense<0.000000e+00> : vector<8x16xf32>
    %367 = tpu.matmul %366, %352, %cst_140 {dimension_numbers = #tpu.dot_dimension_numbers<[1], [0], [0], [1], [0, 0, 1, 1], [], []>} : vector<8x8xf32>, vector<8x16xf32>, vector<8x16xf32> -> vector<8x16xf32>
    %368 = vector.extract_strided_slice %4 {offsets = [16, 0], sizes = [16, 32], strides = [1, 1]} : vector<32x32xf32> to vector<16x32xf32>
    %cst_141 = arith.constant dense<0.000000e+00> : vector<8x32xf32>
    %369 = tpu.matmul %367, %368, %cst_141 {dimension_numbers = #tpu.dot_dimension_numbers<[1], [0], [0], [1], [0, 0, 1, 1], [], []>} : vector<8x16xf32>, vector<16x32xf32>, vector<8x32xf32> -> vector<8x32xf32>
    %370 = arith.addf %349, %369 : vector<8x32xf32>
    %371 = arith.addf %304, %370 : vector<8x32xf32>
    %372 = vector.broadcast %5 : vector<1x32xf32> to vector<8x32xf32>
    %373 = arith.addf %371, %372 : vector<8x32xf32>
    %cst_142 = arith.constant dense<0.000000e+00> : vector<8xf32>
    %374 = vector.multi_reduction <add>, %373, %cst_142 [1] : vector<8x32xf32> to vector<8xf32>
    %375 = vector.shape_cast %374 : vector<8xf32> to vector<8x1xf32>
    %cst_143 = arith.constant 3.200000e+01 : f32
    %376 = vector.broadcast %cst_143 : f32 to vector<8x1xf32>
    %377 = arith.divf %375, %376 : vector<8x1xf32>
    %378 = vector.broadcast %377 : vector<8x1xf32> to vector<8x32xf32>
    %379 = arith.subf %373, %378 : vector<8x32xf32>
    %380 = arith.mulf %379, %379 : vector<8x32xf32>
    %cst_144 = arith.constant dense<0.000000e+00> : vector<8xf32>
    %381 = vector.multi_reduction <add>, %380, %cst_144 [1] : vector<8x32xf32> to vector<8xf32>
    %382 = vector.shape_cast %381 : vector<8xf32> to vector<8x1xf32>
    %cst_145 = arith.constant 3.200000e+01 : f32
    %383 = vector.broadcast %cst_145 : f32 to vector<8x1xf32>
    %384 = arith.divf %382, %383 : vector<8x1xf32>
    %cst_146 = arith.constant 9.99999974E-6 : f32
    %385 = vector.broadcast %cst_146 : f32 to vector<8x1xf32>
    %386 = arith.addf %384, %385 : vector<8x1xf32>
    %387 = math.rsqrt %386 : vector<8x1xf32>
    %388 = vector.broadcast %387 : vector<8x1xf32> to vector<8x32xf32>
    %389 = arith.mulf %379, %388 : vector<8x32xf32>
    %390 = vector.broadcast %6 : vector<1x32xf32> to vector<8x32xf32>
    %391 = arith.mulf %389, %390 : vector<8x32xf32>
    %392 = vector.broadcast %7 : vector<1x32xf32> to vector<8x32xf32>
    %393 = arith.addf %391, %392 : vector<8x32xf32>
    %cst_147 = arith.constant dense<0.000000e+00> : vector<8x128xf32>
    %394 = tpu.matmul %393, %8, %cst_147 {dimension_numbers = #tpu.dot_dimension_numbers<[1], [0], [0], [1], [0, 0, 1, 1], [], []>} : vector<8x32xf32>, vector<32x128xf32>, vector<8x128xf32> -> vector<8x128xf32>
    %395 = vector.broadcast %9 : vector<1x128xf32> to vector<8x128xf32>
    %396 = arith.addf %394, %395 : vector<8x128xf32>
    %cst_148 = arith.constant 1.702000e+00 : f32
    %397 = vector.broadcast %cst_148 : f32 to vector<8x128xf32>
    %398 = arith.mulf %397, %396 : vector<8x128xf32>
    %399 = arith.negf %398 : vector<8x128xf32>
    %400 = math.exp %399 : vector<8x128xf32>
    %cst_149 = arith.constant 1.000000e+00 : f32
    %401 = vector.broadcast %cst_149 : f32 to vector<8x128xf32>
    %402 = arith.addf %401, %400 : vector<8x128xf32>
    %403 = arith.divf %401, %402 : vector<8x128xf32>
    %404 = arith.mulf %396, %403 : vector<8x128xf32>
    %cst_150 = arith.constant dense<0.000000e+00> : vector<8x32xf32>
    %405 = tpu.matmul %404, %10, %cst_150 {dimension_numbers = #tpu.dot_dimension_numbers<[1], [0], [0], [1], [0, 0, 1, 1], [], []>} : vector<8x128xf32>, vector<128x32xf32>, vector<8x32xf32> -> vector<8x32xf32>
    %406 = arith.addf %373, %405 : vector<8x32xf32>
    %407 = vector.broadcast %11 : vector<1x32xf32> to vector<8x32xf32>
    %408 = arith.addf %406, %407 : vector<8x32xf32>
    %cst_151 = arith.constant dense<0.000000e+00> : vector<8xf32>
    %409 = vector.multi_reduction <add>, %408, %cst_151 [1] : vector<8x32xf32> to vector<8xf32>
    %410 = vector.shape_cast %409 : vector<8xf32> to vector<8x1xf32>
    %cst_152 = arith.constant 3.200000e+01 : f32
    %411 = vector.broadcast %cst_152 : f32 to vector<8x1xf32>
    %412 = arith.divf %410, %411 : vector<8x1xf32>
    %413 = vector.broadcast %412 : vector<8x1xf32> to vector<8x32xf32>
    %414 = arith.subf %408, %413 : vector<8x32xf32>
    %415 = arith.mulf %414, %414 : vector<8x32xf32>
    %cst_153 = arith.constant dense<0.000000e+00> : vector<8xf32>
    %416 = vector.multi_reduction <add>, %415, %cst_153 [1] : vector<8x32xf32> to vector<8xf32>
    %417 = vector.shape_cast %416 : vector<8xf32> to vector<8x1xf32>
    %cst_154 = arith.constant 3.200000e+01 : f32
    %418 = vector.broadcast %cst_154 : f32 to vector<8x1xf32>
    %419 = arith.divf %417, %418 : vector<8x1xf32>
    %cst_155 = arith.constant 9.99999974E-6 : f32
    %420 = vector.broadcast %cst_155 : f32 to vector<8x1xf32>
    %421 = arith.addf %419, %420 : vector<8x1xf32>
    %422 = math.rsqrt %421 : vector<8x1xf32>
    %423 = vector.broadcast %422 : vector<8x1xf32> to vector<8x32xf32>
    %424 = arith.mulf %414, %423 : vector<8x32xf32>
    %425 = vector.broadcast %13 : vector<1x32xf32> to vector<8x32xf32>
    %426 = arith.mulf %424, %425 : vector<8x32xf32>
    %427 = vector.broadcast %14 : vector<1x32xf32> to vector<8x32xf32>
    %428 = arith.addf %426, %427 : vector<8x32xf32>
    %c2_156 = arith.constant 2 : index
    %c0_157 = arith.constant 0 : index
    %c0_158 = arith.constant 0 : index
    %429 = vector.load %arg17[%c2_156, %c0_157, %c0_158] : memref<4x1x8xf32, #tpu.memory_space<vmem>>, vector<1x1x8xf32>
    %430 = vector.shape_cast %429 : vector<1x1x8xf32> to vector<1x8xf32>
    %cst_159 = arith.constant dense<0.000000e+00> : vector<1x32xf32>
    %431 = tpu.matmul %430, %428, %cst_159 {dimension_numbers = #tpu.dot_dimension_numbers<[1], [0], [0], [1], [0, 0, 1, 1], [], []>} : vector<1x8xf32>, vector<8x32xf32>, vector<1x32xf32> -> vector<1x32xf32>
    %cst_160 = arith.constant dense<0.000000e+00> : vector<1x32xf32>
    %432 = tpu.matmul %431, %15, %cst_160 {dimension_numbers = #tpu.dot_dimension_numbers<[1], [0], [0], [1], [0, 0, 1, 1], [], []>} : vector<1x32xf32>, vector<32x32xf32>, vector<1x32xf32> -> vector<1x32xf32>
    %433 = arith.mulf %432, %432 : vector<1x32xf32>
    %cst_161 = arith.constant dense<0.000000e+00> : vector<1xf32>
    %434 = vector.multi_reduction <add>, %433, %cst_161 [1] : vector<1x32xf32> to vector<1xf32>
    %435 = vector.shape_cast %434 : vector<1xf32> to vector<1x1xf32>
    %436 = math.rsqrt %435 : vector<1x1xf32>
    %437 = vector.broadcast %436 : vector<1x1xf32> to vector<1x32xf32>
    %438 = arith.mulf %432, %437 : vector<1x32xf32>
    %c2_162 = arith.constant 2 : index
    %c0_163 = arith.constant 0 : index
    %c0_164 = arith.constant 0 : index
    %439 = vector.load %arg19[%c2_162, %c0_163, %c0_164] : memref<4x1x32xf32, #tpu.memory_space<vmem>>, vector<1x1x32xf32>
    %440 = vector.shape_cast %439 : vector<1x1x32xf32> to vector<1x32xf32>
    %441 = vector.shape_cast %438 : vector<1x32xf32> to vector<1x1x32xf32>
    tpu.vector_store %arg19[%c2_162, %c0_163, %c0_164], %441 {strides = array<i32>} : memref<4x1x32xf32, #tpu.memory_space<vmem>>, vector<1x1x32xf32>,
    %c3 = arith.constant 3 : index
    %c0_165 = arith.constant 0 : index
    %c0_166 = arith.constant 0 : index
    %442 = vector.load %arg1[%c3, %c0_165, %c0_166] : memref<4x8x32xf32, #tpu.memory_space<vmem>>, vector<1x8x32xf32>
    %443 = vector.shape_cast %442 : vector<1x8x32xf32> to vector<8x32xf32>
    %444 = arith.addf %443, %12 : vector<8x32xf32>
    %cst_167 = arith.constant dense<0.000000e+00> : vector<8xf32>
    %445 = vector.multi_reduction <add>, %444, %cst_167 [1] : vector<8x32xf32> to vector<8xf32>
    %446 = vector.shape_cast %445 : vector<8xf32> to vector<8x1xf32>
    %cst_168 = arith.constant 3.200000e+01 : f32
    %447 = vector.broadcast %cst_168 : f32 to vector<8x1xf32>
    %448 = arith.divf %446, %447 : vector<8x1xf32>
    %449 = vector.broadcast %448 : vector<8x1xf32> to vector<8x32xf32>
    %450 = arith.subf %444, %449 : vector<8x32xf32>
    %451 = arith.mulf %450, %450 : vector<8x32xf32>
    %cst_169 = arith.constant dense<0.000000e+00> : vector<8xf32>
    %452 = vector.multi_reduction <add>, %451, %cst_169 [1] : vector<8x32xf32> to vector<8xf32>
    %453 = vector.shape_cast %452 : vector<8xf32> to vector<8x1xf32>
    %cst_170 = arith.constant 3.200000e+01 : f32
    %454 = vector.broadcast %cst_170 : f32 to vector<8x1xf32>
    %455 = arith.divf %453, %454 : vector<8x1xf32>
    %cst_171 = arith.constant 9.99999974E-6 : f32
    %456 = vector.broadcast %cst_171 : f32 to vector<8x1xf32>
    %457 = arith.addf %455, %456 : vector<8x1xf32>
    %458 = math.rsqrt %457 : vector<8x1xf32>
    %459 = vector.broadcast %458 : vector<8x1xf32> to vector<8x32xf32>
    %460 = arith.mulf %450, %459 : vector<8x32xf32>
    %461 = vector.broadcast %0 : vector<1x32xf32> to vector<8x32xf32>
    %462 = arith.mulf %460, %461 : vector<8x32xf32>
    %463 = vector.broadcast %1 : vector<1x32xf32> to vector<8x32xf32>
    %464 = arith.addf %462, %463 : vector<8x32xf32>
    %cst_172 = arith.constant dense<0.000000e+00> : vector<8x96xf32>
    %465 = tpu.matmul %464, %2, %cst_172 {dimension_numbers = #tpu.dot_dimension_numbers<[1], [0], [0], [1], [0, 0, 1, 1], [], []>} : vector<8x32xf32>, vector<32x96xf32>, vector<8x96xf32> -> vector<8x96xf32>
    %466 = vector.broadcast %3 : vector<1x96xf32> to vector<8x96xf32>
    %467 = arith.addf %465, %466 : vector<8x96xf32>
    %cst_173 = arith.constant 0.000000e+00 : f32
    %468 = vector.broadcast %cst_173 : f32 to vector<8x32xf32>
    %469 = vector.extract_strided_slice %467 {offsets = [0, 0], sizes = [8, 16], strides = [1, 1]} : vector<8x96xf32> to vector<8x16xf32>
    %470 = vector.extract_strided_slice %467 {offsets = [0, 32], sizes = [8, 16], strides = [1, 1]} : vector<8x96xf32> to vector<8x16xf32>
    %471 = vector.extract_strided_slice %467 {offsets = [0, 64], sizes = [8, 16], strides = [1, 1]} : vector<8x96xf32> to vector<8x16xf32>
    %cst_174 = arith.constant dense<0.000000e+00> : vector<8x8xf32>
    %472 = tpu.matmul %469, %470, %cst_174 {dimension_numbers = #tpu.dot_dimension_numbers<[1], [1], [0], [0], [0, 0, 1, 0], [], []>} : vector<8x16xf32>, vector<8x16xf32>, vector<8x8xf32> -> vector<8x8xf32>
    %cst_175 = arith.constant 2.500000e-01 : f32
    %473 = vector.broadcast %cst_175 : f32 to vector<8x8xf32>
    %474 = arith.mulf %472, %473 : vector<8x8xf32>
    %475 = arith.addf %474, %21 : vector<8x8xf32>
    %cst_176 = arith.constant dense<0xFF800000> : vector<8xf32>
    %476 = vector.multi_reduction <maximumf>, %475, %cst_176 [1] : vector<8x8xf32> to vector<8xf32>
    %477 = vector.shape_cast %476 : vector<8xf32> to vector<8x1xf32>
    %478 = vector.broadcast %477 : vector<8x1xf32> to vector<8x8xf32>
    %479 = arith.subf %475, %478 : vector<8x8xf32>
    %480 = math.exp %479 : vector<8x8xf32>
    %cst_177 = arith.constant dense<0.000000e+00> : vector<8xf32>
    %481 = vector.multi_reduction <add>, %480, %cst_177 [1] : vector<8x8xf32> to vector<8xf32>
    %482 = vector.shape_cast %481 : vector<8xf32> to vector<8x1xf32>
    %483 = tpu.reciprocal %482 {approx = true} : vector<8x1xf32> -> vector<8x1xf32>
    %484 = vector.broadcast %483 : vector<8x1xf32> to vector<8x8xf32>
    %485 = arith.mulf %480, %484 : vector<8x8xf32>
    %cst_178 = arith.constant dense<0.000000e+00> : vector<8x16xf32>
    %486 = tpu.matmul %485, %471, %cst_178 {dimension_numbers = #tpu.dot_dimension_numbers<[1], [0], [0], [1], [0, 0, 1, 1], [], []>} : vector<8x8xf32>, vector<8x16xf32>, vector<8x16xf32> -> vector<8x16xf32>
    %487 = vector.extract_strided_slice %4 {offsets = [0, 0], sizes = [16, 32], strides = [1, 1]} : vector<32x32xf32> to vector<16x32xf32>
    %cst_179 = arith.constant dense<0.000000e+00> : vector<8x32xf32>
    %488 = tpu.matmul %486, %487, %cst_179 {dimension_numbers = #tpu.dot_dimension_numbers<[1], [0], [0], [1], [0, 0, 1, 1], [], []>} : vector<8x16xf32>, vector<16x32xf32>, vector<8x32xf32> -> vector<8x32xf32>
    %489 = arith.addf %468, %488 : vector<8x32xf32>
    %490 = vector.extract_strided_slice %467 {offsets = [0, 16], sizes = [8, 16], strides = [1, 1]} : vector<8x96xf32> to vector<8x16xf32>
    %491 = vector.extract_strided_slice %467 {offsets = [0, 48], sizes = [8, 16], strides = [1, 1]} : vector<8x96xf32> to vector<8x16xf32>
    %492 = vector.extract_strided_slice %467 {offsets = [0, 80], sizes = [8, 16], strides = [1, 1]} : vector<8x96xf32> to vector<8x16xf32>
    %cst_180 = arith.constant dense<0.000000e+00> : vector<8x8xf32>
    %493 = tpu.matmul %490, %491, %cst_180 {dimension_numbers = #tpu.dot_dimension_numbers<[1], [1], [0], [0], [0, 0, 1, 0], [], []>} : vector<8x16xf32>, vector<8x16xf32>, vector<8x8xf32> -> vector<8x8xf32>
    %cst_181 = arith.constant 2.500000e-01 : f32
    %494 = vector.broadcast %cst_181 : f32 to vector<8x8xf32>
    %495 = arith.mulf %493, %494 : vector<8x8xf32>
    %496 = arith.addf %495, %21 : vector<8x8xf32>
    %cst_182 = arith.constant dense<0xFF800000> : vector<8xf32>
    %497 = vector.multi_reduction <maximumf>, %496, %cst_182 [1] : vector<8x8xf32> to vector<8xf32>
    %498 = vector.shape_cast %497 : vector<8xf32> to vector<8x1xf32>
    %499 = vector.broadcast %498 : vector<8x1xf32> to vector<8x8xf32>
    %500 = arith.subf %496, %499 : vector<8x8xf32>
    %501 = math.exp %500 : vector<8x8xf32>
    %cst_183 = arith.constant dense<0.000000e+00> : vector<8xf32>
    %502 = vector.multi_reduction <add>, %501, %cst_183 [1] : vector<8x8xf32> to vector<8xf32>
    %503 = vector.shape_cast %502 : vector<8xf32> to vector<8x1xf32>
    %504 = tpu.reciprocal %503 {approx = true} : vector<8x1xf32> -> vector<8x1xf32>
    %505 = vector.broadcast %504 : vector<8x1xf32> to vector<8x8xf32>
    %506 = arith.mulf %501, %505 : vector<8x8xf32>
    %cst_184 = arith.constant dense<0.000000e+00> : vector<8x16xf32>
    %507 = tpu.matmul %506, %492, %cst_184 {dimension_numbers = #tpu.dot_dimension_numbers<[1], [0], [0], [1], [0, 0, 1, 1], [], []>} : vector<8x8xf32>, vector<8x16xf32>, vector<8x16xf32> -> vector<8x16xf32>
    %508 = vector.extract_strided_slice %4 {offsets = [16, 0], sizes = [16, 32], strides = [1, 1]} : vector<32x32xf32> to vector<16x32xf32>
    %cst_185 = arith.constant dense<0.000000e+00> : vector<8x32xf32>
    %509 = tpu.matmul %507, %508, %cst_185 {dimension_numbers = #tpu.dot_dimension_numbers<[1], [0], [0], [1], [0, 0, 1, 1], [], []>} : vector<8x16xf32>, vector<16x32xf32>, vector<8x32xf32> -> vector<8x32xf32>
    %510 = arith.addf %489, %509 : vector<8x32xf32>
    %511 = arith.addf %444, %510 : vector<8x32xf32>
    %512 = vector.broadcast %5 : vector<1x32xf32> to vector<8x32xf32>
    %513 = arith.addf %511, %512 : vector<8x32xf32>
    %cst_186 = arith.constant dense<0.000000e+00> : vector<8xf32>
    %514 = vector.multi_reduction <add>, %513, %cst_186 [1] : vector<8x32xf32> to vector<8xf32>
    %515 = vector.shape_cast %514 : vector<8xf32> to vector<8x1xf32>
    %cst_187 = arith.constant 3.200000e+01 : f32
    %516 = vector.broadcast %cst_187 : f32 to vector<8x1xf32>
    %517 = arith.divf %515, %516 : vector<8x1xf32>
    %518 = vector.broadcast %517 : vector<8x1xf32> to vector<8x32xf32>
    %519 = arith.subf %513, %518 : vector<8x32xf32>
    %520 = arith.mulf %519, %519 : vector<8x32xf32>
    %cst_188 = arith.constant dense<0.000000e+00> : vector<8xf32>
    %521 = vector.multi_reduction <add>, %520, %cst_188 [1] : vector<8x32xf32> to vector<8xf32>
    %522 = vector.shape_cast %521 : vector<8xf32> to vector<8x1xf32>
    %cst_189 = arith.constant 3.200000e+01 : f32
    %523 = vector.broadcast %cst_189 : f32 to vector<8x1xf32>
    %524 = arith.divf %522, %523 : vector<8x1xf32>
    %cst_190 = arith.constant 9.99999974E-6 : f32
    %525 = vector.broadcast %cst_190 : f32 to vector<8x1xf32>
    %526 = arith.addf %524, %525 : vector<8x1xf32>
    %527 = math.rsqrt %526 : vector<8x1xf32>
    %528 = vector.broadcast %527 : vector<8x1xf32> to vector<8x32xf32>
    %529 = arith.mulf %519, %528 : vector<8x32xf32>
    %530 = vector.broadcast %6 : vector<1x32xf32> to vector<8x32xf32>
    %531 = arith.mulf %529, %530 : vector<8x32xf32>
    %532 = vector.broadcast %7 : vector<1x32xf32> to vector<8x32xf32>
    %533 = arith.addf %531, %532 : vector<8x32xf32>
    %cst_191 = arith.constant dense<0.000000e+00> : vector<8x128xf32>
    %534 = tpu.matmul %533, %8, %cst_191 {dimension_numbers = #tpu.dot_dimension_numbers<[1], [0], [0], [1], [0, 0, 1, 1], [], []>} : vector<8x32xf32>, vector<32x128xf32>, vector<8x128xf32> -> vector<8x128xf32>
    %535 = vector.broadcast %9 : vector<1x128xf32> to vector<8x128xf32>
    %536 = arith.addf %534, %535 : vector<8x128xf32>
    %cst_192 = arith.constant 1.702000e+00 : f32
    %537 = vector.broadcast %cst_192 : f32 to vector<8x128xf32>
    %538 = arith.mulf %537, %536 : vector<8x128xf32>
    %539 = arith.negf %538 : vector<8x128xf32>
    %540 = math.exp %539 : vector<8x128xf32>
    %cst_193 = arith.constant 1.000000e+00 : f32
    %541 = vector.broadcast %cst_193 : f32 to vector<8x128xf32>
    %542 = arith.addf %541, %540 : vector<8x128xf32>
    %543 = arith.divf %541, %542 : vector<8x128xf32>
    %544 = arith.mulf %536, %543 : vector<8x128xf32>
    %cst_194 = arith.constant dense<0.000000e+00> : vector<8x32xf32>
    %545 = tpu.matmul %544, %10, %cst_194 {dimension_numbers = #tpu.dot_dimension_numbers<[1], [0], [0], [1], [0, 0, 1, 1], [], []>} : vector<8x128xf32>, vector<128x32xf32>, vector<8x32xf32> -> vector<8x32xf32>
    %546 = arith.addf %513, %545 : vector<8x32xf32>
    %547 = vector.broadcast %11 : vector<1x32xf32> to vector<8x32xf32>
    %548 = arith.addf %546, %547 : vector<8x32xf32>
    %cst_195 = arith.constant dense<0.000000e+00> : vector<8xf32>
    %549 = vector.multi_reduction <add>, %548, %cst_195 [1] : vector<8x32xf32> to vector<8xf32>
    %550 = vector.shape_cast %549 : vector<8xf32> to vector<8x1xf32>
    %cst_196 = arith.constant 3.200000e+01 : f32
    %551 = vector.broadcast %cst_196 : f32 to vector<8x1xf32>
    %552 = arith.divf %550, %551 : vector<8x1xf32>
    %553 = vector.broadcast %552 : vector<8x1xf32> to vector<8x32xf32>
    %554 = arith.subf %548, %553 : vector<8x32xf32>
    %555 = arith.mulf %554, %554 : vector<8x32xf32>
    %cst_197 = arith.constant dense<0.000000e+00> : vector<8xf32>
    %556 = vector.multi_reduction <add>, %555, %cst_197 [1] : vector<8x32xf32> to vector<8xf32>
    %557 = vector.shape_cast %556 : vector<8xf32> to vector<8x1xf32>
    %cst_198 = arith.constant 3.200000e+01 : f32
    %558 = vector.broadcast %cst_198 : f32 to vector<8x1xf32>
    %559 = arith.divf %557, %558 : vector<8x1xf32>
    %cst_199 = arith.constant 9.99999974E-6 : f32
    %560 = vector.broadcast %cst_199 : f32 to vector<8x1xf32>
    %561 = arith.addf %559, %560 : vector<8x1xf32>
    %562 = math.rsqrt %561 : vector<8x1xf32>
    %563 = vector.broadcast %562 : vector<8x1xf32> to vector<8x32xf32>
    %564 = arith.mulf %554, %563 : vector<8x32xf32>
    %565 = vector.broadcast %13 : vector<1x32xf32> to vector<8x32xf32>
    %566 = arith.mulf %564, %565 : vector<8x32xf32>
    %567 = vector.broadcast %14 : vector<1x32xf32> to vector<8x32xf32>
    %568 = arith.addf %566, %567 : vector<8x32xf32>
    %c3_200 = arith.constant 3 : index
    %c0_201 = arith.constant 0 : index
    %c0_202 = arith.constant 0 : index
    %569 = vector.load %arg17[%c3_200, %c0_201, %c0_202] : memref<4x1x8xf32, #tpu.memory_space<vmem>>, vector<1x1x8xf32>
    %570 = vector.shape_cast %569 : vector<1x1x8xf32> to vector<1x8xf32>
    %cst_203 = arith.constant dense<0.000000e+00> : vector<1x32xf32>
    %571 = tpu.matmul %570, %568, %cst_203 {dimension_numbers = #tpu.dot_dimension_numbers<[1], [0], [0], [1], [0, 0, 1, 1], [], []>} : vector<1x8xf32>, vector<8x32xf32>, vector<1x32xf32> -> vector<1x32xf32>
    %cst_204 = arith.constant dense<0.000000e+00> : vector<1x32xf32>
    %572 = tpu.matmul %571, %15, %cst_204 {dimension_numbers = #tpu.dot_dimension_numbers<[1], [0], [0], [1], [0, 0, 1, 1], [], []>} : vector<1x32xf32>, vector<32x32xf32>, vector<1x32xf32> -> vector<1x32xf32>
    %573 = arith.mulf %572, %572 : vector<1x32xf32>
    %cst_205 = arith.constant dense<0.000000e+00> : vector<1xf32>
    %574 = vector.multi_reduction <add>, %573, %cst_205 [1] : vector<1x32xf32> to vector<1xf32>
    %575 = vector.shape_cast %574 : vector<1xf32> to vector<1x1xf32>
    %576 = math.rsqrt %575 : vector<1x1xf32>
    %577 = vector.broadcast %576 : vector<1x1xf32> to vector<1x32xf32>
    %578 = arith.mulf %572, %577 : vector<1x32xf32>
    %c3_206 = arith.constant 3 : index
    %c0_207 = arith.constant 0 : index
    %c0_208 = arith.constant 0 : index
    %579 = vector.load %arg19[%c3_206, %c0_207, %c0_208] : memref<4x1x32xf32, #tpu.memory_space<vmem>>, vector<1x1x32xf32>
    %580 = vector.shape_cast %579 : vector<1x1x32xf32> to vector<1x32xf32>
    %581 = vector.shape_cast %578 : vector<1x32xf32> to vector<1x1x32xf32>
    tpu.vector_store %arg19[%c3_206, %c0_207, %c0_208], %581 {strides = array<i32>} : memref<4x1x32xf32, #tpu.memory_space<vmem>>, vector<1x1x32xf32>,
    return
  }
  func.func @transform_0(%arg0: i32) -> (i32, i32, i32) {
    %c0_i32 = arith.constant 0 : i32
    %c0_i32_0 = arith.constant 0 : i32
    %c0_i32_1 = arith.constant 0 : i32
    return %arg0, %c0_i32, %c0_i32_0 : i32, i32, i32
  }
  func.func @transform_1(%arg0: i32) -> (i32, i32) {
    %c0_i32 = arith.constant 0 : i32
    %c0_i32_0 = arith.constant 0 : i32
    %c0_i32_1 = arith.constant 0 : i32
    return %c0_i32, %c0_i32_0 : i32, i32
  }
  func.func @transform_2(%arg0: i32) -> (i32, i32) {
    %c0_i32 = arith.constant 0 : i32
    %c0_i32_0 = arith.constant 0 : i32
    %c0_i32_1 = arith.constant 0 : i32
    return %c0_i32, %c0_i32_0 : i32, i32
  }
  func.func @transform_3(%arg0: i32) -> (i32, i32) {
    %c0_i32 = arith.constant 0 : i32
    %c0_i32_0 = arith.constant 0 : i32
    %c0_i32_1 = arith.constant 0 : i32
    return %c0_i32, %c0_i32_0 : i32, i32
  }
  func.func @transform_4(%arg0: i32) -> (i32, i32) {
    %c0_i32 = arith.constant 0 : i32
    %c0_i32_0 = arith.constant 0 : i32
    %c0_i32_1 = arith.constant 0 : i32
    return %c0_i32, %c0_i32_0 : i32, i32
  }
  func.func @transform_5(%arg0: i32) -> (i32, i32) {
    %c0_i32 = arith.constant 0 : i32
    %c0_i32_0 = arith.constant 0 : i32
    %c0_i32_1 = arith.constant 0 : i32
    return %c0_i32, %c0_i32_0 : i32, i32
  }
  func.func @transform_6(%arg0: i32) -> (i32, i32) {
    %c0_i32 = arith.constant 0 : i32
    %c0_i32_0 = arith.constant 0 : i32
    %c0_i32_1 = arith.constant 0 : i32
    return %c0_i32, %c0_i32_0 : i32, i32
  }
  func.func @transform_7(%arg0: i32) -> (i32, i32) {
    %c0_i32 = arith.constant 0 : i32
    %c0_i32_0 = arith.constant 0 : i32
    %c0_i32_1 = arith.constant 0 : i32
    return %c0_i32, %c0_i32_0 : i32, i32
  }
  func.func @transform_8(%arg0: i32) -> (i32, i32) {
    %c0_i32 = arith.constant 0 : i32
    %c0_i32_0 = arith.constant 0 : i32
    %c0_i32_1 = arith.constant 0 : i32
    return %c0_i32, %c0_i32_0 : i32, i32
  }
  func.func @transform_9(%arg0: i32) -> (i32, i32) {
    %c0_i32 = arith.constant 0 : i32
    %c0_i32_0 = arith.constant 0 : i32
    %c0_i32_1 = arith.constant 0 : i32
    return %c0_i32, %c0_i32_0 : i32, i32
  }
  func.func @transform_10(%arg0: i32) -> (i32, i32) {
    %c0_i32 = arith.constant 0 : i32
    %c0_i32_0 = arith.constant 0 : i32
    %c0_i32_1 = arith.constant 0 : i32
    return %c0_i32, %c0_i32_0 : i32, i32
  }
  func.func @transform_11(%arg0: i32) -> (i32, i32) {
    %c0_i32 = arith.constant 0 : i32
    %c0_i32_0 = arith.constant 0 : i32
    %c0_i32_1 = arith.constant 0 : i32
    return %c0_i32, %c0_i32_0 : i32, i32
  }
  func.func @transform_12(%arg0: i32) -> (i32, i32) {
    %c0_i32 = arith.constant 0 : i32
    %c0_i32_0 = arith.constant 0 : i32
    %c0_i32_1 = arith.constant 0 : i32
    return %c0_i32, %c0_i32_0 : i32, i32
  }
  func.func @transform_13(%arg0: i32) -> (i32, i32) {
    %c0_i32 = arith.constant 0 : i32
    %c0_i32_0 = arith.constant 0 : i32
    %c0_i32_1 = arith.constant 0 : i32
    return %c0_i32, %c0_i32_0 : i32, i32
  }
  func.func @transform_14(%arg0: i32) -> (i32, i32) {
    %c0_i32 = arith.constant 0 : i32
    %c0_i32_0 = arith.constant 0 : i32
    %c0_i32_1 = arith.constant 0 : i32
    return %c0_i32, %c0_i32_0 : i32, i32
  }
  func.func @transform_15(%arg0: i32) -> (i32, i32) {
    %c0_i32 = arith.constant 0 : i32
    %c0_i32_0 = arith.constant 0 : i32
    %c0_i32_1 = arith.constant 0 : i32
    return %c0_i32, %c0_i32_0 : i32, i32
  }
  func.func @transform_16(%arg0: i32) -> (i32, i32, i32) {
    %c0_i32 = arith.constant 0 : i32
    %c0_i32_0 = arith.constant 0 : i32
    %c0_i32_1 = arith.constant 0 : i32
    return %arg0, %c0_i32, %c0_i32_0 : i32, i32, i32
  }
  func.func @transform_17(%arg0: i32) -> (i32, i32) {
    %c0_i32 = arith.constant 0 : i32
    %c0_i32_0 = arith.constant 0 : i32
    %c0_i32_1 = arith.constant 0 : i32
    return %c0_i32, %c0_i32_0 : i32, i32
  }
  func.func @transform_18(%arg0: i32) -> (i32, i32, i32) {
    %c0_i32 = arith.constant 0 : i32
    %c0_i32_0 = arith.constant 0 : i32
    %c0_i32_1 = arith.constant 0 : i32
    return %arg0, %c0_i32, %c0_i32_0 : i32, i32, i32
  }
}

</mosaic_0001>

<bundles_post_ra>
// kernel: ost_forward.2
= control target key start
LH: loop header
LB: loop body
LE: loop exit
PB: predicated region body
PF: predicated region fallthrough
CT: control target
= control target key end

     0   :  { %s4105_s0 = inlined_call_operand.vmem [shape: f32[4,5,193], index: 0, kind: input, shape index: {}]   ;;  %s4106_s1 = inlined_call_operand.vmem [shape: f32[193,32], index: 1, kind: input, shape index: {}]   ;;  %s4107_s2 = inlined_call_operand.vmem [shape: f32[5,32], index: 2, kind: input, shape index: {}]   ;;  %s4108_s3 = inlined_call_operand.vmem [shape: f32[1,32], index: 3, kind: input, shape index: {}]   ;;  %s4109_s4 = inlined_call_operand.vmem [shape: f32[1,32], index: 4, kind: input, shape index: {}]   ;;  %s4110_s5 = inlined_call_operand.vmem [shape: f32[1,32], index: 5, kind: input, shape index: {}]   ;;  %s4111_s6 = inlined_call_operand.vmem [shape: f32[1,32], index: 6, kind: input, shape index: {}]   ;;  %s4112_s7 = inlined_call_operand.vmem [shape: f32[32,96], index: 7, kind: input, shape index: {}]   ;;  %s4113_s8 = inlined_call_operand.vmem [shape: f32[1,96], index: 8, kind: input, shape index: {}]   ;;  %s4114_s9 = inlined_call_operand.vmem [shape: f32[32,32], index: 9, kind: input, shape index: {}]   ;;  %s4115_s10 = inlined_call_operand.vmem [shape: f32[1,32], index: 10, kind: input, shape index: {}]   ;;  %s4116_s11 = inlined_call_operand.vmem [shape: f32[1,32], index: 11, kind: input, shape index: {}]   ;;  %s4117_s12 = inlined_call_operand.vmem [shape: f32[1,32], index: 12, kind: input, shape index: {}]   ;;  %s4118_s13 = inlined_call_operand.vmem [shape: f32[32,128], index: 13, kind: input, shape index: {}]   ;;  %s4119_s14 = inlined_call_operand.vmem [shape: f32[1,128], index: 14, kind: input, shape index: {}]   ;;  %s4120_s15 = inlined_call_operand.vmem [shape: f32[128,32], index: 15, kind: input, shape index: {}]   ;;  %s4121_s16 = inlined_call_operand.vmem [shape: f32[1,32], index: 16, kind: input, shape index: {}]   ;;  %s4122_s17 = inlined_call_operand.vmem [shape: f32[1,32], index: 17, kind: input, shape index: {}]   ;;  %s4123_s18 = inlined_call_operand.vmem [shape: f32[1,32], index: 18, kind: input, shape index: {}]   ;;  %s4124_s19 = inlined_call_operand.vmem [shape: f32[32,32], index: 19, kind: input, shape index: {}]   ;;  %s4125_s20 = inlined_call_operand.hbm [shape: f32[4,1,32], index: 20, kind: output, shape index: {}]  }
   0x1   :  { %4135 = sst [smem:[#allocation10_spill]] %s4105_s0 }
   0x2   :  { %4136 = sst [smem:[#allocation11_spill]] %s4106_s1 }
   0x3   :  { %4137 = sst [smem:[#allocation12_spill]] %s4107_s2 }
   0x4   :  { %4138 = sst [smem:[#allocation13_spill]] %s4108_s3 }
   0x5   :  { %4139 = sst [smem:[#allocation14_spill]] %s4109_s4 }
   0x6   :  { %25 = vsyncpa [#allocation3], 0 }
   0x7   :  { %27 = vsyncpa [#allocation3 + $0x1], 0  ;;  %s3496_s1 = smov 0   ;;  %s3498_s22 = smov 0  }
   0x8   :  { %s3500_s23 = smov 0   ;;  %s3502_s24 = smov 0  }
   0x9 LB: > { %4140 = sst [smem:[#allocation5_spill]] %s3366_s1  ;;  %s3517_s2 = sadd.s32 4294967295, %s3378_s24   ;;  %s3378_s24 = sphi %s3502_s24, %s4157_s24   ;;  %s3374_s23 = sphi %s3500_s23, %s4159_s23   ;;  %s3370_s22 = sphi %s3498_s22, %s4161_s22   ;;  %s3366_s1 = sphi %s3496_s1, %s4160_s1  }
   0xa   : > { %4141 = sst [smem:[#allocation6_spill]] %s3374_s23  ;;  %s2699_s25 = sadd.s32 4294967294, %s3378_s24  }
   0xb   : > { %s3521_s3 = sadd.s32 1, %s3378_s24   ;;  %s465_s26 = sadd.s32 1, %s3374_s23 }
   0xc   : > { %4142 = sst [smem:[#allocation7_spill]] %s3521_s3  ;;  %s462_s27 = ssub.s32 %s3378_s24, %s3521_s3 }
   0xd   : > { %p475_p0 = scmp.ne.s32.totalorder %s3374_s23, %s3370_s22  ;;  %p463_p1 = scmp.eq.s32.totalorder %s462_s27, 0 }
   0xe   : > { %p476_p2 = scmp.eq.s32.totalorder %s3517_s2, 1  ;;  %p481_p3 = scmp.ne.s32.totalorder %s3370_s22, %s3366_s1 }
   0xf   : > { %p482_p4 = scmp.eq.s32.totalorder %s2699_s25, 1  ;;  %p2702_p7 = scmp.ge.s32.totalorder %s3378_s24, 1 }
  0x10   : > { %s3532_s28 = scalar_select %p463_p1, %s3374_s23, %s465_s26  }
  0x11   : > { %p3534_p5 = por %p476_p2, %p475_p0  ;;  %p3538_p6 = por %p482_p4, %p481_p3 }
  0x12   : > { %4143 = sst [smem:[#allocation8_spill]] %s3532_s28  ;;  %p567_p8 = scmp.lt.s32.totalorder %s3378_s24, 3 }
  0x13   : > { %s4145_s29 = scalar_select %p3538_p6, 1, 0 }
  0x14   : > { %p568_p9 = pnand %p2702_p7, %p567_p8 }
  0x15   : > { %4146 = sst [smem:[#allocation9_spill]] %s4145_s29  ;;  %v3380_v3 = vmov (!%p568_p9), 0.0|0.0   ;;  %s2704_s30 = sshll.u32 (!%p568_p9), %s3517_s2, 1  ;;  %vm706_vm0 = vcmask (!%p568_p9), 531456   ;;  %v3381_v38 = vmov (!%p568_p9), 0.0   ;;  %vm710_vm1 = vcmask (!%p568_p9), 1040384  }
  0x16   : > { %571 = sbr.rel (%p568_p9) target bundleno = 7137 (0x1be1), region = 100  ;;  %s4147_s21 = sld [smem:[#allocation11_spill]] (!%p568_p9)  ;;  %3055 = vmatprep.subr.bf16.mxu0 (!%p568_p9), %v3380_v3  ;;  %3091 = vmatprep.subr.bf16.mxu1 (!%p568_p9), %v3380_v3  ;;  %vm784_vm2 = vcmask (!%p568_p9), 258048   ;;  %vm3382_vm3 = vmmov (!%p568_p9), 0   ;;  %vm846_vm4 = vcmask (!%p568_p9), 261120   ;;  %vm923_vm5 = vcmask (!%p568_p9), 130048  }
  0x17   : > { %p627_p10 = scmp.lt.s32.totalorder (!%p568_p9), %s2704_s30, 3  ;;  %s4148_s29 = sld [smem:[#allocation10_spill]] (!%p568_p9)  ;;  %2859 = vmatprep.mubr.msk.f32.mxu1 (!%p568_p9), %vm3382_vm3, %v3381_v38  ;;  %vm999_vm6 = vcmask (!%p568_p9), 36864   ;;  %vm1017_vm7 = vcmask (!%p568_p9), 1044480   ;;  %vm1013_vm8 = vcmask (!%p568_p9), 39936   ;;  %vm1603_vm9 = vcmask (!%p568_p9), 253952  }
  0x18   : > { %s4150_s3 = sld [smem:[#allocation13_spill]] (!%p568_p9)  ;;  %s4151_s0 = sld [smem:[#allocation14_spill]] (!%p568_p9) }
  0x19   : > { %s4134_s27 = smov (!%p568_p9), 80   ;;  %s3385_s28 = smov (!%p568_p9), 64  }
  0x1a   : > { %s4132_s25 = smov (!%p568_p9), 48  }
  0x1c   : > { %v670_v0 = vld [vmem:[%s4147_s21] sm:$0xff] (!%p568_p9)  ;;  %v671_v1 = vld [vmem:[%s4147_s21 + $0x8] sm:$0xff] (!%p568_p9)  ;;  %v672_v2 = vld [vmem:[%s4147_s21 + $0x10] sm:$0xff] (!%p568_p9) }
  0x1d   : > { %v3554_v4 = vpack.c.bf16 %v671_v1, %v670_v0  ;;  %v673_v5 = vld [vmem:[%s4147_s21 + $0x18] sm:$0xff]  ;;  %v674_v7 = vld [vmem:[%s4147_s21 + $0x20] sm:$0xff]  ;;  %v675_v8 = vld [vmem:[%s4147_s21 + $0x28] sm:$0xff]  ;;  %s4163_s30 = smov (!%p627_p10, %s2704_s30), 3 }
  0x1e   : > { %v3562_v6 = vpack.c.bf16 %v673_v5, %v672_v2  ;;  %s2757_s23 = sshll.u32 %s4163_s30, 4  ;;  %v3062_v9 = vpack.c.bf16 %v675_v8, %v674_v7  ;;  %v676_v10 = vld [vmem:[%s4147_s21 + $0x30] sm:$0xff]  ;;  %v677_v11 = vld [vmem:[%s4147_s21 + $0x38] sm:$0xff]  ;;  %v678_v14 = vld [vmem:[%s4147_s21 + $0x40] sm:$0xff]  ;;  %s4152_s30 = smov 80  }
  0x1f   : > { %3057 = vmatpush1.bf16.msra.mxu0 %v3554_v4  ;;  %s3575_s1 = scalar_lea.vmem %s4148_s29, %s2757_s23  ;;  %v3065_v13 = vpack.c.bf16 %v677_v11, %v676_v10  ;;  %v679_v15 = vld [vmem:[%s4147_s21 + $0x48] sm:$0xff]  ;;  %v680_v17 = vld [vmem:[%s4147_s21 + $0x50] sm:$0xff]  ;;  %v681_v18 = vld [vmem:[%s4147_s21 + $0x58] sm:$0xff]  ;;  %s4149_s29 = sld [smem:[#allocation12_spill]] }
  0x20   : > { %3058 = vmatprep.subr.bf16.mxu0 %v3380_v3  ;;  %v705_v12 = vld [vmem:[%s3575_s1 + $0x8] sm:$0x1f]  ;;  %v3068_v16 = vpack.c.bf16 %v679_v15, %v678_v14  ;;  %v3071_v19 = vpack.c.bf16 %v681_v18, %v680_v17  ;;  %v682_v20 = vld [vmem:[%s4147_s21 + $0x60] sm:$0xff]  ;;  %v684_v23 = vld [vmem:[%s4147_s21 + $0x70] sm:$0xff]  ;;  %s623_s23 = sand.u32 1, %s3370_s22  }
  0x21   : > { %2708 = vmatprep.mubr.msk.f32.mxu0 %vm706_vm0, %v705_v12  ;;  %v683_v21 = vld [vmem:[%s4147_s21 + $0x68] sm:$0xff]  ;;  %v685_v24 = vld [vmem:[%s4147_s21 + $0x78] sm:$0xff]  ;;  %v686_v26 = vld [vmem:[%s4147_s21 + $0x80] sm:$0xff] }
  0x22   : > { %v3074_v22 = vpack.c.bf16 %v683_v21, %v682_v20  ;;  %v3077_v25 = vpack.c.bf16 %v685_v24, %v684_v23  ;;  %v687_v27 = vld [vmem:[%s4147_s21 + $0x88] sm:$0xff]  ;;  %v688_v29 = vld [vmem:[%s4147_s21 + $0x90] sm:$0xff]  ;;  %v689_v30 = vld [vmem:[%s4147_s21 + $0x98] sm:$0xff] }
  0x23   : > { %3060 = vmatpush1.bf16.msra.mxu0 %v3562_v6  ;;  %v3080_v28 = vpack.c.bf16 %v687_v27, %v686_v26  ;;  %v3083_v31 = vpack.c.bf16 %v689_v30, %v688_v29  ;;  %v690_v32 = vld [vmem:[%s4147_s21 + $0xa0] sm:$0xff]  ;;  %v691_v33 = vld [vmem:[%s4147_s21 + $0xa8] sm:$0xff]  ;;  %v692_v35 = vld [vmem:[%s4147_s21 + $0xb0] sm:$0xff] }
  0x24   : > { %3061 = vmatprep.subr.bf16.mxu0 %v3380_v3  ;;  %v3086_v34 = vpack.c.bf16 %v691_v33, %v690_v32  ;;  %v693_v36 = vld [vmem:[%s4147_s21 + $0xb8] sm:$0xff]  ;;  %v694_v39 = vld [vmem:[%s4147_s21 + $0xc0] sm:$0x1]  ;;  %v638_v5 = vld [vmem:[%s4112_s7 + $0x10] sm:$0xff] }
  0x25   : > { %v3089_v37 = vpack.c.bf16 %v693_v36, %v692_v35  ;;  %v704_v40 = vld [vmem:[%s3575_s1] sm:$0x1f]  ;;  %v639_v7 = vld [vmem:[%s4112_s7 + $0x18] sm:$0xff] }
  0x26   : > { %v3669_v41 = vld [vmem:[%s4149_s29] sm:$0x1f]  ;;  %v3709_v8 = vpack.c.bf16 %v639_v7, %v638_v5 }
  0x27   : > { %3063 = vmatpush1.bf16.msra.mxu0 %v3062_v9  ;;  %v3677_v55 = vld [vmem:[%s4150_s3] ss:$0 sm:$0xff]  ;;  %s3383_s3 = smov 96  }
  0x28   : > { %3064 = vmatprep.subr.bf16.mxu0 %v3380_v3  ;;  %v3682_v57 = vld [vmem:[%s4151_s0] ss:$0 sm:$0xff]  ;;  %s4133_s0 = smov 112  }
  0x29   : > { %v636_v2 = vld [vmem:[%s4112_s7] sm:$0xff] }
  0x2a   : > { %v3722_v15 = vld [vmem:[%s4111_s6] ss:$0 sm:$0xff] }
  0x2b   : > { %3066 = vmatpush1.bf16.msra.mxu0 %v3065_v13  ;;  %v3732_v18 = vld [vmem:[%s4113_s8] ss:$0 sm:$0xff] }
  0x2c   : > { %3067 = vmatprep.subr.bf16.mxu0 %v3380_v3 }
  0x2f   : > { %3069 = vmatpush1.bf16.msra.mxu0 %v3068_v16 }
  0x30   : > { %3070 = vmatprep.subr.bf16.mxu0 %v3380_v3 }
  0x33   : > { %3072 = vmatpush1.bf16.msra.mxu0 %v3071_v19 }
  0x34   : > { %3073 = vmatprep.subr.bf16.mxu0 %v3380_v3 }
  0x37   : > { %3075 = vmatpush1.bf16.msra.mxu0 %v3074_v22 }
  0x38   : > { %3076 = vmatprep.subr.bf16.mxu0 %v3380_v3 }
  0x3b   : > { %3078 = vmatpush1.bf16.msra.mxu0 %v3077_v25 }
  0x3c   : > { %3079 = vmatprep.subr.bf16.mxu0 %v3380_v3 }
  0x3f   : > { %3081 = vmatpush1.bf16.msra.mxu0 %v3080_v28 }
  0x40   : > { %3082 = vmatprep.subr.bf16.mxu0 %v3380_v3 }
  0x43   : > { %3084 = vmatpush1.bf16.msra.mxu0 %v3083_v31 }
  0x44   : > { %3085 = vmatprep.subr.bf16.mxu0 %v3380_v3 }
  0x47   : > { %3087 = vmatpush1.bf16.msra.mxu0 %v3086_v34 }
  0x48   : > { %3088 = vmatprep.subr.bf16.mxu0 %v3380_v3 }
  0x4b   : > { %3090 = vmatpush1.bf16.msra.mxu0 %v3089_v37 }
  0x4c   : > { %762 = vmatprep.subr.mxu0 %v3381_v38 }
  0x4f   : > { %2707 = vmatpush1.msk.msra.mxu0 %vm710_vm1, %v694_v39 }
  0x50   : > { %779 = vmatmul.mubr.f32.vlgmr.msra.gmra.mrb[0].mxu0 %v704_v40  ;;  %3139 = vmatprep.subr.bf16.mxu0 %v3380_v3 }
  0x51   : > { %3141 = vmatpush1.bf16.msra.mxu0 %v3554_v4  ;;  %v637_v4 = vld [vmem:[%s4112_s7 + $0x8] sm:$0xff] }
  0x52   : > { %3142 = vmatprep.subr.bf16.mxu0 %v3380_v3 }
  0x55   : > { %3144 = vmatpush1.bf16.msra.mxu0 %v3562_v6  ;;  %v3701_v6 = vpack.c.bf16 %v637_v4, %v636_v2 }
  0x56   : > { %3145 = vmatprep.subr.bf16.mxu0 %v3380_v3 }
  0x57   : > { %3093 = vmatpush3.bf16.msra.mxu1 %v3701_v6 }
  0x58   : > { %3094 = vmatprep.subr.bf16.mxu1 %v3380_v3 }
  0x59   : > { %3147 = vmatpush1.bf16.msra.mxu0 %v3062_v9 }
  0x5a   : > { %3148 = vmatprep.subr.bf16.mxu0 %v3380_v3 }
  0x5b   : > { %3096 = vmatpush3.bf16.msra.mxu1 %v3709_v8 }
  0x5c   : > { %2862 = vmatprep.subr.mxu1 %v3381_v38 }
  0x5d   : > { %3150 = vmatpush1.bf16.msra.mxu0 %v3065_v13  ;;  %v3717_v13 = vld [vmem:[%s4110_s5] ss:$0 sm:$0xff] }
  0x5e   : > { %3151 = vmatprep.subr.bf16.mxu0 %v3380_v3 }
  0x61   : > { %3153 = vmatpush1.bf16.msra.mxu0 %v3068_v16 }
  0x62   : > { %3154 = vmatprep.subr.bf16.mxu0 %v3380_v3 }
  0x65   : > { %3156 = vmatpush1.bf16.msra.mxu0 %v3071_v19 }
  0x66   : > { %3157 = vmatprep.subr.bf16.mxu0 %v3380_v3 }
  0x69   : > { %3159 = vmatpush1.bf16.msra.mxu0 %v3074_v22 }
  0x6a   : > { %3160 = vmatprep.subr.bf16.mxu0 %v3380_v3 }
  0x6d   : > { %3162 = vmatpush1.bf16.msra.mxu0 %v3077_v25 }
  0x6e   : > { %3163 = vmatprep.subr.bf16.mxu0 %v3380_v3 }
  0x71   : > { %3165 = vmatpush1.bf16.msra.mxu0 %v3080_v28 }
  0x72   : > { %3166 = vmatprep.subr.bf16.mxu0 %v3380_v3 }
  0x75   : > { %3168 = vmatpush1.bf16.msra.mxu0 %v3083_v31 }
  0x76   : > { %3169 = vmatprep.subr.bf16.mxu0 %v3380_v3 }
  0x79   : > { %3171 = vmatpush1.bf16.msra.mxu0 %v3086_v34 }
  0x7a   : > { %3172 = vmatprep.subr.bf16.mxu0 %v3380_v3 }
  0x7d   : > { %3174 = vmatpush1.bf16.msra.mxu0 %v3089_v37 }
  0x7e   : > { %1753 = vmatprep.subr.mxu0 %v3381_v38 }
  0x81   : > { %2735 = vmatpush1.msk.msra.mxu0 %vm710_vm1, %v694_v39 }
  0x82   : > { %3193 = vmatprep.subr.bf16.mxu0 %v3380_v3 }
 0x123   : > { %v780_v42 = vpop.f32.mrb[0].mxu0 }
 0x124   : > { %v781_v43 = vadd.f32 %v780_v42, %v3669_v41  ;;  %v782_v44 = vpop.f32.mrb[1].mxu0 }
 0x126   : > { %v785_v45 = vsel %vm784_vm2, %v781_v43, 0.0 }
 0x127   : > { %786 = vadd.xlane.f32.xlu0 %v785_v45 }
 0x1b4   : > { %v787_v46 = vpop.xlane.xlu0 %786 }
 0x1b5   : > { %v789_v47 = vmul.f32 0.03125, %v787_v46 }
 0x1b7   : > { %v790_v48 = vsub.f32 %v781_v43, %v789_v47 }
 0x1b9   : > { %v791_v49 = vmul.f32 %v790_v48, %v790_v48 }
 0x1bb   : > { %v792_v50 = vsel %vm784_vm2, %v791_v49, 0.0 }
 0x1bc   : > { %793 = vadd.xlane.f32.xlu0 %v792_v50 }
 0x249   : > { %v794_v51 = vpop.xlane.xlu0 %793 }
 0x24a   : > { %v795_v52 = vmul.f32 0.03125, %v794_v51 }
 0x24c   : > { %v796_v53 = vadd.f32 1e-05, %v795_v52 }
 0x24e   : > { %3272 = vrsqrt.f32 %v796_v53  ;;  %v643_v53 = vld [vmem:[%s4114_s9 + $0x10] sm:$0xff] }
 0x258   : > { %v3273_v54 = vpop.eup %3272 }
 0x259   : > { %v798_v56 = vmul.f32 %v3273_v54, %v790_v48  ;;  %v644_v54 = vld [vmem:[%s4114_s9 + $0x18] sm:$0xff] }
 0x25b   : > { %v805_v58 = vmul.f32 %v3677_v55, %v798_v56 }
 0x25d   : > { %v3686_v59 = vadd.f32 %v3682_v57, %v805_v58  ;;  %v3767_v58 = vpack.c.bf16 %v644_v54, %v643_v53  ;;  %v657_v54 = vld [vmem:[%s4120_s15 + $0x20] sm:$0xff] }
 0x25f   : > { %v813_v60 = vsel %vm784_vm2, %v3686_v59, 0.0 }
 0x260   : > { %814 = vadd.xlane.f32.xlu1 %v813_v60 }
 0x2ed   : > { %v815_v61 = vpop.xlane.xlu1 %814 }
 0x2ee   : > { %v816_v62 = vmul.f32 0.03125, %v815_v61  ;;  %v2734_v61 = vld [vmem:[%s3575_s1 + $0x18] sm:$0x1f] }
 0x2ef   : > { %2736 = vmatprep.mubr.msk.f32.mxu0 %vm706_vm0, %v2734_v61  ;;  %v659_v61 = vld [vmem:[%s4120_s15 + $0x30] sm:$0xff] }
 0x2f0   : > { %v817_v63 = vsub.f32 %v3686_v59, %v816_v62  ;;  %v2733_v62 = vld [vmem:[%s3575_s1 + $0x10] sm:$0x1f]  ;;  %s2703_s1 = sshll.u32 %s623_s23, 1 }
 0x2f1   : > { %1770 = vmatmul.mubr.f32.vlgmr.msra.gmra.mrb[2].mxu0 %v2733_v62  ;;  %v660_v62 = vld [vmem:[%s4120_s15 + $0x38] sm:$0xff]  ;;  %s625_s26 = scalar_lea.vmem [#allocation2], %s2703_s1 }
 0x2f2   : > { %v818_v0 = vmul.f32 %v817_v63, %v817_v63  ;;  %3041 = vmatprep.mubr.msk.f32.mxu0 %vm3382_vm3, %v3381_v38 }
 0x2f4   : > { %v819_v1 = vsel %vm784_vm2, %v818_v0, 0.0  ;;  %v642_v0 = vld [vmem:[%s4114_s9 + $0x8] sm:$0xff] }
 0x2f5   : > { %820 = vadd.xlane.f32.xlu1 %v819_v1 }
 0x382   : > { %v821_v9 = vpop.xlane.xlu1 %820 }
 0x383   : > { %v822_v10 = vmul.f32 0.03125, %v821_v9 }
 0x385   : > { %v823_v11 = vadd.f32 1e-05, %v822_v10 }
 0x387   : > { %3274 = vrsqrt.f32 %v823_v11 }
 0x391   : > { %v3275_v12 = vpop.eup %3274 }
 0x392   : > { %v825_v14 = vmul.f32 %v3275_v12, %v817_v63  ;;  %v641_v63 = vld [vmem:[%s4114_s9] sm:$0xff] }
 0x393   : > { %v3785_v1 = vpack.c.bf16 %v642_v0, %v641_v63  ;;  %v3798_v12 = vld [vmem:[%s4115_s10] ss:$0 sm:$0xff]  ;;  %v3119_v63 = vpack.c.bf16 %v660_v62, %v659_v61  ;;  %v701_v61 = vld [vmem:[%s4124_s19 + $0x8] sm:$0xff] }
 0x394   : > { %v832_v16 = vmul.f32 %v3717_v13, %v825_v14  ;;  %v661_v0 = vld [vmem:[%s4120_s15 + $0x40] sm:$0xff] }
 0x396   : > { %v839_v17 = vadd.f32 %v3722_v15, %v832_v16 }
 0x398   : > { %2860 = vmatmul.mubr.msk.f32.vlgmr.msra.gmra.mrb[0].mxu1 %vm846_vm4, %v839_v17 }
 0x399   : > { %2864 = vmatprep.mubr.msk.f32.mxu1 %vm3382_vm3, %v3381_v38 }
 0x46b   : > { %v916_v19 = vpop.f32.mrb[0].mxu1 }
 0x46c   : > { %v917_v20 = vadd.f32 %v3732_v18, %v916_v19  ;;  %v2861_v21 = vpop.f32.mrb[1].mxu1  ;;  %v1771_v19 = vpop.f32.mrb[2].mxu0 }
 0x46e   : > { %921 = vrot.lane.b32.xlu0 %v917_v20, %s3383_s3 }
 0x472   : > { %1092 = vrot.lane.b32.xlu0 %v917_v20, %s4134_s27  ;;  %s2758_s27 = sshll.u32 %s3517_s2, 5  ;;  %s3388_s2 = smov [#allocation2]  }
 0x473   : > { %s3320_s1 = sshll.u32 %s3388_s2, 4  ;;  %s3321_s1 = int_to_ptr.vmem [resolvable:$false] %s3320_s1 }
 0x4e0   : > { %v922_v22 = vpop.permute.xlu0 %921 }
 0x4e1   : > { %2863 = vmatpush3.xpose.msk.msra.mxu1 %vm923_vm5, %v922_v22 }
 0x4e2   : > { %2867 = vmatprep.subr.mxu1 %v3381_v38 }
 0x4e4   : > { %2865 = vmatmul.mubr.msk.f32.vlgmr.msra.gmra.mrb[2].mxu1 %vm923_vm5, %v917_v20  ;;  %v1093_v36 = vpop.permute.xlu0 %1092 }
 0x4e5   : > { %2869 = vmatprep.mubr.msk.f32.mxu1 %vm3382_vm3, %v3381_v38 }
 0x5b7   : > { %v994_v23 = vpop.f32.mrb[2].mxu1 }
 0x5b8   : > { %v998_v24 = vmul.f32 0.25, %v994_v23  ;;  %v2866_v25 = vpop.f32.mrb[3].mxu1 }
 0x5ba   : > { %v1000_v26 = vsel %vm999_vm6, %v998_v24, -inf }
 0x5bb   : > { %1001 = vmax.xlane.f32.xlu1 %v1000_v26 }
 0x5cc   : > { %1011 = vrot.lane.b32.xlu1 %v917_v20, %s3385_s28 }
 0x648   : > { %v1002_v27 = vpop.xlane.xlu1 %1001 }
 0x649   : > { %v1003_v28 = vsub.f32 %v998_v24, %v1002_v27  ;;  %v1772_v24 = vadd.f32 %v1771_v19, %v3669_v41  ;;  %v648_v27 = vld [vmem:[%s4118_s13] sm:$0xff]  ;;  %v650_v41 = vld [vmem:[%s4118_s13 + $0x10] sm:$0xff]  ;;  %v668_v19 = vld [vmem:[%s4120_s15 + $0x78] sm:$0xff] }
 0x64b   : > { %v1004_v29 = vmul.f32 1.442695, %v1003_v28  ;;  %v649_v28 = vld [vmem:[%s4118_s13 + $0x8] sm:$0xff] }
 0x64c   : > { %v1012_v30 = vpop.permute.xlu1 %1011 }
 0x64d   : > { %3276 = vpow2.f32 %v1004_v29  ;;  %2868 = vmatpush3.msk.msra.mxu1 %vm1017_vm7, %v1012_v30  ;;  %v3816_v29 = vpack.c.bf16 %v649_v28, %v648_v27  ;;  %v651_v30 = vld [vmem:[%s4118_s13 + $0x18] sm:$0xff]  ;;  %v3923_v28 = vld [vmem:[%s4119_s14] ss:$0 sm:$0xff] }
 0x64e   : > { %2872 = vmatprep.subr.mxu1 %v3381_v38 }
 0x657   : > { %v3277_v31 = vpop.eup %3276 }
 0x658   : > { %v1006_v32 = vsel %vm999_vm6, %v3277_v31, 0.0 }
 0x659   : > { %1007 = vadd.xlane.f32.xlu1 %v1006_v32 }
 0x66a   : > { %1090 = vrot.lane.b32.xlu1 %v917_v20, %s4133_s0  ;;  %s2637_s0 = sshll.u32 %s625_s26, 4  ;;  %s4061_s0 = int_to_ptr.vmem [resolvable:$true] %s2637_s0 }
 0x66b   : > { %p3323_p0 = scmp.lt.s32.totalorder %s4061_s0, %s3321_s1 }
 0x6e6   : > { %v1008_v33 = vpop.xlane.xlu1 %1007 }
 0x6e7   : > { %3278 = vrcp.f32 %v1008_v33 }
 0x6ea   : > { %v1091_v37 = vpop.permute.xlu1 %1090 }
 0x6f1   : > { %v3279_v34 = vpop.eup %3278 }
 0x6f2   : > { %v1010_v35 = vmul.f32 %v3279_v34, %v3277_v31  ;;  %v3826_v31 = vpack.c.bf16 %v651_v30, %v650_v41 }
 0x6f4   : > { %2870 = vmatmul.mubr.msk.f32.vlgmr.msra.gmra.mrb[4].mxu1 %vm1013_vm8, %v1010_v35 }
 0x6f5   : > { %2873 = vmatpush3.xpose.msk.msra.mxu1 %vm923_vm5, %v1093_v36  ;;  %2874 = vmatprep.mubr.msk.f32.mxu1 %vm3382_vm3, %v3381_v38 }
 0x6f6   : > { %2877 = vmatprep.subr.mxu1 %v3381_v38 }
 0x6f8   : > { %2875 = vmatmul.mubr.msk.f32.vlgmr.msra.gmra.mrb[6].mxu1 %vm923_vm5, %v1091_v37 }
 0x6f9   : > { %2879 = vmatprep.mubr.msk.f32.mxu1 %vm3382_vm3, %v3381_v38 }
 0x7c7   : > { %v1086_v39 = vpop.f32.mrb[4].mxu1 }
 0x7c8   : > { %v2871_v40 = vpop.f32.mrb[5].mxu1 }
 0x7cb   : > { %v1164_v42 = vpop.f32.mrb[6].mxu1 }
 0x7cc   : > { %v1168_v43 = vmul.f32 0.25, %v1164_v42  ;;  %v2876_v44 = vpop.f32.mrb[7].mxu1 }
 0x7ce   : > { %v1169_v45 = vsel %vm999_vm6, %v1168_v43, -inf }
 0x7cf   : > { %1170 = vmax.xlane.f32.xlu0 %v1169_v45  ;;  %v3843_v45 = vld [vmem:[%s4117_s12] ss:$0 sm:$0xff] }
 0x7e5   : > { %1180 = vrot.lane.b32.xlu0 %v917_v20, %s4132_s25  ;;  %v1773_v20 = vpop.f32.mrb[3].mxu0 }
 0x85c   : > { %v1171_v46 = vpop.xlane.xlu0 %1170 }
 0x85d   : > { %v1172_v47 = vsub.f32 %v1168_v43, %v1171_v46  ;;  %v3838_v43 = vld [vmem:[%s4116_s11] ss:$0 sm:$0xff] }
 0x85f   : > { %v1173_v48 = vmul.f32 1.442695, %v1172_v47 }
 0x860   : > { %v1181_v49 = vpop.permute.xlu0 %1180 }
 0x861   : > { %3280 = vpow2.f32 %v1173_v48  ;;  %2878 = vmatpush3.msk.msra.mxu1 %vm1017_vm7, %v1181_v49  ;;  %v653_v48 = vld [vmem:[%s4120_s15] sm:$0xff]  ;;  %v654_v49 = vld [vmem:[%s4120_s15 + $0x8] sm:$0xff] }
 0x862   : > { %3097 = vmatprep.subr.bf16.mxu1 %v3380_v3 }
 0x86b   : > { %v3281_v50 = vpop.eup %3280 }
 0x86c   : > { %v1175_v51 = vsel %vm999_vm6, %v3281_v50, 0.0 }
 0x86d   : > { %1176 = vadd.xlane.f32.xlu1 %v1175_v51  ;;  %v655_v51 = vld [vmem:[%s4120_s15 + $0x10] sm:$0xff] }
 0x8fa   : > { %v1177_v52 = vpop.xlane.xlu1 %1176 }
 0x8fb   : > { %3282 = vrcp.f32 %v1177_v52  ;;  %v656_v52 = vld [vmem:[%s4120_s15 + $0x18] sm:$0xff] }
 0x8fc   : > { %v3113_v53 = vpack.c.bf16 %v656_v52, %v655_v51 }
 0x905   : > { %v3283_v56 = vpop.eup %3282 }
 0x906   : > { %v1179_v60 = vmul.f32 %v3283_v56, %v3281_v50  ;;  %v3110_v50 = vpack.c.bf16 %v654_v49, %v653_v48  ;;  %v658_v56 = vld [vmem:[%s4120_s15 + $0x28] sm:$0xff] }
 0x908   : > { %2880 = vmatmul.mubr.msk.f32.vlgmr.msra.gmra.mrb[8].mxu1 %vm1013_vm8, %v1179_v60  ;;  %3195 = vmatpush3.bf16.msra.mxu0 %v3110_v50  ;;  %v3116_v60 = vpack.c.bf16 %v658_v56, %v657_v54 }
 0x909   : > { %3099 = vmatpush3.bf16.msra.mxu1 %v3767_v58  ;;  %2886 = vmatprep.mubr.msk.f32.mxu1 %vm3382_vm3, %v3381_v38 }
 0x90a   : > { %3100 = vmatprep.subr.bf16.mxu1 %v3380_v3  ;;  %3196 = vmatprep.subr.bf16.mxu0 %v3380_v3 }
 0x90c   : > { %3198 = vmatpush3.bf16.msra.mxu0 %v3113_v53 }
 0x90d   : > { %3199 = vmatprep.subr.bf16.mxu0 %v3380_v3 }
 0x910   : > { %3201 = vmatpush3.bf16.msra.mxu0 %v3116_v60 }
 0x911   : > { %3202 = vmatprep.subr.bf16.mxu0 %v3380_v3 }
 0x914   : > { %3204 = vmatpush3.bf16.msra.mxu0 %v3119_v63 }
 0x915   : > { %3205 = vmatprep.subr.bf16.mxu0 %v3380_v3 }
 0x9db   : > { %v1253_v2 = vpop.f32.mrb[8].mxu1 }
 0x9dc   : > { %v2881_v4 = vpop.f32.mrb[9].mxu1  ;;  %2887 = vmatmul.mubr.msk.f32.vlgmr.msra.gmra.mrb[10].mxu1 %vm923_vm5, %v1253_v2  ;;  %v662_v2 = vld [vmem:[%s4120_s15 + $0x48] sm:$0xff] }
 0x9dd   : > { %3102 = vmatpush3.bf16.msra.mxu1 %v3785_v1  ;;  %2893 = vmatprep.mubr.msk.f32.mxu1 %vm3382_vm3, %v3381_v38  ;;  %v3122_v4 = vpack.c.bf16 %v662_v2, %v661_v0  ;;  %v703_v0 = vld [vmem:[%s4124_s19 + $0x18] sm:$0xff] }
 0x9de   : > { %3103 = vmatprep.subr.bf16.mxu1 %v3380_v3 }
 0x9df   : > { %3207 = vmatpush3.bf16.msra.mxu0 %v3122_v4 }
 0x9e0   : > { %2894 = vmatmul.mubr.msk.f32.vlgmr.msra.gmra.mrb[12].mxu1 %vm923_vm5, %v1086_v39  ;;  %3208 = vmatprep.subr.bf16.mxu0 %v3380_v3 }
 0x9e1   : > { %2904 = vmatprep.mubr.msk.f32.mxu1 %vm3382_vm3, %v3381_v38  ;;  %3105 = vmatpush3.bf16.msra.mxu1 %v3816_v29 }
 0x9e2   : > { %3106 = vmatprep.subr.bf16.mxu1 %v3380_v3 }
 0x9e5   : > { %3108 = vmatpush3.bf16.msra.mxu1 %v3826_v31 }
 0x9e6   : > { %3109 = vmatprep.subr.bf16.mxu1 %v3380_v3 }
 0xaaf   : > { %v1326_v5 = vpop.f32.mrb[10].mxu1 }
 0xab0   : > { %v2888_v7 = vpop.f32.mrb[11].mxu1 }
 0xab1   : > { %v664_v7 = vld [vmem:[%s4120_s15 + $0x58] sm:$0xff] }
 0xab3   : > { %v1399_v9 = vpop.f32.mrb[12].mxu1 }
 0xab4   : > { %v1400_v10 = vadd.f32 %v1399_v9, %v1326_v5  ;;  %v2895_v11 = vpop.f32.mrb[13].mxu1  ;;  %v663_v5 = vld [vmem:[%s4120_s15 + $0x50] sm:$0xff] }
 0xab5   : > { %v3125_v9 = vpack.c.bf16 %v664_v7, %v663_v5  ;;  %v666_v11 = vld [vmem:[%s4120_s15 + $0x68] sm:$0xff] }
 0xab6   : > { %v1403_v14 = vadd.f32 %v1400_v10, %v3686_v59  ;;  %v1775_v59 = vsel %vm784_vm2, %v1772_v24, 0.0  ;;  %v665_v10 = vld [vmem:[%s4120_s15 + $0x60] sm:$0xff] }
 0xab7   : > { %3210 = vmatpush3.bf16.msra.mxu0 %v3125_v9 }
 0xab8   : > { %v3802_v16 = vadd.f32 %v3798_v12, %v1403_v14  ;;  %3211 = vmatprep.subr.bf16.mxu0 %v3380_v3  ;;  %v3128_v14 = vpack.c.bf16 %v666_v11, %v665_v10 }
 0xaba   : > { %v1411_v17 = vsel %vm784_vm2, %v3802_v16, 0.0 }
 0xabb   : > { %1412 = vadd.xlane.f32.xlu1 %v1411_v17  ;;  %3213 = vmatpush3.bf16.msra.mxu0 %v3128_v14  ;;  %v667_v17 = vld [vmem:[%s4120_s15 + $0x70] sm:$0xff] }
 0xabc   : > { %3214 = vmatprep.subr.bf16.mxu0 %v3380_v3  ;;  %v3131_v20 = vpack.c.bf16 %v668_v19, %v667_v17  ;;  %v3962_v17 = vld [vmem:[%s4122_s17] sm:$0x1] }
 0xabf   : > { %3216 = vmatpush3.bf16.msra.mxu0 %v3131_v20 }
 0xb48   : > { %v1413_v21 = vpop.xlane.xlu1 %1412 }
 0xb49   : > { %v1414_v22 = vmul.f32 0.03125, %v1413_v21 }
 0xb4b   : > { %v1415_v23 = vsub.f32 %v3802_v16, %v1414_v22 }
 0xb4d   : > { %v1416_v25 = vmul.f32 %v1415_v23, %v1415_v23 }
 0xb4f   : > { %v1417_v26 = vsel %vm784_vm2, %v1416_v25, 0.0 }
 0xb50   : > { %1418 = vadd.xlane.f32.xlu1 %v1417_v26 }
 0xb54   : > { %1776 = vadd.xlane.f32.xlu1 %v1775_v59 }
 0xbdd   : > { %v1419_v32 = vpop.xlane.xlu1 %1418 }
 0xbde   : > { %v1420_v33 = vmul.f32 0.03125, %v1419_v32 }
 0xbe0   : > { %v1421_v34 = vadd.f32 1e-05, %v1420_v33 }
 0xbe1   : > { %v1777_v35 = vpop.xlane.xlu1 %1776 }
 0xbe2   : > { %3284 = vrsqrt.f32 %v1421_v34  ;;  %v1778_v36 = vmul.f32 0.03125, %v1777_v35 }
 0xbe4   : > { %v3830_v37 = vsub.f32 %v1772_v24, %v1778_v36 }
 0xbe6   : > { %v1780_v39 = vmul.f32 %v3830_v37, %v3830_v37 }
 0xbe8   : > { %v1781_v40 = vsel %vm784_vm2, %v1780_v39, 0.0  ;;  %v3931_v39 = vld [vmem:[%s4121_s16] ss:$0 sm:$0xff] }
 0xbe9   : > { %1782 = vadd.xlane.f32.xlu1 %v1781_v40 }
 0xbec   : > { %v3285_v42 = vpop.eup %3284 }
 0xbed   : > { %v1423_v44 = vmul.f32 %v3285_v42, %v1415_v23 }
 0xbef   : > { %v1430_v46 = vmul.f32 %v3838_v43, %v1423_v44 }
 0xbf1   : > { %v1437_v47 = vadd.f32 %v3843_v45, %v1430_v46 }
 0xbf3   : > { %2905 = vmatmul.mubr.msk.f32.vlgmr.msra.gmra.mrb[14].mxu1 %vm846_vm4, %v1437_v47 }
 0xbf4   : > { %2939 = vmatprep.mubr.msk.f32.mxu1 %vm3382_vm3, %v3381_v38  ;;  %3111 = vmatpush3.bf16.msra.mxu1 %v3110_v50 }
 0xbf5   : > { %3112 = vmatprep.subr.bf16.mxu1 %v3380_v3 }
 0xbf8   : > { %3114 = vmatpush3.bf16.msra.mxu1 %v3113_v53 }
 0xbf9   : > { %3115 = vmatprep.subr.bf16.mxu1 %v3380_v3 }
 0xbfc   : > { %3117 = vmatpush3.bf16.msra.mxu1 %v3116_v60  ;;  %v700_v60 = vld [vmem:[%s4124_s19] sm:$0xff] }
 0xbfd   : > { %3118 = vmatprep.subr.bf16.mxu1 %v3380_v3  ;;  %v3945_v62 = vpack.c.bf16 %v701_v61, %v700_v60 }
 0xc00   : > { %3120 = vmatpush3.bf16.msra.mxu1 %v3119_v63  ;;  %v702_v63 = vld [vmem:[%s4124_s19 + $0x10] sm:$0xff] }
 0xc01   : > { %3121 = vmatprep.subr.bf16.mxu1 %v3380_v3  ;;  %v3955_v2 = vpack.c.bf16 %v703_v0, %v702_v63 }
 0xc04   : > { %3123 = vmatpush3.bf16.msra.mxu1 %v3122_v4 }
 0xc05   : > { %3124 = vmatprep.subr.bf16.mxu1 %v3380_v3 }
 0xc08   : > { %3126 = vmatpush3.bf16.msra.mxu1 %v3125_v9 }
 0xc09   : > { %3127 = vmatprep.subr.bf16.mxu1 %v3380_v3 }
 0xc0c   : > { %3129 = vmatpush3.bf16.msra.mxu1 %v3128_v14 }
 0xc0d   : > { %3130 = vmatprep.subr.bf16.mxu1 %v3380_v3 }
 0xc10   : > { %3132 = vmatpush3.bf16.msra.mxu1 %v3131_v20  ;;  %v3967_v20 = vld [vmem:[%s4123_s18] sm:$0x1] }
 0xc11   : > { %3133 = vmatprep.subr.bf16.mxu1 %v3380_v3 }
 0xc76   : > { %v1783_v21 = vpop.xlane.xlu1 %1782 }
 0xc77   : > { %v1784_v22 = vmul.f32 0.03125, %v1783_v21 }
 0xc79   : > { %v1785_v23 = vadd.f32 1e-05, %v1784_v22 }
 0xc7b   : > { %3286 = vrsqrt.f32 %v1785_v23 }
 0xc85   : > { %v3287_v24 = vpop.eup %3286 }
 0xc86   : > { %v1787_v25 = vmul.f32 %v3287_v24, %v3830_v37 }
 0xc88   : > { %v1788_v26 = vmul.f32 %v3677_v55, %v1787_v25 }
 0xc8a   : > { %v3916_v59 = vadd.f32 %v3682_v57, %v1788_v26 }
 0xc8c   : > { %v1790_v27 = vsel %vm784_vm2, %v3916_v59, 0.0 }
 0xc8d   : > { %1791 = vadd.xlane.f32.xlu1 %v1790_v27 }
 0xcc6   : > { %v1513_v41 = vpop.f32.mrb[14].mxu1 }
 0xcc7   : > { %v1514_v30 = vadd.f32 %v3923_v28, %v1513_v41  ;;  %v2906_v32 = vpop.f32.mrb[15].mxu1 }
 0xcc9   : > { %v2730_v33 = vmul.f32 -1.702, %v1514_v30 }
 0xccb   : > { %v1519_v34 = vmul.f32 1.442695, %v2730_v33 }
 0xccd   : > { %3288 = vpow2.f32 %v1519_v34 }
 0xcd7   : > { %v3289_v55 = vpop.eup %3288 }
 0xcd8   : > { %v1521_v35 = vadd.f32 1.0, %v3289_v55 }
 0xcda   : > { %3290 = vrcp.f32 %v1521_v35 }
 0xce4   : > { %v3291_v57 = vpop.eup %3290 }
 0xce5   : > { %v1524_v36 = vmul.f32 %v3291_v57, %v1514_v30 }
 0xce7   : > { %2940 = vmatmul.mubr.f32.vlgmr.msra.gmra.mrb[16].mxu1 %v1524_v36 }
 0xce8   : > { %2950 = vmatprep.mubr.msk.f32.mxu1 %vm3382_vm3, %v3381_v38  ;;  %3135 = vmatpush3.bf16.msra.mxu1 %v3945_v62 }
 0xce9   : > { %3136 = vmatprep.subr.bf16.mxu1 %v3380_v3 }
 0xcec   : > { %3138 = vmatpush3.bf16.msra.mxu1 %v3955_v2 }
 0xced   : > { %3175 = vmatprep.subr.bf16.mxu1 %v3380_v3 }
 0xd1a   : > { %v1792_v47 = vpop.xlane.xlu1 %1791 }
 0xd1b   : > { %v1793_v48 = vmul.f32 0.03125, %v1792_v47 }
 0xd1d   : > { %v1794_v51 = vsub.f32 %v3916_v59, %v1793_v48 }
 0xd1f   : > { %v1795_v56 = vmul.f32 %v1794_v51, %v1794_v51 }
 0xdba   : > { %v1591_v37 = vpop.f32.mrb[16].mxu1 }
 0xdbb   : > { %v1595_v40 = vadd.f32 %v1591_v37, %v3802_v16  ;;  %v2941_v42 = vpop.f32.mrb[17].mxu1  ;;  %v1796_v16 = vsel %vm784_vm2, %v1795_v56, 0.0 }
 0xdbd   : > { %v1602_v44 = vadd.f32 %v3931_v39, %v1595_v40 }
 0xdbf   : > { %v1604_v46 = vsel %vm1603_vm9, %v1602_v44, 0.0 }
 0xdc0   : > { %1605 = vadd.xlane.f32.xlu0 %v1604_v46 }
 0xe4d   : > { %v1606_v49 = vpop.xlane.xlu0 %1605 }
 0xe4e   : > { %v1607_v50 = vmul.f32 0.03125, %v1606_v49 }
 0xe50   : > { %v1608_v52 = vsub.f32 %v1602_v44, %v1607_v50 }
 0xe52   : > { %v1609_v53 = vmul.f32 %v1608_v52, %v1608_v52 }
 0xe54   : > { %v1610_v54 = vsel %vm1603_vm9, %v1609_v53, 0.0 }
 0xe55   : > { %1611 = vadd.xlane.f32.xlu1 %v1610_v54 }
 0xe59   : > { %1797 = vadd.xlane.f32.xlu1 %v1796_v16 }
 0xee2   : > { %v1612_v4 = vpop.xlane.xlu1 %1611 }
 0xee3   : > { %v1613_v5 = vmul.f32 0.03125, %v1612_v4 }
 0xee5   : > { %v1614_v7 = vadd.f32 1e-05, %v1613_v5 }
 0xee6   : > { %v1798_v9 = vpop.xlane.xlu1 %1797 }
 0xee7   : > { %3292 = vrsqrt.f32 %v1614_v7  ;;  %v1799_v10 = vmul.f32 0.03125, %v1798_v9 }
 0xee9   : > { %v1800_v11 = vadd.f32 1e-05, %v1799_v10 }
 0xeeb   : > { %3294 = vrsqrt.f32 %v1800_v11 }
 0xef1   : > { %v3293_v14 = vpop.eup %3292 }
 0xef2   : > { %v1616_v19 = vmul.f32 %v3293_v14, %v1608_v52 }
 0xef4   : > { %v1617_v21 = vmul.f32 %v1616_v19, %v3962_v17 }
 0xef5   : > { %v3295_v22 = vpop.eup %3294 }
 0xef6   : > { %v1802_v23 = vmul.f32 %v3295_v22, %v1794_v51  ;;  %v1618_v24 = vadd.f32 %v1617_v21, %v3967_v20 }
 0xef8   : > { %2951 = vmatmul.mubr.msk.f32.vlgmr.msra.gmra.mrb[18].mxu1 %vm846_vm4, %v1618_v24  ;;  %v1803_v25 = vmul.f32 %v3717_v13, %v1802_v23 }
 0xef9   : > { %3177 = vmatpush3.bf16.msra.mxu1 %v3701_v6  ;;  %2961 = vmatprep.mubr.msk.f32.mxu1 %vm3382_vm3, %v3381_v38 }
 0xefa   : > { %3178 = vmatprep.subr.bf16.mxu1 %v3380_v3  ;;  %v1804_v26 = vadd.f32 %v3722_v15, %v1803_v25 }
 0xefd   : > { %3180 = vmatpush3.bf16.msra.mxu1 %v3709_v8 }
 0xefe   : > { %2964 = vmatprep.subr.mxu1 %v3381_v38 }
 0xf00   : > { %2962 = vmatmul.mubr.msk.f32.vlgmr.msra.gmra.mrb[20].mxu1 %vm846_vm4, %v1804_v26 }
 0xf01   : > { %2966 = vmatprep.mubr.msk.f32.mxu1 %vm3382_vm3, %v3381_v38 }
 0xfcb   : > { %v3983_v27 = vpop.f32.mrb[18].mxu1 }
 0xfcc   : > { %v2952_v6 = vpop.f32.mrb[19].mxu1 }
 0xfd3   : > { %v1874_v41 = vpop.f32.mrb[20].mxu1 }
 0xfd4   : > { %v1875_v30 = vadd.f32 %v3732_v18, %v1874_v41  ;;  %v2963_v32 = vpop.f32.mrb[21].mxu1 }
 0xfd6   : > { %1879 = vrot.lane.b32.xlu1 %v1875_v30, %s3383_s3  ;;  %s4153_s3 = smov 112  }
0x1048   : > { %v1880_v13 = vpop.permute.xlu1 %1879 }
0x1049   : > { %2965 = vmatpush3.xpose.msk.msra.mxu1 %vm923_vm5, %v1880_v13 }
0x104a   : > { %2969 = vmatprep.subr.mxu1 %v3381_v38 }
0x104c   : > { %2967 = vmatmul.mubr.msk.f32.vlgmr.msra.gmra.mrb[22].mxu1 %vm923_vm5, %v1875_v30 }
0x104d   : > { %2971 = vmatprep.mubr.msk.f32.mxu1 %vm3382_vm3, %v3381_v38 }
0x111f   : > { %v1951_v8 = vpop.f32.mrb[22].mxu1 }
0x1120   : > { %v1955_v15 = vmul.f32 0.25, %v1951_v8  ;;  %v2968_v33 = vpop.f32.mrb[23].mxu1 }
0x1122   : > { %v1956_v34 = vsel %vm999_vm6, %v1955_v15, -inf }
0x1123   : > { %1957 = vmax.xlane.f32.xlu0 %v1956_v34 }
0x1139   : > { %1967 = vrot.lane.b32.xlu0 %v1875_v30, %s3385_s28  ;;  %s4154_s28 = smov 48  }
0x113d   : > { %2046 = vrot.lane.b32.xlu0 %v1875_v30, %s4152_s30  ;;  %s4059_s30 = scalar_lea.hbm %s4125_s20, %s2758_s27  ;;  %s3322_s27 = scalar_lea.vmem %s3321_s1, 64 }
0x1141   : > { %2044 = vrot.lane.b32.xlu0 %v1875_v30, %s4153_s3  ;;  %s4064_s3 = scalar_lea.sflag [#allocation3], %s623_s23 }
0x11b0   : > { %v1958_v18 = vpop.xlane.xlu0 %1957 }
0x11b1   : > { %v1959_v55 = vsub.f32 %v1955_v15, %v1958_v18 }
0x11b3   : > { %v1960_v35 = vmul.f32 1.442695, %v1959_v55 }
0x11b4   : > { %v1968_v57 = vpop.permute.xlu0 %1967 }
0x11b5   : > { %3296 = vpow2.f32 %v1960_v35  ;;  %2970 = vmatpush3.msk.msra.mxu1 %vm1017_vm7, %v1968_v57 }
0x11b6   : > { %2974 = vmatprep.subr.mxu1 %v3381_v38 }
0x11b8   : > { %v2047_v44 = vpop.permute.xlu0 %2046 }
0x11bc   : > { %v2045_v47 = vpop.permute.xlu0 %2044 }
0x11bf   : > { %v3297_v36 = vpop.eup %3296 }
0x11c0   : > { %v1962_v37 = vsel %vm999_vm6, %v3297_v36, 0.0 }
0x11c1   : > { %1963 = vadd.xlane.f32.xlu1 %v1962_v37 }
0x124e   : > { %v1964_v40 = vpop.xlane.xlu1 %1963 }
0x124f   : > { %3298 = vrcp.f32 %v1964_v40  ;;  %v1692_v40 = vmul.f32 %v3983_v27, %v3983_v27 }
0x1259   : > { %v3299_v42 = vpop.eup %3298 }
0x125a   : > { %v1966_v46 = vmul.f32 %v3299_v42, %v3297_v36 }
0x125c   : > { %2972 = vmatmul.mubr.msk.f32.vlgmr.msra.gmra.mrb[24].mxu1 %vm1013_vm8, %v1966_v46 }
0x125d   : > { %2975 = vmatpush3.xpose.msk.msra.mxu1 %vm923_vm5, %v2047_v44  ;;  %2976 = vmatprep.mubr.msk.f32.mxu1 %vm3382_vm3, %v3381_v38  ;;  %v1693_v44 = vsel %vm1603_vm9, %v1692_v40, 0.0 }
0x125e   : > { %2979 = vmatprep.subr.mxu1 %v3381_v38 }
0x1260   : > { %2977 = vmatmul.mubr.msk.f32.vlgmr.msra.gmra.mrb[26].mxu1 %vm923_vm5, %v2045_v47 }
0x1261   : > { %2981 = vmatprep.mubr.msk.f32.mxu1 %vm3382_vm3, %v3381_v38 }
0x132f   : > { %v2040_v48 = vpop.f32.mrb[24].mxu1 }
0x1330   : > { %v2973_v49 = vpop.f32.mrb[25].mxu1 }
0x1333   : > { %v2118_v50 = vpop.f32.mrb[26].mxu1 }
0x1334   : > { %v2122_v51 = vmul.f32 0.25, %v2118_v50  ;;  %v2978_v52 = vpop.f32.mrb[27].mxu1 }
0x1336   : > { %v2123_v53 = vsel %vm999_vm6, %v2122_v51, -inf }
0x1337   : > { %2124 = vmax.xlane.f32.xlu0 %v2123_v53 }
0x13c4   : > { %v2125_v54 = vpop.xlane.xlu0 %2124 }
0x13c5   : > { %v2126_v56 = vsub.f32 %v2122_v51, %v2125_v54 }
0x13c7   : > { %v2127_v16 = vmul.f32 1.442695, %v2126_v56 }
0x13c9   : > { %3300 = vpow2.f32 %v2127_v16 }
0x13d3   : > { %v3301_v60 = vpop.eup %3300 }
0x13d4   : > { %v2129_v61 = vsel %vm999_vm6, %v3301_v60, 0.0 }
0x13d5   : > { %2130 = vadd.xlane.f32.xlu1 %v2129_v61 }
0x13e6   : > { %2134 = vrot.lane.b32.xlu1 %v1875_v30, %s4154_s28  ;;  %s3316_s28 = scalar_lea.vmem %s4061_s0, 32 }
0x13e7   : > { %p3317_p11 = scmp.ne.s32.totalorder %s4061_s0, %s3316_s28  ;;  %p3324_p1 = scmp.lt.s32.totalorder %s3322_s27, %s3316_s28 }
0x13e9   : > { %p3318_p12 = pnand %p3317_p11, %p3534_p5  ;;  %p3325_p2 = por %p3324_p1, %p3323_p0 }
0x13eb   : > { %p3319_p13 = pneg %p3318_p12 }
0x13ed   : > { %p3326_p3 = pnand %p3325_p2, %p3319_p13 }
0x1462   : > { %v2131_v63 = vpop.xlane.xlu1 %2130 }
0x1463   : > { %3302 = vrcp.f32 %v2131_v63 }
0x1466   : > { %v2135_v0 = vpop.permute.xlu1 %2134 }
0x1467   : > { %2980 = vmatpush3.msk.msra.mxu1 %vm1017_vm7, %v2135_v0 }
0x1468   : > { %3181 = vmatprep.subr.bf16.mxu1 %v3380_v3 }
0x146d   : > { %v3303_v4 = vpop.eup %3302 }
0x146e   : > { %v2133_v5 = vmul.f32 %v3303_v4, %v3301_v60 }
0x1470   : > { %2982 = vmatmul.mubr.msk.f32.vlgmr.msra.gmra.mrb[28].mxu1 %vm1013_vm8, %v2133_v5 }
0x1471   : > { %3183 = vmatpush3.bf16.msra.mxu1 %v3767_v58  ;;  %2988 = vmatprep.mubr.msk.f32.mxu1 %vm3382_vm3, %v3381_v38 }
0x1472   : > { %3184 = vmatprep.subr.bf16.mxu1 %v3380_v3 }
0x1543   : > { %v2207_v7 = vpop.f32.mrb[28].mxu1 }
0x1544   : > { %v2983_v9 = vpop.f32.mrb[29].mxu1  ;;  %2989 = vmatmul.mubr.msk.f32.vlgmr.msra.gmra.mrb[30].mxu1 %vm923_vm5, %v2207_v7 }
0x1545   : > { %3186 = vmatpush3.bf16.msra.mxu1 %v3785_v1  ;;  %2995 = vmatprep.mubr.msk.f32.mxu1 %vm3382_vm3, %v3381_v38 }
0x1546   : > { %3187 = vmatprep.subr.bf16.mxu1 %v3380_v3 }
0x1548   : > { %2996 = vmatmul.mubr.msk.f32.vlgmr.msra.gmra.mrb[32].mxu1 %vm923_vm5, %v2040_v48 }
0x1549   : > { %3189 = vmatpush3.bf16.msra.mxu1 %v3816_v29  ;;  %3006 = vmatprep.mubr.msk.f32.mxu1 %vm3382_vm3, %v3381_v38 }
0x154a   : > { %3190 = vmatprep.subr.bf16.mxu1 %v3380_v3 }
0x154d   : > { %3192 = vmatpush3.bf16.msra.mxu1 %v3826_v31 }
0x154e   : > { %3217 = vmatprep.subr.bf16.mxu1 %v3380_v3 }
0x1617   : > { %v2280_v58 = vpop.f32.mrb[30].mxu1 }
0x1618   : > { %v2990_v1 = vpop.f32.mrb[31].mxu1 }
0x161b   : > { %v2353_v10 = vpop.f32.mrb[32].mxu1 }
0x161c   : > { %v2354_v11 = vadd.f32 %v2353_v10, %v2280_v58  ;;  %v2997_v14 = vpop.f32.mrb[33].mxu1 }
0x161e   : > { %v2357_v19 = vadd.f32 %v2354_v11, %v3916_v59 }
0x1620   : > { %v2358_v21 = vadd.f32 %v3798_v12, %v2357_v19 }
0x1622   : > { %v2359_v29 = vsel %vm784_vm2, %v2358_v21, 0.0 }
0x1623   : > { %2360 = vadd.xlane.f32.xlu1 %v2359_v29 }
0x16b0   : > { %v2361_v22 = vpop.xlane.xlu1 %2360 }
0x16b1   : > { %v2362_v23 = vmul.f32 0.03125, %v2361_v22 }
0x16b3   : > { %v2363_v24 = vsub.f32 %v2358_v21, %v2362_v23 }
0x16b5   : > { %v2364_v25 = vmul.f32 %v2363_v24, %v2363_v24 }
0x16b7   : > { %v2365_v31 = vsel %vm784_vm2, %v2364_v25, 0.0 }
0x16b8   : > { %2366 = vadd.xlane.f32.xlu0 %v2365_v31 }
0x1745   : > { %v2367_v26 = vpop.xlane.xlu0 %2366 }
0x1746   : > { %v2368_v6 = vmul.f32 0.03125, %v2367_v26 }
0x1748   : > { %v2369_v41 = vadd.f32 1e-05, %v2368_v6 }
0x174a   : > { %3304 = vrsqrt.f32 %v2369_v41 }
0x1754   : > { %v3305_v30 = vpop.eup %3304 }
0x1755   : > { %v2371_v32 = vmul.f32 %v3305_v30, %v2363_v24 }
0x1757   : > { %v2372_v59 = vmul.f32 %v3838_v43, %v2371_v32 }
0x1759   : > { %v2373_v12 = vadd.f32 %v3843_v45, %v2372_v59 }
0x175b   : > { %3007 = vmatmul.mubr.msk.f32.vlgmr.msra.gmra.mrb[34].mxu1 %vm846_vm4, %v2373_v12 }
0x175c   : > { %3219 = vmatpush3.bf16.msra.mxu1 %v3945_v62  ;;  %3052 = vmatprep.mubr.msk.f32.mxu1 %vm3382_vm3, %v3381_v38 }
0x175d   : > { %3220 = vmatprep.subr.bf16.mxu1 %v3380_v3 }
0x1760   : > { %3222 = vmatpush3.bf16.msra.mxu1 %v3955_v2 }
0x182e   : > { %v2443_v13 = vpop.f32.mrb[34].mxu1 }
0x182f   : > { %v2444_v8 = vadd.f32 %v3923_v28, %v2443_v13  ;;  %v3008_v15 = vpop.f32.mrb[35].mxu1 }
0x1831   : > { %v2749_v33 = vmul.f32 -1.702, %v2444_v8 }
0x1833   : > { %v2449_v34 = vmul.f32 1.442695, %v2749_v33 }
0x1835   : > { %3306 = vpow2.f32 %v2449_v34 }
0x183f   : > { %v3307_v43 = vpop.eup %3306 }
0x1840   : > { %v2451_v45 = vadd.f32 1.0, %v3307_v43 }
0x1842   : > { %3308 = vrcp.f32 %v2451_v45 }
0x184c   : > { %v3309_v18 = vpop.eup %3308 }
0x184d   : > { %v2454_v55 = vmul.f32 %v3309_v18, %v2444_v8 }
0x184f   : > { %3042 = vmatmul.mubr.f32.vlgmr.msra.gmra.mrb[4].mxu0 %v2454_v55 }
0x1922   : > { %v2521_v62 = vpop.f32.mrb[4].mxu0 }
0x1923   : > { %v2525_v35 = vadd.f32 %v2521_v62, %v2358_v21  ;;  %v3043_v38 = vpop.f32.mrb[5].mxu0 }
0x1925   : > { %v2526_v3 = vadd.f32 %v3931_v39, %v2525_v35 }
0x1927   : > { %v2527_v2 = vsel %vm1603_vm9, %v2526_v3, 0.0 }
0x1928   : > { %2528 = vadd.xlane.f32.xlu0 %v2527_v2 }
0x19b5   : > { %v2529_v28 = vpop.xlane.xlu0 %2528 }
0x19b6   : > { %v2530_v57 = vmul.f32 0.03125, %v2529_v28 }
0x19b8   : > { %v2531_v36 = vsub.f32 %v2526_v3, %v2530_v57 }
0x19ba   : > { %v2532_v37 = vmul.f32 %v2531_v36, %v2531_v36 }
0x19bc   : > { %v2533_v42 = vsel %vm1603_vm9, %v2532_v37, 0.0 }
0x19bd   : > { %2534 = vadd.xlane.f32.xlu0 %v2533_v42 }
0x19c1   : > { %1694 = vadd.xlane.f32.xlu0 %v1693_v44 }
0x1a4a   : > { %v2535_v46 = vpop.xlane.xlu0 %2534 }
0x1a4b   : > { %v2536_v47 = vmul.f32 0.03125, %v2535_v46 }
0x1a4d   : > { %v2537_v39 = vadd.f32 1e-05, %v2536_v47 }
0x1a4e   : > { %v1695_v48 = vpop.xlane.xlu0 %1694 }
0x1a4f   : > { %3310 = vrsqrt.f32 %v2537_v39 }
0x1a50   : > { %3312 = vrsqrt.f32 %v1695_v48 }
0x1a59   : > { %v3311_v49 = vpop.eup %3310 }
0x1a5a   : > { %v3313_v50 = vpop.eup %3312  ;;  %v2539_v51 = vmul.f32 %v3311_v49, %v2531_v36 }
0x1a5b   : > { %v1697_v52 = vmul.f32 %v3313_v50, %v3983_v27 }
0x1a5c   : > { %v2540_v53 = vmul.f32 %v2539_v51, %v3962_v17 }
0x1a5d   : > { %1698 = vst.msk [vmem:[%s625_s26] sm:$0x1] %vm1603_vm9, %v1697_v52 }
0x1a5e   : > { %v2541_v54 = vadd.f32 %v2540_v53, %v3967_v20 }
0x1a60   : > { %3053 = vmatmul.mubr.msk.f32.vlgmr.msra.gmra.mrb[36].mxu1 %vm846_vm4, %v2541_v54 }
0x1b33   : > { %v2611_v56 = vpop.f32.mrb[36].mxu1 }
0x1b34   : > { %v2615_v16 = vmul.f32 %v2611_v56, %v2611_v56  ;;  %v3054_v60 = vpop.f32.mrb[37].mxu1 }
0x1b36   : > { %v2616_v61 = vsel %vm1603_vm9, %v2615_v16, 0.0 }
0x1b37   : > { %2617 = vadd.xlane.f32.xlu0 %v2616_v61 }
0x1bc4   : > { %v2618_v63 = vpop.xlane.xlu0 %2617 }
0x1bc5   : > { %3314 = vrsqrt.f32 %v2618_v63 }
0x1bcf   : > { %v3315_v27 = vpop.eup %3314 }
0x1bd0   : > { %v2620_v17 = vmul.f32 %v3315_v27, %v2611_v56 }
0x1bd2   : > { %2751 = vst.msk [vmem:[%s625_s26 + $0x1] sm:$0x1] %vm1603_vm9, %v2620_v17 }
0x1bd3   : > { %3329 = shalt.err (!%p3326_p3)
}
0x1bd4   : > { %s3330_s23 = scalar_lea.hbm %s4059_s30, 32  ;;  %s3334_s29 = scalar_lea.hbm %s4125_s20, 64 }
0x1bd5   : > { %p3331_p4 = scmp.ne.s32.totalorder %s4059_s30, %s3330_s23  ;;  %p3335_p9 = scmp.lt.u32.totalorder %s4059_s30, %s4125_s20 }
0x1bd6   : > { %p3336_p10 = scmp.lt.u32.totalorder %s3334_s29, %s3330_s23  ;;  %p3338_p12 = scmp.lt.u32.totalorder %s3330_s23, %s4059_s30 }
0x1bd7   : > { %p3332_p7 = pnand %p3331_p4, %p3534_p5 }
0x1bd8   : > { %p3337_p11 = por %p3336_p10, %p3335_p9 }
0x1bd9   : > { %p3333_p8 = pneg %p3332_p7 }
0x1bda   : > { %p3339_p13 = por %p3338_p12, %p3337_p11 }
0x1bdc   : > { %p3340_p0 = pnand %p3339_p13, %p3333_p8 }
0x1bde   : > { %3343 = shalt.err (!%p3340_p0)
}
0x1bdf   : > { %s3389_s28 = smov 16   ;;  %s3390_s27 = smov 1  }
0x1be0   : > { %3223 = dma.vmem_to_hbm [thread:$0]  (%p3534_p5), %s4061_s0, 32, %s4059_s30, %s4064_s3, %s3389_s28, %s3389_s28, %s3390_s27  }
0x1be1 PF: > { %s4155_s26 = sld [smem:[#allocation5_spill]]  ;;  %p3229_p1 = scmp.ge.s32.totalorder %s3378_s24, 2 }
0x1be3   : > { %p3226_p2 = pnand %p3229_p1, %p3538_p6 }
0x1be7   : > { %s2652_s2 = sand.u32 1, %s4155_s26  }
0x1be8   : > { %s2653_s23 = scalar_lea.sflag [#allocation3], %s2652_s2 }
0x1be9   : > { %3361 = dma.done.wait (!%p3226_p2), %s2653_s23, 32  }
0x1bea   : > { %3363 = vsyncadd (!%p3226_p2), %s2653_s23, 4294967264  ;;  %s4157_s24 = sld [smem:[#allocation7_spill]]  ;;  %s4158_s29 = sld [smem:[#allocation6_spill]] }
0x1beb   : > { %s4159_s23 = sld [smem:[#allocation8_spill]]  ;;  %s4160_s1 = smov %s3370_s22 }
0x1bf0   : > { %p30_p3 = scmp.ge.s32.totalorder %s4157_s24, 4   ;;  %s4161_s22 = smov %s4158_s29 }
0x1bf2   :  { %32 = sbr.rel (!%p30_p3) target bundleno = 9 (0x9), region = 137 }
0x1bf9   :  { %2658 = vsyncpa [#allocation3], 1 }
0x1bfa   :  { %2660 = vsyncpa [#allocation3 + $0x1], 1 }

// kernel: ost_forward.3
= control target key start
LH: loop header
LB: loop body
LE: loop exit
PB: predicated region body
PF: predicated region fallthrough
CT: control target
= control target key end

     0   :  { %s5524_s27 = smov 0   ;;  %s6218_s0 = inlined_call_operand.vmem [shape: f32[8,8,32], index: 0, kind: input, shape index: {}]   ;;  %s6219_s1 = inlined_call_operand.vmem [shape: f32[8,32], index: 1, kind: input, shape index: {}]   ;;  %s6220_s2 = inlined_call_operand.vmem [shape: f32[1,32], index: 2, kind: input, shape index: {}]   ;;  %s6221_s3 = inlined_call_operand.vmem [shape: f32[1,32], index: 3, kind: input, shape index: {}]   ;;  %s6222_s4 = inlined_call_operand.vmem [shape: f32[32,96], index: 4, kind: input, shape index: {}]   ;;  %s6223_s5 = inlined_call_operand.vmem [shape: f32[1,96], index: 5, kind: input, shape index: {}]   ;;  %s6224_s6 = inlined_call_operand.vmem [shape: f32[32,32], index: 6, kind: input, shape index: {}]   ;;  %s6225_s7 = inlined_call_operand.vmem [shape: f32[1,32], index: 7, kind: input, shape index: {}]   ;;  %s6226_s8 = inlined_call_operand.vmem [shape: f32[1,32], index: 8, kind: input, shape index: {}]   ;;  %s6227_s9 = inlined_call_operand.vmem [shape: f32[1,32], index: 9, kind: input, shape index: {}]   ;;  %s6228_s10 = inlined_call_operand.vmem [shape: f32[32,128], index: 10, kind: input, shape index: {}]   ;;  %s6229_s11 = inlined_call_operand.vmem [shape: f32[1,128], index: 11, kind: input, shape index: {}]   ;;  %s6230_s12 = inlined_call_operand.vmem [shape: f32[128,32], index: 12, kind: input, shape index: {}]   ;;  %s6231_s13 = inlined_call_operand.vmem [shape: f32[1,32], index: 13, kind: input, shape index: {}]   ;;  %s6232_s14 = inlined_call_operand.vmem [shape: f32[1,32], index: 14, kind: input, shape index: {}]   ;;  %s6233_s15 = inlined_call_operand.vmem [shape: f32[1,32], index: 15, kind: input, shape index: {}]   ;;  %s6234_s16 = inlined_call_operand.vmem [shape: f32[8,1,8], index: 16, kind: input, shape index: {}]   ;;  %s6235_s17 = inlined_call_operand.vmem [shape: f32[32,32], index: 17, kind: input, shape index: {}]   ;;  %s6236_s18 = inlined_call_operand.vmem [shape: f32[8,1,32], index: 18, kind: output, shape index: {}]  }
   0x1   :  { %6247 = sst [smem:[#allocation2_spill]] %s6218_s0 }
   0x2   :  { %6248 = sst [smem:[#allocation3_spill]] %s6219_s1 }
   0x3   :  { %6249 = sst [smem:[#allocation4_spill]] %s6220_s2 }
   0x4 LB: > { %s4410_s28 = sadd.s32 4294967295, %s5418_s27   ;;  %p4414_p0 = scmp.ge.s32.totalorder %s5418_s27, 1  ;;  %s5418_s27 = sphi %s5524_s27, %s28_s27  }
   0x5   : > { %p523_p1 = scmp.lt.s32.totalorder %s5418_s27, 3 }
   0x7   : > { %p524_p2 = pnand %p4414_p0, %p523_p1 }
   0x8   : > { %s4415_s29 = sshll.u32 (!%p524_p2), %s4410_s28, 2  ;;  %s6250_s1 = sld [smem:[#allocation3_spill]] (!%p524_p2)  ;;  %vm647_vm0 = vcmask (!%p524_p2), 261120   ;;  %v598_v9 = vld [vmem:[%s6222_s4] sm:$0xff] (!%p524_p2)  ;;  %v599_v10 = vld [vmem:[%s6222_s4 + $0x8] sm:$0xff] (!%p524_p2)  ;;  %v600_v11 = vld [vmem:[%s6222_s4 + $0x10] sm:$0xff] (!%p524_p2)  ;;  %v639_v33 = vlaneseq (!%p524_p2) }
   0x9   : > { %527 = sbr.rel (%p524_p2) target bundleno = 11110 (0x2b66), region = 92  ;;  %p581_p3 = scmp.lt.s32.totalorder (!%p524_p2), %s4415_s29, 7  ;;  %v5420_v12 = vmov (!%p524_p2), 0.0|0.0   ;;  %v5563_v13 = vpack.c.bf16 (!%p524_p2), %v599_v10, %v598_v9  ;;  %v601_v14 = vld [vmem:[%s6222_s4 + $0x18] sm:$0xff] (!%p524_p2)  ;;  %vm5421_vm1 = vmmov (!%p524_p2), 0   ;;  %v5422_v15 = vmov (!%p524_p2), 0.0  }
   0xa   : > { %s6251_s22 = sld [smem:[#allocation2_spill]] (!%p524_p2)  ;;  %5112 = vmatprep.subr.bf16.mxu1 (!%p524_p2), %v5420_v12  ;;  %4692 = vmatprep.mubr.msk.f32.mxu1 (!%p524_p2), %vm5421_vm1, %v5422_v15  ;;  %v5574_v16 = vpack.c.bf16 (!%p524_p2), %v601_v14, %v600_v11  ;;  %v5587_v23 = vld [vmem:[%s6221_s3] ss:$0 sm:$0xff] (!%p524_p2)  ;;  %s6243_s28 = smov (!%p524_p2), 112   ;;  %vm758_vm2 = vcmask (!%p524_p2), 130048   ;;  %v640_v34 = vshrl.u32 (!%p524_p2), %v639_v33, 7 }
   0xb   : > { %4705 = vmatprep.subr.mxu0 (!%p524_p2), %v5422_v15  ;;  %4707 = vmatprep.mubr.msk.f32.mxu0 (!%p524_p2), %vm5421_vm1, %v5422_v15  ;;  %v5597_v26 = vld [vmem:[%s6223_s5] ss:$0 sm:$0xff] (!%p524_p2)  ;;  %s5425_s0 = smov (!%p524_p2), 80   ;;  %v642_v35 = vand.u32 (!%p524_p2), 127, %v639_v33  ;;  %v5426_v37 = vmov (!%p524_p2), -1e+09  }
   0xc   : > { %5114 = vmatpush3.bf16.msra.mxu1 (!%p524_p2), %v5563_v13  ;;  %vm835_vm4 = vcmask (!%p524_p2), 64512   ;;  %s6241_s19 = smov (!%p524_p2), 48   ;;  %s6239_s20 = smov (!%p524_p2), 64   ;;  %v603_v63 = vld [vmem:[%s6224_s6] sm:$0xff] (!%p524_p2)  ;;  %vm1611_vm5 = vcmask (!%p524_p2), 253952  }
   0xd   : > { %5115 = vmatprep.subr.bf16.mxu1 (!%p524_p2), %v5420_v12  ;;  %vm643_vm3 = vcmp.le.s32.totalorder (!%p524_p2), %v642_v35, %v640_v34  ;;  %v610_v35 = vld [vmem:[%s6228_s10] sm:$0xff] (!%p524_p2)  ;;  %s6254_s26 = smov (!%p524_p2), 112   ;;  %s6255_s21 = smov (!%p524_p2), 48  }
   0xe   : > { %v5538_v0 = vld [vmem:[%s6250_s1] sm:$0xff] (!%p524_p2)  ;;  %v5613_v38 = vsel (!%p524_p2), %vm643_vm3, 0.0, %v5426_v37  ;;  %v612_v37 = vld [vmem:[%s6228_s10 + $0x10] sm:$0xff] (!%p524_p2) }
  0x10   : > { %s6258_s29 = smov (!%p581_p3, %s4415_s29), 7  ;;  %5117 = vmatpush3.bf16.msra.mxu1 %v5574_v16 }
  0x11   : > { %s4416_s30 = sshll.u32 %s6258_s29, 3  ;;  %4695 = vmatprep.subr.mxu1 %v5422_v15  ;;  %s5824_s25 = scalar_lea.vmem %s6234_s16, %s6258_s29 }
  0x12   : > { %s5543_s2 = scalar_lea.vmem %s6251_s22, %s4416_s30  ;;  %s6252_s22 = sld [smem:[#allocation4_spill]] }
  0x13   : > { %v645_v1 = vld [vmem:[%s5543_s2] sm:$0xff]  ;;  %s6245_s30 = smov 96  }
  0x14   : > { %v5547_v2 = vadd.f32 %v645_v1, %v5538_v0  ;;  %v604_v1 = vld [vmem:[%s6224_s6 + $0x8] sm:$0xff] }
  0x16   : > { %v648_v3 = vsel %vm647_vm0, %v5547_v2, 0.0 }
  0x17   : > { %649 = vadd.xlane.f32.xlu0 %v648_v3 }
  0x18   : > { %v5582_v21 = vld [vmem:[%s6252_s22] ss:$0 sm:$0xff] }
  0xa4   : > { %v650_v4 = vpop.xlane.xlu0 %649 }
  0xa5   : > { %v652_v5 = vmul.f32 0.03125, %v650_v4 }
  0xa7   : > { %v653_v6 = vsub.f32 %v5547_v2, %v652_v5  ;;  %v5633_v5 = vpack.c.bf16 %v604_v1, %v603_v63  ;;  %v624_v63 = vld [vmem:[%s6230_s12 + $0x48] sm:$0xff] }
  0xa9   : > { %v654_v7 = vmul.f32 %v653_v6, %v653_v6 }
  0xab   : > { %v655_v8 = vsel %vm647_vm0, %v654_v7, 0.0  ;;  %v605_v7 = vld [vmem:[%s6224_s6 + $0x10] sm:$0xff] }
  0xac   : > { %656 = vadd.xlane.f32.xlu0 %v655_v8  ;;  %v606_v8 = vld [vmem:[%s6224_s6 + $0x18] sm:$0xff] }
  0xad   : > { %v5647_v9 = vpack.c.bf16 %v606_v8, %v605_v7  ;;  %v627_v7 = vld [vmem:[%s6230_s12 + $0x60] sm:$0xff]  ;;  %v628_v8 = vld [vmem:[%s6230_s12 + $0x68] sm:$0xff] }
 0x139   : > { %v657_v17 = vpop.xlane.xlu0 %656 }
 0x13a   : > { %v658_v18 = vmul.f32 0.03125, %v657_v17 }
 0x13c   : > { %v659_v19 = vadd.f32 1e-05, %v658_v18 }
 0x13e   : > { %5321 = vrsqrt.f32 %v659_v19 }
 0x148   : > { %v5322_v20 = vpop.eup %5321 }
 0x149   : > { %v661_v22 = vmul.f32 %v5322_v20, %v653_v6 }
 0x14b   : > { %v668_v24 = vmul.f32 %v5582_v21, %v661_v22 }
 0x14d   : > { %v675_v25 = vadd.f32 %v5587_v23, %v668_v24 }
 0x14f   : > { %4693 = vmatmul.mubr.msk.f32.vlgmr.msra.gmra.mrb[0].mxu1 %vm647_vm0, %v675_v25  ;;  %v5660_v25 = vld [vmem:[%s6225_s7] ss:$0 sm:$0xff] }
 0x150   : > { %4697 = vmatprep.mubr.msk.f32.mxu1 %vm5421_vm1, %v5422_v15 }
 0x222   : > { %v751_v27 = vpop.f32.mrb[0].mxu1 }
 0x223   : > { %v752_v28 = vadd.f32 %v5597_v26, %v751_v27  ;;  %v4694_v29 = vpop.f32.mrb[1].mxu1 }
 0x225   : > { %923 = vrot.lane.b32.xlu0 %v752_v28, %s6243_s28  ;;  %756 = vrot.lane.b32.xlu1 %v752_v28, %s6245_s30  ;;  %s6253_s30 = smov 96  }
 0x229   : > { %925 = vrot.lane.b32.xlu1 %v752_v28, %s5425_s0 }
 0x297   : > { %v757_v30 = vpop.permute.xlu1 %756  ;;  %v924_v32 = vpop.permute.xlu0 %923 }
 0x298   : > { %4696 = vmatpush3.xpose.msk.msra.mxu1 %vm758_vm2, %v757_v30 }
 0x299   : > { %4700 = vmatprep.subr.mxu1 %v5422_v15 }
 0x29b   : > { %4698 = vmatmul.mubr.msk.f32.vlgmr.msra.gmra.mrb[2].mxu1 %vm758_vm2, %v752_v28  ;;  %v926_v31 = vpop.permute.xlu1 %925 }
 0x29c   : > { %4706 = vmatpush3.xpose.msk.msra.mxu0 %vm758_vm2, %v926_v31  ;;  %4702 = vmatprep.mubr.msk.f32.mxu1 %vm5421_vm1, %v5422_v15 }
 0x29d   : > { %5118 = vmatprep.subr.bf16.mxu0 %v5420_v12 }
 0x29f   : > { %4708 = vmatmul.mubr.msk.f32.vlgmr.msra.gmra.mrb[0].mxu0 %vm758_vm2, %v924_v32 }
 0x2a0   : > { %4719 = vmatprep.mubr.msk.f32.mxu0 %vm5421_vm1, %v5422_v15  ;;  %5120 = vmatpush3.bf16.msra.mxu0 %v5647_v9 }
 0x2a1   : > { %5124 = vmatprep.subr.bf16.mxu0 %v5420_v12 }
 0x36e   : > { %v829_v36 = vpop.f32.mrb[2].mxu1 }
 0x36f   : > { %v833_v39 = vmul.f32 0.25, %v829_v36  ;;  %v4699_v40 = vpop.f32.mrb[3].mxu1 }
 0x371   : > { %v834_v41 = vadd.f32 %v833_v39, %v5613_v38  ;;  %v613_v39 = vld [vmem:[%s6228_s10 + $0x18] sm:$0xff] }
 0x372   : > { %v997_v42 = vpop.f32.mrb[0].mxu0  ;;  %v5686_v40 = vpack.c.bf16 %v613_v39, %v612_v37 }
 0x373   : > { %v1001_v43 = vmul.f32 0.25, %v997_v42  ;;  %v4709_v44 = vpop.f32.mrb[1].mxu0  ;;  %v836_v45 = vsel %vm835_vm4, %v834_v41, -inf }
 0x374   : > { %837 = vmax.xlane.f32.xlu1 %v836_v45  ;;  %v5693_v45 = vld [vmem:[%s6226_s8] ss:$0 sm:$0xff] }
 0x375   : > { %v1002_v46 = vadd.f32 %v1001_v43, %v5613_v38 }
 0x377   : > { %v1003_v47 = vsel %vm835_vm4, %v1002_v46, -inf }
 0x378   : > { %1004 = vmax.xlane.f32.xlu0 %v1003_v47  ;;  %v5698_v47 = vld [vmem:[%s6227_s9] ss:$0 sm:$0xff] }
 0x38e   : > { %1014 = vrot.lane.b32.xlu0 %v752_v28, %s6241_s19 }
 0x401   : > { %v838_v48 = vpop.xlane.xlu1 %837 }
 0x402   : > { %v839_v49 = vsub.f32 %v834_v41, %v838_v48 }
 0x404   : > { %v840_v50 = vmul.f32 1.442695, %v839_v49 }
 0x405   : > { %v1005_v51 = vpop.xlane.xlu0 %1004 }
 0x406   : > { %5323 = vpow2.f32 %v840_v50  ;;  %v1006_v52 = vsub.f32 %v1002_v46, %v1005_v51  ;;  %v615_v50 = vld [vmem:[%s6230_s12] sm:$0xff]  ;;  %v616_v51 = vld [vmem:[%s6230_s12 + $0x8] sm:$0xff] }
 0x408   : > { %v1007_v53 = vmul.f32 1.442695, %v1006_v52  ;;  %v5711_v52 = vpack.c.bf16 %v616_v51, %v615_v50 }
 0x409   : > { %v1015_v3 = vpop.permute.xlu0 %1014 }
 0x40a   : > { %5325 = vpow2.f32 %v1007_v53  ;;  %v617_v53 = vld [vmem:[%s6230_s12 + $0x10] sm:$0xff] }
 0x410   : > { %v5324_v54 = vpop.eup %5323 }
 0x411   : > { %v842_v55 = vsel %vm835_vm4, %v5324_v54, 0.0 }
 0x412   : > { %843 = vadd.xlane.f32.xlu1 %v842_v55 }
 0x414   : > { %v5326_v56 = vpop.eup %5325 }
 0x415   : > { %v1009_v57 = vsel %vm835_vm4, %v5326_v56, 0.0 }
 0x416   : > { %1010 = vadd.xlane.f32.xlu1 %v1009_v57  ;;  %v620_v57 = vld [vmem:[%s6230_s12 + $0x28] sm:$0xff] }
 0x427   : > { %847 = vrot.lane.b32.xlu1 %v752_v28, %s6239_s20  ;;  %s6256_s20 = smov 64  }
 0x49f   : > { %v844_v58 = vpop.xlane.xlu1 %843 }
 0x4a0   : > { %5327 = vrcp.f32 %v844_v58 }
 0x4a3   : > { %v1011_v59 = vpop.xlane.xlu1 %1010 }
 0x4a4   : > { %5329 = vrcp.f32 %v1011_v59  ;;  %v621_v59 = vld [vmem:[%s6230_s12 + $0x30] sm:$0xff] }
 0x4a7   : > { %v848_v60 = vpop.permute.xlu1 %847 }
 0x4a8   : > { %4701 = vmatpush3.msra.mxu1 %v848_v60  ;;  %v622_v60 = vld [vmem:[%s6230_s12 + $0x38] sm:$0xff] }
 0x4a9   : > { %4710 = vmatprep.subr.mxu1 %v5422_v15 }
 0x4aa   : > { %v5328_v61 = vpop.eup %5327 }
 0x4ab   : > { %v846_v62 = vmul.f32 %v5328_v61, %v5324_v54  ;;  %v618_v54 = vld [vmem:[%s6230_s12 + $0x18] sm:$0xff]  ;;  %v5741_v61 = vpack.c.bf16 %v622_v60, %v621_v59 }
 0x4ac   : > { %v5721_v55 = vpack.c.bf16 %v618_v54, %v617_v53 }
 0x4ad   : > { %4703 = vmatmul.mubr.msk.f32.vlgmr.msra.gmra.mrb[4].mxu1 %vm835_vm4, %v846_v62  ;;  %v623_v62 = vld [vmem:[%s6230_s12 + $0x40] sm:$0xff] }
 0x4ae   : > { %v5330_v4 = vpop.eup %5329  ;;  %4711 = vmatpush3.msra.mxu1 %v1015_v3  ;;  %4712 = vmatprep.mubr.msk.f32.mxu1 %vm5421_vm1, %v5422_v15  ;;  %v5751_v1 = vpack.c.bf16 %v624_v63, %v623_v62  ;;  %v625_v3 = vld [vmem:[%s6230_s12 + $0x50] sm:$0xff]  ;;  %v5813_v63 = vld [vmem:[%s6232_s14] ss:$0 sm:$0xff] }
 0x4af   : > { %v1013_v6 = vmul.f32 %v5330_v4, %v5326_v56  ;;  %5121 = vmatprep.subr.bf16.mxu1 %v5420_v12  ;;  %v619_v56 = vld [vmem:[%s6230_s12 + $0x20] sm:$0xff]  ;;  %v626_v4 = vld [vmem:[%s6230_s12 + $0x58] sm:$0xff] }
 0x4b0   : > { %v5731_v58 = vpack.c.bf16 %v620_v57, %v619_v56 }
 0x4b1   : > { %4713 = vmatmul.mubr.msk.f32.vlgmr.msra.gmra.mrb[6].mxu1 %vm835_vm4, %v1013_v6  ;;  %v5761_v6 = vpack.c.bf16 %v626_v4, %v625_v3  ;;  %v5818_v4 = vld [vmem:[%s6233_s15] ss:$0 sm:$0xff] }
 0x4b2   : > { %5123 = vmatpush3.bf16.msra.mxu1 %v5633_v5  ;;  %4726 = vmatprep.mubr.msk.f32.mxu1 %vm5421_vm1, %v5422_v15 }
 0x4b3   : > { %5130 = vmatprep.subr.bf16.mxu1 %v5420_v12 }
 0x580   : > { %v919_v10 = vpop.f32.mrb[4].mxu1 }
 0x581   : > { %v4704_v11 = vpop.f32.mrb[5].mxu1  ;;  %4727 = vmatmul.mubr.msk.f32.vlgmr.msra.gmra.mrb[8].mxu1 %vm758_vm2, %v919_v10  ;;  %v5771_v10 = vpack.c.bf16 %v628_v8, %v627_v7 }
 0x582   : > { %4772 = vmatprep.mubr.msk.f32.mxu1 %vm5421_vm1, %v5422_v15  ;;  %5132 = vmatpush3.bf16.msra.mxu1 %v5711_v52  ;;  %v629_v11 = vld [vmem:[%s6230_s12 + $0x70] sm:$0xff] }
 0x583   : > { %5133 = vmatprep.subr.bf16.mxu1 %v5420_v12 }
 0x584   : > { %v1086_v14 = vpop.f32.mrb[6].mxu1 }
 0x585   : > { %v4714_v17 = vpop.f32.mrb[7].mxu1  ;;  %4720 = vmatmul.mubr.msk.f32.vlgmr.msra.gmra.mrb[2].mxu0 %vm758_vm2, %v1086_v14  ;;  %v630_v14 = vld [vmem:[%s6230_s12 + $0x78] sm:$0xff] }
 0x586   : > { %4737 = vmatprep.mubr.msk.f32.mxu0 %vm5421_vm1, %v5422_v15  ;;  %5135 = vmatpush3.bf16.msra.mxu1 %v5721_v55  ;;  %v5781_v17 = vpack.c.bf16 %v630_v14, %v629_v11  ;;  %v1463_v11 = vld [vmem:[%s5824_s25] sm:$0x1] }
 0x587   : > { %5136 = vmatprep.subr.bf16.mxu1 %v5420_v12  ;;  %v635_v14 = vld [vmem:[%s6235_s17] sm:$0xff] }
 0x58a   : > { %5138 = vmatpush3.bf16.msra.mxu1 %v5731_v58 }
 0x58b   : > { %5139 = vmatprep.subr.bf16.mxu1 %v5420_v12 }
 0x58e   : > { %5141 = vmatpush3.bf16.msra.mxu1 %v5741_v61 }
 0x58f   : > { %5142 = vmatprep.subr.bf16.mxu1 %v5420_v12 }
 0x592   : > { %5144 = vmatpush3.bf16.msra.mxu1 %v5751_v1 }
 0x593   : > { %5145 = vmatprep.subr.bf16.mxu1 %v5420_v12 }
 0x596   : > { %5147 = vmatpush3.bf16.msra.mxu1 %v5761_v6 }
 0x597   : > { %5148 = vmatprep.subr.bf16.mxu1 %v5420_v12 }
 0x59a   : > { %5150 = vmatpush3.bf16.msra.mxu1 %v5771_v10 }
 0x59b   : > { %5151 = vmatprep.subr.bf16.mxu1 %v5420_v12 }
 0x59e   : > { %5153 = vmatpush3.bf16.msra.mxu1 %v5781_v17 }
 0x59f   : > { %4812 = vmatprep.subr.mxu1 %v5422_v15 }
 0x654   : > { %v1232_v18 = vpop.f32.mrb[8].mxu1 }
 0x655   : > { %v4728_v19 = vpop.f32.mrb[9].mxu1 }
 0x658   : > { %v1159_v20 = vpop.f32.mrb[2].mxu0 }
 0x659   : > { %v1233_v22 = vadd.f32 %v1232_v18, %v1159_v20  ;;  %v4721_v24 = vpop.f32.mrb[3].mxu0  ;;  %v5788_v18 = vld [vmem:[%s6229_s11] ss:$0 sm:$0xff] }
 0x65b   : > { %v1236_v27 = vadd.f32 %v1233_v22, %v5547_v2  ;;  %v611_v2 = vld [vmem:[%s6228_s10 + $0x8] sm:$0xff] }
 0x65c   : > { %v5676_v36 = vpack.c.bf16 %v611_v2, %v610_v35 }
 0x65d   : > { %v5664_v28 = vadd.f32 %v5660_v25, %v1236_v27 }
 0x65e   : > { %5126 = vmatpush3.bf16.msra.mxu0 %v5676_v36 }
 0x65f   : > { %v1244_v29 = vsel %vm647_vm0, %v5664_v28, 0.0  ;;  %5127 = vmatprep.subr.bf16.mxu0 %v5420_v12 }
 0x660   : > { %1245 = vadd.xlane.f32.xlu1 %v1244_v29 }
 0x662   : > { %5129 = vmatpush3.bf16.msra.mxu0 %v5686_v40 }
 0x663   : > { %4775 = vmatprep.subr.mxu0 %v5422_v15 }
 0x6ed   : > { %v1246_v30 = vpop.xlane.xlu1 %1245 }
 0x6ee   : > { %v1247_v31 = vmul.f32 0.03125, %v1246_v30 }
 0x6f0   : > { %v1248_v32 = vsub.f32 %v5664_v28, %v1247_v31 }
 0x6f2   : > { %v1249_v33 = vmul.f32 %v1248_v32, %v1248_v32 }
 0x6f4   : > { %v1250_v34 = vsel %vm647_vm0, %v1249_v33, 0.0 }
 0x6f5   : > { %1251 = vadd.xlane.f32.xlu0 %v1250_v34  ;;  %v5796_v34 = vld [vmem:[%s6231_s13] ss:$0 sm:$0xff] }
 0x782   : > { %v1252_v41 = vpop.xlane.xlu0 %1251 }
 0x783   : > { %v1253_v42 = vmul.f32 0.03125, %v1252_v41 }
 0x785   : > { %v1254_v43 = vadd.f32 1e-05, %v1253_v42 }
 0x787   : > { %5331 = vrsqrt.f32 %v1254_v43  ;;  %v4442_v43 = vld [vmem:[%s5543_s2 + $0x8] sm:$0xff] }
 0x791   : > { %v5332_v44 = vpop.eup %5331 }
 0x792   : > { %v1256_v46 = vmul.f32 %v5332_v44, %v1248_v32 }
 0x794   : > { %v1263_v48 = vmul.f32 %v5693_v45, %v1256_v46 }
 0x796   : > { %v1270_v49 = vadd.f32 %v5698_v47, %v1263_v48  ;;  %v5803_v48 = vadd.f32 %v4442_v43, %v5538_v0 }
 0x798   : > { %4738 = vmatmul.mubr.msk.f32.vlgmr.msra.gmra.mrb[4].mxu0 %vm647_vm0, %v1270_v49 }
 0x799   : > { %4777 = vmatprep.mubr.msk.f32.mxu0 %vm5421_vm1, %v5422_v15 }
 0x86b   : > { %v1346_v19 = vpop.f32.mrb[4].mxu0 }
 0x86c   : > { %v1347_v20 = vadd.f32 %v5788_v18, %v1346_v19  ;;  %v4739_v22 = vpop.f32.mrb[5].mxu0  ;;  %v636_v19 = vld [vmem:[%s6235_s17 + $0x8] sm:$0xff] }
 0x86d   : > { %v5842_v22 = vpack.c.bf16 %v636_v19, %v635_v14 }
 0x86e   : > { %v4436_v24 = vmul.f32 -1.702, %v1347_v20 }
 0x870   : > { %v1352_v27 = vmul.f32 1.442695, %v4436_v24  ;;  %v638_v24 = vld [vmem:[%s6235_s17 + $0x18] sm:$0xff] }
 0x872   : > { %5333 = vpow2.f32 %v1352_v27 }
 0x87c   : > { %v5334_v29 = vpop.eup %5333 }
 0x87d   : > { %v1354_v30 = vadd.f32 1.0, %v5334_v29 }
 0x87f   : > { %5335 = vrcp.f32 %v1354_v30 }
 0x889   : > { %v5336_v31 = vpop.eup %5335 }
 0x88a   : > { %v1357_v32 = vmul.f32 %v5336_v31, %v1347_v20  ;;  %v637_v20 = vld [vmem:[%s6235_s17 + $0x10] sm:$0xff] }
 0x88b   : > { %v5848_v27 = vpack.c.bf16 %v638_v24, %v637_v20 }
 0x88c   : > { %4773 = vmatmul.mubr.f32.vlgmr.msra.gmra.mrb[10].mxu1 %v1357_v32 }
 0x88d   : > { %4814 = vmatprep.mubr.msk.f32.mxu1 %vm5421_vm1, %v5422_v15 }
 0x95f   : > { %v1424_v33 = vpop.f32.mrb[10].mxu1 }
 0x960   : > { %v1428_v35 = vadd.f32 %v1424_v33, %v5664_v28  ;;  %v4774_v2 = vpop.f32.mrb[11].mxu1  ;;  %v1621_v28 = vsel %vm647_vm0, %v5803_v48, 0.0 }
 0x962   : > { %v1435_v37 = vadd.f32 %v5796_v34, %v1428_v35 }
 0x964   : > { %v1436_v39 = vsel %vm647_vm0, %v1435_v37, 0.0 }
 0x965   : > { %1437 = vadd.xlane.f32.xlu1 %v1436_v39 }
 0x9f2   : > { %v1438_v41 = vpop.xlane.xlu1 %1437 }
 0x9f3   : > { %v1439_v42 = vmul.f32 0.03125, %v1438_v41 }
 0x9f5   : > { %v1440_v44 = vsub.f32 %v1435_v37, %v1439_v42 }
 0x9f7   : > { %v1441_v46 = vmul.f32 %v1440_v44, %v1440_v44 }
 0x9f9   : > { %v1442_v49 = vsel %vm647_vm0, %v1441_v46, 0.0 }
 0x9fa   : > { %1443 = vadd.xlane.f32.xlu1 %v1442_v49 }
 0x9fe   : > { %1622 = vadd.xlane.f32.xlu1 %v1621_v28 }
 0xa87   : > { %v1444_v50 = vpop.xlane.xlu1 %1443 }
 0xa88   : > { %v1445_v51 = vmul.f32 0.03125, %v1444_v50 }
 0xa8a   : > { %v1446_v53 = vadd.f32 1e-05, %v1445_v51 }
 0xa8b   : > { %v1623_v54 = vpop.xlane.xlu1 %1622 }
 0xa8c   : > { %5337 = vrsqrt.f32 %v1446_v53  ;;  %v1624_v56 = vmul.f32 0.03125, %v1623_v54 }
 0xa8e   : > { %v1625_v57 = vsub.f32 %v5803_v48, %v1624_v56 }
 0xa90   : > { %v1626_v59 = vmul.f32 %v1625_v57, %v1625_v57 }
 0xa92   : > { %v1627_v60 = vsel %vm647_vm0, %v1626_v59, 0.0 }
 0xa93   : > { %1628 = vadd.xlane.f32.xlu0 %v1627_v60 }
 0xa96   : > { %v5338_v62 = vpop.eup %5337 }
 0xa97   : > { %v1448_v3 = vmul.f32 %v5338_v62, %v1440_v44 }
 0xa99   : > { %v1455_v7 = vmul.f32 %v5813_v63, %v1448_v3 }
 0xa9b   : > { %v1462_v8 = vadd.f32 %v5818_v4, %v1455_v7 }
 0xa9d   : > { %4776 = vmatpush3.msra.mxu0 %v1462_v8 }
 0xa9e   : > { %4778 = vmatmul.mubr.msk.f32.vlgmr.msra.gmra.mrb[6].mxu0 %vm835_vm4, %v1463_v11  ;;  %5154 = vmatprep.subr.bf16.mxu0 %v5420_v12 }
 0xa9f   : > { %4788 = vmatprep.mubr.msk.f32.mxu0 %vm5421_vm1, %v5422_v15  ;;  %5156 = vmatpush3.bf16.msra.mxu0 %v5842_v22 }
 0xaa0   : > { %5157 = vmatprep.subr.bf16.mxu0 %v5420_v12 }
 0xaa3   : > { %5159 = vmatpush3.bf16.msra.mxu0 %v5848_v27 }
 0xaa4   : > { %5160 = vmatprep.subr.bf16.mxu0 %v5420_v12 }
 0xb20   : > { %v1629_v29 = vpop.xlane.xlu0 %1628 }
 0xb21   : > { %v1630_v30 = vmul.f32 0.03125, %v1629_v29 }
 0xb23   : > { %v1631_v31 = vadd.f32 1e-05, %v1630_v30 }
 0xb25   : > { %5339 = vrsqrt.f32 %v1631_v31 }
 0xb2f   : > { %v5340_v32 = vpop.eup %5339 }
 0xb30   : > { %v1633_v33 = vmul.f32 %v5340_v32, %v1625_v57 }
 0xb32   : > { %v1634_v37 = vmul.f32 %v5582_v21, %v1633_v33 }
 0xb34   : > { %v1635_v39 = vadd.f32 %v5587_v23, %v1634_v37 }
 0xb71   : > { %v1533_v35 = vpop.f32.mrb[6].mxu0 }
 0xb72   : > { %v4779_v2 = vpop.f32.mrb[7].mxu0  ;;  %4789 = vmatmul.mubr.msk.f32.vlgmr.msra.gmra.mrb[8].mxu0 %vm647_vm0, %v1533_v35 }
 0xb73   : > { %5162 = vmatpush3.bf16.msra.mxu0 %v5563_v13  ;;  %4799 = vmatprep.mubr.msk.f32.mxu0 %vm5421_vm1, %v5422_v15 }
 0xb74   : > { %5163 = vmatprep.subr.bf16.mxu0 %v5420_v12 }
 0xb77   : > { %5165 = vmatpush3.bf16.msra.mxu0 %v5574_v16 }
 0xb78   : > { %4802 = vmatprep.subr.mxu0 %v5422_v15 }
 0xb7a   : > { %4800 = vmatmul.mubr.msk.f32.vlgmr.msra.gmra.mrb[10].mxu0 %vm647_vm0, %v1635_v39 }
 0xb7b   : > { %4804 = vmatprep.mubr.msk.f32.mxu0 %vm5421_vm1, %v5422_v15 }
 0xc45   : > { %v5865_v41 = vpop.f32.mrb[8].mxu0 }
 0xc46   : > { %v4790_v42 = vpop.f32.mrb[9].mxu0 }
 0xc4d   : > { %v1705_v43 = vpop.f32.mrb[10].mxu0 }
 0xc4e   : > { %v1706_v44 = vadd.f32 %v5597_v26, %v1705_v43  ;;  %v4801_v46 = vpop.f32.mrb[11].mxu0 }
 0xc50   : > { %1877 = vrot.lane.b32.xlu0 %v1706_v44, %s5425_s0  ;;  %1710 = vrot.lane.b32.xlu1 %v1706_v44, %s6253_s30 }
 0xc54   : > { %1875 = vrot.lane.b32.xlu1 %v1706_v44, %s6254_s26 }
 0xcc2   : > { %v1878_v49 = vpop.permute.xlu0 %1877  ;;  %v1711_v28 = vpop.permute.xlu1 %1710 }
 0xcc3   : > { %4803 = vmatpush3.xpose.msk.msra.mxu0 %vm758_vm2, %v1711_v28  ;;  %4813 = vmatpush3.xpose.msk.msra.mxu1 %vm758_vm2, %v1878_v49 }
 0xcc4   : > { %4807 = vmatprep.subr.mxu0 %v5422_v15  ;;  %5166 = vmatprep.subr.bf16.mxu1 %v5420_v12 }
 0xcc6   : > { %4805 = vmatmul.mubr.msk.f32.vlgmr.msra.gmra.mrb[12].mxu0 %vm758_vm2, %v1706_v44  ;;  %v1876_v50 = vpop.permute.xlu1 %1875 }
 0xcc7   : > { %4815 = vmatmul.mubr.msk.f32.vlgmr.msra.gmra.mrb[12].mxu1 %vm758_vm2, %v1876_v50  ;;  %4809 = vmatprep.mubr.msk.f32.mxu0 %vm5421_vm1, %v5422_v15 }
 0xcc8   : > { %5168 = vmatpush3.bf16.msra.mxu1 %v5647_v9  ;;  %4826 = vmatprep.mubr.msk.f32.mxu1 %vm5421_vm1, %v5422_v15 }
 0xcc9   : > { %5172 = vmatprep.subr.bf16.mxu1 %v5420_v12 }
 0xd99   : > { %v1782_v51 = vpop.f32.mrb[12].mxu0 }
 0xd9a   : > { %v1786_v53 = vmul.f32 0.25, %v1782_v51  ;;  %v4806_v54 = vpop.f32.mrb[13].mxu0  ;;  %v1949_v56 = vpop.f32.mrb[12].mxu1 }
 0xd9b   : > { %v1953_v57 = vmul.f32 0.25, %v1949_v56  ;;  %v4816_v59 = vpop.f32.mrb[13].mxu1 }
 0xd9c   : > { %v1787_v60 = vadd.f32 %v1786_v53, %v5613_v38 }
 0xd9d   : > { %v1954_v62 = vadd.f32 %v1953_v57, %v5613_v38 }
 0xd9e   : > { %v1788_v3 = vsel %vm835_vm4, %v1787_v60, -inf }
 0xd9f   : > { %1789 = vmax.xlane.f32.xlu1 %v1788_v3  ;;  %v1955_v7 = vsel %vm835_vm4, %v1954_v62, -inf }
 0xda0   : > { %1956 = vmax.xlane.f32.xlu0 %v1955_v7 }
 0xe2c   : > { %v1790_v8 = vpop.xlane.xlu1 %1789 }
 0xe2d   : > { %v1791_v11 = vsub.f32 %v1787_v60, %v1790_v8  ;;  %v1957_v14 = vpop.xlane.xlu0 %1956 }
 0xe2e   : > { %v1958_v19 = vsub.f32 %v1954_v62, %v1957_v14 }
 0xe2f   : > { %v1792_v20 = vmul.f32 1.442695, %v1791_v11 }
 0xe30   : > { %v1959_v24 = vmul.f32 1.442695, %v1958_v19 }
 0xe31   : > { %5341 = vpow2.f32 %v1792_v20 }
 0xe32   : > { %5343 = vpow2.f32 %v1959_v24 }
 0xe3b   : > { %v5342_v29 = vpop.eup %5341 }
 0xe3c   : > { %v5344_v30 = vpop.eup %5343  ;;  %v1794_v31 = vsel %vm835_vm4, %v5342_v29, 0.0 }
 0xe3d   : > { %1795 = vadd.xlane.f32.xlu0 %v1794_v31  ;;  %v1961_v32 = vsel %vm835_vm4, %v5344_v30, 0.0 }
 0xe3e   : > { %1962 = vadd.xlane.f32.xlu1 %v1961_v32 }
 0xe4f   : > { %1966 = vrot.lane.b32.xlu1 %v1706_v44, %s6255_s21 }
 0xe53   : > { %1799 = vrot.lane.b32.xlu0 %v1706_v44, %s6256_s20 }
 0xeca   : > { %v1796_v33 = vpop.xlane.xlu0 %1795 }
 0xecb   : > { %5345 = vrcp.f32 %v1796_v33  ;;  %v1963_v35 = vpop.xlane.xlu1 %1962 }
 0xecc   : > { %5347 = vrcp.f32 %v1963_v35 }
 0xece   : > { %v1800_v2 = vpop.permute.xlu0 %1799 }
 0xecf   : > { %4808 = vmatpush3.msra.mxu0 %v1800_v2  ;;  %v1967_v43 = vpop.permute.xlu1 %1966 }
 0xed0   : > { %4817 = vmatprep.subr.mxu0 %v5422_v15 }
 0xed5   : > { %v5346_v37 = vpop.eup %5345 }
 0xed6   : > { %v1798_v39 = vmul.f32 %v5346_v37, %v5342_v29  ;;  %v5348_v42 = vpop.eup %5347 }
 0xed7   : > { %v1965_v46 = vmul.f32 %v5348_v42, %v5344_v30 }
 0xed8   : > { %4810 = vmatmul.mubr.msk.f32.vlgmr.msra.gmra.mrb[14].mxu0 %vm835_vm4, %v1798_v39 }
 0xed9   : > { %4818 = vmatpush3.msra.mxu0 %v1967_v43  ;;  %4819 = vmatprep.mubr.msk.f32.mxu0 %vm5421_vm1, %v5422_v15 }
 0xeda   : > { %5169 = vmatprep.subr.bf16.mxu0 %v5420_v12 }
 0xedc   : > { %4820 = vmatmul.mubr.msk.f32.vlgmr.msra.gmra.mrb[16].mxu0 %vm835_vm4, %v1965_v46 }
 0xedd   : > { %5171 = vmatpush3.bf16.msra.mxu0 %v5633_v5  ;;  %4833 = vmatprep.mubr.msk.f32.mxu0 %vm5421_vm1, %v5422_v15 }
 0xede   : > { %5178 = vmatprep.subr.bf16.mxu0 %v5420_v12 }
 0xfab   : > { %v1871_v44 = vpop.f32.mrb[14].mxu0 }
 0xfac   : > { %v4811_v49 = vpop.f32.mrb[15].mxu0  ;;  %4834 = vmatmul.mubr.msk.f32.vlgmr.msra.gmra.mrb[18].mxu0 %vm758_vm2, %v1871_v44 }
 0xfad   : > { %5180 = vmatpush3.bf16.msra.mxu0 %v5711_v52  ;;  %4879 = vmatprep.mubr.msk.f32.mxu0 %vm5421_vm1, %v5422_v15  ;;  %v4458_v49 = vld [vmem:[%s5543_s2 + $0x10] sm:$0xff] }
 0xfae   : > { %5181 = vmatprep.subr.bf16.mxu0 %v5420_v12 }
 0xfaf   : > { %v2038_v28 = vpop.f32.mrb[16].mxu0 }
 0xfb0   : > { %v4821_v50 = vpop.f32.mrb[17].mxu0  ;;  %4827 = vmatmul.mubr.msk.f32.vlgmr.msra.gmra.mrb[14].mxu1 %vm758_vm2, %v2038_v28 }
 0xfb1   : > { %5174 = vmatpush3.bf16.msra.mxu1 %v5676_v36  ;;  %4844 = vmatprep.mubr.msk.f32.mxu1 %vm5421_vm1, %v5422_v15 }
 0xfb2   : > { %5175 = vmatprep.subr.bf16.mxu1 %v5420_v12  ;;  %5183 = vmatpush3.bf16.msra.mxu0 %v5721_v55 }
 0xfb3   : > { %5184 = vmatprep.subr.bf16.mxu0 %v5420_v12 }
 0xfb5   : > { %5177 = vmatpush3.bf16.msra.mxu1 %v5686_v40 }
 0xfb6   : > { %5186 = vmatpush3.bf16.msra.mxu0 %v5731_v58  ;;  %4882 = vmatprep.subr.mxu1 %v5422_v15 }
 0xfb7   : > { %5187 = vmatprep.subr.bf16.mxu0 %v5420_v12 }
 0xfba   : > { %5189 = vmatpush3.bf16.msra.mxu0 %v5741_v61 }
 0xfbb   : > { %5190 = vmatprep.subr.bf16.mxu0 %v5420_v12 }
 0xfbe   : > { %5192 = vmatpush3.bf16.msra.mxu0 %v5751_v1 }
 0xfbf   : > { %5193 = vmatprep.subr.bf16.mxu0 %v5420_v12 }
 0xfc2   : > { %5195 = vmatpush3.bf16.msra.mxu0 %v5761_v6 }
 0xfc3   : > { %5196 = vmatprep.subr.bf16.mxu0 %v5420_v12 }
 0xfc6   : > { %5198 = vmatpush3.bf16.msra.mxu0 %v5771_v10 }
 0xfc7   : > { %5199 = vmatprep.subr.bf16.mxu0 %v5420_v12 }
 0xfca   : > { %5201 = vmatpush3.bf16.msra.mxu0 %v5781_v17 }
 0xfcb   : > { %4919 = vmatprep.subr.mxu0 %v5422_v15 }
0x107f   : > { %v2184_v51 = vpop.f32.mrb[18].mxu0 }
0x1080   : > { %v4835_v53 = vpop.f32.mrb[19].mxu0 }
0x1081   : > { %v5942_v53 = vadd.f32 %v4458_v49, %v5538_v0 }
0x1083   : > { %v2111_v54 = vpop.f32.mrb[14].mxu1 }
0x1084   : > { %v2185_v56 = vadd.f32 %v2184_v51, %v2111_v54  ;;  %v4828_v57 = vpop.f32.mrb[15].mxu1 }
0x1086   : > { %v2188_v59 = vadd.f32 %v2185_v56, %v5803_v48  ;;  %v2532_v56 = vsel %vm647_vm0, %v5942_v53, 0.0 }
0x1088   : > { %v2189_v60 = vadd.f32 %v5660_v25, %v2188_v59 }
0x108a   : > { %v2190_v62 = vsel %vm647_vm0, %v2189_v60, 0.0 }
0x108b   : > { %2191 = vadd.xlane.f32.xlu1 %v2190_v62 }
0x1118   : > { %v2192_v3 = vpop.xlane.xlu1 %2191 }
0x1119   : > { %v2193_v7 = vmul.f32 0.03125, %v2192_v3 }
0x111b   : > { %v2194_v8 = vsub.f32 %v2189_v60, %v2193_v7 }
0x111d   : > { %v2195_v11 = vmul.f32 %v2194_v8, %v2194_v8 }
0x111f   : > { %v2196_v14 = vsel %vm647_vm0, %v2195_v11, 0.0 }
0x1120   : > { %2197 = vadd.xlane.f32.xlu0 %v2196_v14 }
0x11ad   : > { %v2198_v19 = vpop.xlane.xlu0 %2197 }
0x11ae   : > { %v2199_v20 = vmul.f32 0.03125, %v2198_v19 }
0x11b0   : > { %v2200_v24 = vadd.f32 1e-05, %v2199_v20 }
0x11b2   : > { %5349 = vrsqrt.f32 %v2200_v24 }
0x11bc   : > { %v5350_v29 = vpop.eup %5349 }
0x11bd   : > { %v2202_v30 = vmul.f32 %v5350_v29, %v2194_v8 }
0x11bf   : > { %v2203_v48 = vmul.f32 %v5693_v45, %v2202_v30 }
0x11c1   : > { %v2204_v31 = vadd.f32 %v5698_v47, %v2203_v48 }
0x11c3   : > { %4845 = vmatmul.mubr.msk.f32.vlgmr.msra.gmra.mrb[16].mxu1 %vm647_vm0, %v2204_v31 }
0x11c4   : > { %4884 = vmatprep.mubr.msk.f32.mxu1 %vm5421_vm1, %v5422_v15 }
0x1296   : > { %v2274_v32 = vpop.f32.mrb[16].mxu1 }
0x1297   : > { %v2275_v33 = vadd.f32 %v5788_v18, %v2274_v32  ;;  %v4846_v35 = vpop.f32.mrb[17].mxu1  ;;  %v4454_v32 = vld [vmem:[%s5824_s25 + $0x1] sm:$0x1] }
0x1299   : > { %v4453_v2 = vmul.f32 -1.702, %v2275_v33 }
0x129b   : > { %v2280_v37 = vmul.f32 1.442695, %v4453_v2 }
0x129d   : > { %5351 = vpow2.f32 %v2280_v37 }
0x12a7   : > { %v5352_v39 = vpop.eup %5351 }
0x12a8   : > { %v2282_v42 = vadd.f32 1.0, %v5352_v39 }
0x12aa   : > { %5353 = vrcp.f32 %v2282_v42 }
0x12b4   : > { %v5354_v43 = vpop.eup %5353 }
0x12b5   : > { %v2285_v46 = vmul.f32 %v5354_v43, %v2275_v33 }
0x12b7   : > { %4880 = vmatmul.mubr.f32.vlgmr.msra.gmra.mrb[20].mxu0 %v2285_v46 }
0x12b8   : > { %4921 = vmatprep.mubr.msk.f32.mxu0 %vm5421_vm1, %v5422_v15 }
0x138a   : > { %v2352_v44 = vpop.f32.mrb[20].mxu0 }
0x138b   : > { %v2356_v28 = vadd.f32 %v2352_v44, %v2189_v60  ;;  %v4881_v50 = vpop.f32.mrb[21].mxu0 }
0x138d   : > { %v2357_v51 = vadd.f32 %v5796_v34, %v2356_v28 }
0x138f   : > { %v2358_v54 = vsel %vm647_vm0, %v2357_v51, 0.0 }
0x1390   : > { %2359 = vadd.xlane.f32.xlu0 %v2358_v54 }
0x1394   : > { %2533 = vadd.xlane.f32.xlu0 %v2532_v56 }
0x141d   : > { %v2360_v57 = vpop.xlane.xlu0 %2359 }
0x141e   : > { %v2361_v59 = vmul.f32 0.03125, %v2360_v57 }
0x1420   : > { %v2362_v62 = vsub.f32 %v2357_v51, %v2361_v59 }
0x1421   : > { %v2534_v3 = vpop.xlane.xlu0 %2533 }
0x1422   : > { %v2363_v7 = vmul.f32 %v2362_v62, %v2362_v62  ;;  %v2535_v60 = vmul.f32 0.03125, %v2534_v3 }
0x1424   : > { %v2364_v8 = vsel %vm647_vm0, %v2363_v7, 0.0  ;;  %v2536_v11 = vsub.f32 %v5942_v53, %v2535_v60 }
0x1425   : > { %2365 = vadd.xlane.f32.xlu1 %v2364_v8 }
0x1426   : > { %v2537_v0 = vmul.f32 %v2536_v11, %v2536_v11 }
0x1428   : > { %v2538_v14 = vsel %vm647_vm0, %v2537_v0, 0.0 }
0x1429   : > { %2539 = vadd.xlane.f32.xlu1 %v2538_v14 }
0x14b2   : > { %v2366_v19 = vpop.xlane.xlu1 %2365 }
0x14b3   : > { %v2367_v20 = vmul.f32 0.03125, %v2366_v19 }
0x14b5   : > { %v2368_v24 = vadd.f32 1e-05, %v2367_v20 }
0x14b6   : > { %v2540_v33 = vpop.xlane.xlu1 %2539 }
0x14b7   : > { %5355 = vrsqrt.f32 %v2368_v24  ;;  %v2541_v35 = vmul.f32 0.03125, %v2540_v33 }
0x14b9   : > { %v2542_v2 = vadd.f32 1e-05, %v2541_v35 }
0x14bb   : > { %5357 = vrsqrt.f32 %v2542_v2 }
0x14c1   : > { %v5356_v29 = vpop.eup %5355 }
0x14c2   : > { %v2370_v30 = vmul.f32 %v5356_v29, %v2362_v62 }
0x14c4   : > { %v2371_v48 = vmul.f32 %v5813_v63, %v2370_v30 }
0x14c5   : > { %v5358_v37 = vpop.eup %5357 }
0x14c6   : > { %v2372_v31 = vadd.f32 %v5818_v4, %v2371_v48  ;;  %v2544_v39 = vmul.f32 %v5358_v37, %v2536_v11 }
0x14c8   : > { %4883 = vmatpush3.msra.mxu1 %v2372_v31  ;;  %v2545_v46 = vmul.f32 %v5582_v21, %v2544_v39 }
0x14c9   : > { %4885 = vmatmul.mubr.msk.f32.vlgmr.msra.gmra.mrb[18].mxu1 %vm835_vm4, %v4454_v32  ;;  %5202 = vmatprep.subr.bf16.mxu1 %v5420_v12 }
0x14ca   : > { %5204 = vmatpush3.bf16.msra.mxu1 %v5842_v22  ;;  %4895 = vmatprep.mubr.msk.f32.mxu1 %vm5421_vm1, %v5422_v15  ;;  %v2546_v44 = vadd.f32 %v5587_v23, %v2545_v46 }
0x14cb   : > { %5205 = vmatprep.subr.bf16.mxu1 %v5420_v12 }
0x14ce   : > { %5207 = vmatpush3.bf16.msra.mxu1 %v5848_v27 }
0x14cf   : > { %5208 = vmatprep.subr.bf16.mxu1 %v5420_v12 }
0x159c   : > { %v2444_v42 = vpop.f32.mrb[18].mxu1 }
0x159d   : > { %v4886_v43 = vpop.f32.mrb[19].mxu1  ;;  %4896 = vmatmul.mubr.msk.f32.vlgmr.msra.gmra.mrb[20].mxu1 %vm647_vm0, %v2444_v42 }
0x159e   : > { %5210 = vmatpush3.bf16.msra.mxu1 %v5563_v13  ;;  %4906 = vmatprep.mubr.msk.f32.mxu1 %vm5421_vm1, %v5422_v15 }
0x159f   : > { %5211 = vmatprep.subr.bf16.mxu1 %v5420_v12 }
0x15a2   : > { %5213 = vmatpush3.bf16.msra.mxu1 %v5574_v16 }
0x15a3   : > { %4909 = vmatprep.subr.mxu1 %v5422_v15 }
0x15a5   : > { %4907 = vmatmul.mubr.msk.f32.vlgmr.msra.gmra.mrb[22].mxu1 %vm647_vm0, %v2546_v44 }
0x15a6   : > { %4911 = vmatprep.mubr.msk.f32.mxu1 %vm5421_vm1, %v5422_v15 }
0x1670   : > { %v5973_v49 = vpop.f32.mrb[20].mxu1 }
0x1671   : > { %v4897_v28 = vpop.f32.mrb[21].mxu1 }
0x1678   : > { %v2616_v50 = vpop.f32.mrb[22].mxu1 }
0x1679   : > { %v2617_v51 = vadd.f32 %v5597_v26, %v2616_v50  ;;  %v4908_v54 = vpop.f32.mrb[23].mxu1 }
0x167b   : > { %2788 = vrot.lane.b32.xlu1 %v2617_v51, %s5425_s0  ;;  %2621 = vrot.lane.b32.xlu0 %v2617_v51, %s6253_s30 }
0x167f   : > { %2786 = vrot.lane.b32.xlu1 %v2617_v51, %s6254_s26 }
0x16ed   : > { %v2789_v21 = vpop.permute.xlu1 %2788  ;;  %v2622_v23 = vpop.permute.xlu0 %2621 }
0x16ee   : > { %4910 = vmatpush3.xpose.msk.msra.mxu1 %vm758_vm2, %v2622_v23  ;;  %4920 = vmatpush3.xpose.msk.msra.mxu0 %vm758_vm2, %v2789_v21 }
0x16ef   : > { %4914 = vmatprep.subr.mxu1 %v5422_v15  ;;  %5214 = vmatprep.subr.bf16.mxu0 %v5420_v12 }
0x16f1   : > { %v2787_v56 = vpop.permute.xlu1 %2786  ;;  %4912 = vmatmul.mubr.msk.f32.vlgmr.msra.gmra.mrb[24].mxu1 %vm758_vm2, %v2617_v51 }
0x16f2   : > { %4922 = vmatmul.mubr.msk.f32.vlgmr.msra.gmra.mrb[22].mxu0 %vm758_vm2, %v2787_v56  ;;  %4916 = vmatprep.mubr.msk.f32.mxu1 %vm5421_vm1, %v5422_v15 }
0x16f3   : > { %5216 = vmatpush3.bf16.msra.mxu0 %v5647_v9  ;;  %4933 = vmatprep.mubr.msk.f32.mxu0 %vm5421_vm1, %v5422_v15 }
0x16f4   : > { %5220 = vmatprep.subr.bf16.mxu0 %v5420_v12 }
0x17c4   : > { %v2693_v26 = vpop.f32.mrb[24].mxu1 }
0x17c5   : > { %v2697_v57 = vmul.f32 0.25, %v2693_v26  ;;  %v4913_v59 = vpop.f32.mrb[25].mxu1  ;;  %v2860_v62 = vpop.f32.mrb[22].mxu0 }
0x17c6   : > { %v2864_v3 = vmul.f32 0.25, %v2860_v62  ;;  %v4923_v7 = vpop.f32.mrb[23].mxu0 }
0x17c7   : > { %v2698_v60 = vadd.f32 %v2697_v57, %v5613_v38 }
0x17c8   : > { %v2865_v8 = vadd.f32 %v2864_v3, %v5613_v38 }
0x17c9   : > { %v2699_v11 = vsel %vm835_vm4, %v2698_v60, -inf }
0x17ca   : > { %2700 = vmax.xlane.f32.xlu0 %v2699_v11  ;;  %v2866_v0 = vsel %vm835_vm4, %v2865_v8, -inf }
0x17cb   : > { %2867 = vmax.xlane.f32.xlu1 %v2866_v0 }
0x17dc   : > { %2710 = vrot.lane.b32.xlu1 %v2617_v51, %s6256_s20 }
0x1857   : > { %v2701_v14 = vpop.xlane.xlu0 %2700 }
0x1858   : > { %v2702_v19 = vsub.f32 %v2698_v60, %v2701_v14  ;;  %v2868_v20 = vpop.xlane.xlu1 %2867 }
0x1859   : > { %v2869_v24 = vsub.f32 %v2865_v8, %v2868_v20 }
0x185a   : > { %v2703_v29 = vmul.f32 1.442695, %v2702_v19 }
0x185b   : > { %v2870_v30 = vmul.f32 1.442695, %v2869_v24 }
0x185c   : > { %5359 = vpow2.f32 %v2703_v29  ;;  %v2711_v48 = vpop.permute.xlu1 %2710 }
0x185d   : > { %4915 = vmatpush3.msra.mxu1 %v2711_v48  ;;  %5361 = vpow2.f32 %v2870_v30 }
0x185e   : > { %4924 = vmatprep.subr.mxu1 %v5422_v15 }
0x1866   : > { %v5360_v31 = vpop.eup %5359 }
0x1867   : > { %v2705_v32 = vsel %vm835_vm4, %v5360_v31, 0.0  ;;  %v5362_v33 = vpop.eup %5361 }
0x1868   : > { %2706 = vadd.xlane.f32.xlu0 %v2705_v32  ;;  %v2872_v35 = vsel %vm835_vm4, %v5362_v33, 0.0 }
0x186c   : > { %2873 = vadd.xlane.f32.xlu0 %v2872_v35 }
0x1882   : > { %2877 = vrot.lane.b32.xlu0 %v2617_v51, %s6255_s21 }
0x18f5   : > { %v2707_v2 = vpop.xlane.xlu0 %2706 }
0x18f6   : > { %5363 = vrcp.f32 %v2707_v2 }
0x18f9   : > { %v2874_v37 = vpop.xlane.xlu0 %2873 }
0x18fa   : > { %5365 = vrcp.f32 %v2874_v37 }
0x18fd   : > { %v2878_v43 = vpop.permute.xlu0 %2877 }
0x1900   : > { %v5364_v39 = vpop.eup %5363 }
0x1901   : > { %v2709_v42 = vmul.f32 %v5364_v39, %v5360_v31  ;;  %v4474_v39 = vld [vmem:[%s5543_s2 + $0x18] sm:$0xff] }
0x1903   : > { %4917 = vmatmul.mubr.msk.f32.vlgmr.msra.gmra.mrb[26].mxu1 %vm835_vm4, %v2709_v42 }
0x1904   : > { %v5366_v46 = vpop.eup %5365  ;;  %4925 = vmatpush3.msra.mxu1 %v2878_v43  ;;  %4926 = vmatprep.mubr.msk.f32.mxu1 %vm5421_vm1, %v5422_v15 }
0x1905   : > { %v2876_v44 = vmul.f32 %v5366_v46, %v5362_v33  ;;  %5217 = vmatprep.subr.bf16.mxu1 %v5420_v12 }
0x1907   : > { %4927 = vmatmul.mubr.msk.f32.vlgmr.msra.gmra.mrb[28].mxu1 %vm835_vm4, %v2876_v44 }
0x1908   : > { %5219 = vmatpush3.bf16.msra.mxu1 %v5633_v5  ;;  %4940 = vmatprep.mubr.msk.f32.mxu1 %vm5421_vm1, %v5422_v15 }
0x1909   : > { %5226 = vmatprep.subr.bf16.mxu1 %v5420_v12 }
0x19d6   : > { %v2782_v28 = vpop.f32.mrb[26].mxu1 }
0x19d7   : > { %v4918_v50 = vpop.f32.mrb[27].mxu1  ;;  %4941 = vmatmul.mubr.msk.f32.vlgmr.msra.gmra.mrb[30].mxu1 %vm758_vm2, %v2782_v28 }
0x19d8   : > { %5228 = vmatpush3.bf16.msra.mxu1 %v5711_v52  ;;  %4986 = vmatprep.mubr.msk.f32.mxu1 %vm5421_vm1, %v5422_v15 }
0x19d9   : > { %5229 = vmatprep.subr.bf16.mxu1 %v5420_v12 }
0x19da   : > { %v2949_v51 = vpop.f32.mrb[28].mxu1 }
0x19db   : > { %v4928_v54 = vpop.f32.mrb[29].mxu1  ;;  %4934 = vmatmul.mubr.msk.f32.vlgmr.msra.gmra.mrb[24].mxu0 %vm758_vm2, %v2949_v51 }
0x19dc   : > { %5222 = vmatpush3.bf16.msra.mxu0 %v5676_v36  ;;  %4951 = vmatprep.mubr.msk.f32.mxu0 %vm5421_vm1, %v5422_v15 }
0x19dd   : > { %5223 = vmatprep.subr.bf16.mxu0 %v5420_v12  ;;  %5231 = vmatpush3.bf16.msra.mxu1 %v5721_v55 }
0x19de   : > { %5232 = vmatprep.subr.bf16.mxu1 %v5420_v12 }
0x19e0   : > { %5225 = vmatpush3.bf16.msra.mxu0 %v5686_v40 }
0x19e1   : > { %5234 = vmatpush3.bf16.msra.mxu1 %v5731_v58  ;;  %4989 = vmatprep.subr.mxu0 %v5422_v15 }
0x19e2   : > { %5235 = vmatprep.subr.bf16.mxu1 %v5420_v12 }
0x19e5   : > { %5237 = vmatpush3.bf16.msra.mxu1 %v5741_v61 }
0x19e6   : > { %5238 = vmatprep.subr.bf16.mxu1 %v5420_v12 }
0x19e9   : > { %5240 = vmatpush3.bf16.msra.mxu1 %v5751_v1 }
0x19ea   : > { %5241 = vmatprep.subr.bf16.mxu1 %v5420_v12 }
0x19ed   : > { %5243 = vmatpush3.bf16.msra.mxu1 %v5761_v6 }
0x19ee   : > { %5244 = vmatprep.subr.bf16.mxu1 %v5420_v12 }
0x19f1   : > { %5246 = vmatpush3.bf16.msra.mxu1 %v5771_v10 }
0x19f2   : > { %5247 = vmatprep.subr.bf16.mxu1 %v5420_v12 }
0x19f5   : > { %5249 = vmatpush3.bf16.msra.mxu1 %v5781_v17 }
0x19f6   : > { %5026 = vmatprep.subr.mxu1 %v5422_v15 }
0x1aaa   : > { %v3095_v21 = vpop.f32.mrb[30].mxu1 }
0x1aab   : > { %v4942_v23 = vpop.f32.mrb[31].mxu1 }
0x1aae   : > { %v3022_v56 = vpop.f32.mrb[24].mxu0 }
0x1aaf   : > { %v3096_v26 = vadd.f32 %v3095_v21, %v3022_v56  ;;  %v4935_v57 = vpop.f32.mrb[25].mxu0 }
0x1ab1   : > { %v3099_v59 = vadd.f32 %v3096_v26, %v5942_v53 }
0x1ab3   : > { %v3100_v62 = vadd.f32 %v5660_v25, %v3099_v59 }
0x1ab5   : > { %v3101_v3 = vsel %vm647_vm0, %v3100_v62, 0.0 }
0x1ab6   : > { %3102 = vadd.xlane.f32.xlu1 %v3101_v3 }
0x1b43   : > { %v3103_v7 = vpop.xlane.xlu1 %3102 }
0x1b44   : > { %v3104_v60 = vmul.f32 0.03125, %v3103_v7 }
0x1b46   : > { %v3105_v8 = vsub.f32 %v3100_v62, %v3104_v60 }
0x1b48   : > { %v3106_v11 = vmul.f32 %v3105_v8, %v3105_v8 }
0x1b4a   : > { %v3107_v0 = vsel %vm647_vm0, %v3106_v11, 0.0 }
0x1b4b   : > { %3108 = vadd.xlane.f32.xlu0 %v3107_v0 }
0x1bd8   : > { %v3109_v14 = vpop.xlane.xlu0 %3108 }
0x1bd9   : > { %v3110_v19 = vmul.f32 0.03125, %v3109_v14 }
0x1bdb   : > { %v3111_v20 = vadd.f32 1e-05, %v3110_v19  ;;  %v4470_v19 = vld [vmem:[%s5824_s25 + $0x2] sm:$0x1] }
0x1bdd   : > { %5367 = vrsqrt.f32 %v3111_v20 }
0x1be7   : > { %v5368_v24 = vpop.eup %5367 }
0x1be8   : > { %v3113_v29 = vmul.f32 %v5368_v24, %v3105_v8 }
0x1bea   : > { %v3114_v53 = vmul.f32 %v5693_v45, %v3113_v29 }
0x1bec   : > { %v3115_v25 = vadd.f32 %v5698_v47, %v3114_v53 }
0x1bee   : > { %4952 = vmatmul.mubr.msk.f32.vlgmr.msra.gmra.mrb[26].mxu0 %vm647_vm0, %v3115_v25 }
0x1bef   : > { %4991 = vmatprep.mubr.msk.f32.mxu0 %vm5421_vm1, %v5422_v15 }
0x1cc1   : > { %v3185_v30 = vpop.f32.mrb[26].mxu0 }
0x1cc2   : > { %v3186_v48 = vadd.f32 %v5788_v18, %v3185_v30  ;;  %v4953_v31 = vpop.f32.mrb[27].mxu0  ;;  %v5401_v18 = vld [vmem:[%s6250_s1] sm:$0xff] }
0x1cc3   : > { %v6052_v44 = vadd.f32 %v5401_v18, %v4474_v39  ;;  %v5402_v30 = vld [vmem:[%s6252_s22] ss:$0 sm:$0xff] }
0x1cc4   : > { %v4469_v32 = vmul.f32 -1.702, %v3186_v48  ;;  %v5403_v31 = vld [vmem:[%s6221_s3] ss:$0 sm:$0xff] }
0x1cc5   : > { %v3443_v50 = vsel %vm647_vm0, %v6052_v44, 0.0 }
0x1cc6   : > { %v3191_v33 = vmul.f32 1.442695, %v4469_v32 }
0x1cc8   : > { %5369 = vpow2.f32 %v3191_v33 }
0x1cd2   : > { %v5370_v35 = vpop.eup %5369 }
0x1cd3   : > { %v3193_v2 = vadd.f32 1.0, %v5370_v35 }
0x1cd5   : > { %5371 = vrcp.f32 %v3193_v2 }
0x1cdf   : > { %v5372_v37 = vpop.eup %5371 }
0x1ce0   : > { %v3196_v45 = vmul.f32 %v5372_v37, %v3186_v48 }
0x1ce2   : > { %4987 = vmatmul.mubr.f32.vlgmr.msra.gmra.mrb[32].mxu1 %v3196_v45 }
0x1ce3   : > { %5028 = vmatprep.mubr.msk.f32.mxu1 %vm5421_vm1, %v5422_v15 }
0x1db5   : > { %v3263_v47 = vpop.f32.mrb[32].mxu1 }
0x1db6   : > { %v3267_v42 = vadd.f32 %v3263_v47, %v3100_v62  ;;  %v4988_v43 = vpop.f32.mrb[33].mxu1 }
0x1db8   : > { %v3268_v46 = vadd.f32 %v5796_v34, %v3267_v42 }
0x1dba   : > { %v3269_v28 = vsel %vm647_vm0, %v3268_v46, 0.0 }
0x1dbb   : > { %3270 = vadd.xlane.f32.xlu1 %v3269_v28 }
0x1dbf   : > { %3444 = vadd.xlane.f32.xlu1 %v3443_v50 }
0x1e48   : > { %v3271_v51 = vpop.xlane.xlu1 %3270 }
0x1e49   : > { %v3272_v54 = vmul.f32 0.03125, %v3271_v51 }
0x1e4b   : > { %v3273_v21 = vsub.f32 %v3268_v46, %v3272_v54 }
0x1e4c   : > { %v3445_v23 = vpop.xlane.xlu1 %3444 }
0x1e4d   : > { %v3274_v56 = vmul.f32 %v3273_v21, %v3273_v21  ;;  %v3446_v34 = vmul.f32 0.03125, %v3445_v23 }
0x1e4f   : > { %v3275_v26 = vsel %vm647_vm0, %v3274_v56, 0.0  ;;  %v3447_v57 = vsub.f32 %v6052_v44, %v3446_v34 }
0x1e50   : > { %3276 = vadd.xlane.f32.xlu0 %v3275_v26 }
0x1e51   : > { %v3448_v59 = vmul.f32 %v3447_v57, %v3447_v57 }
0x1e53   : > { %v3449_v62 = vsel %vm647_vm0, %v3448_v59, 0.0 }
0x1e54   : > { %3450 = vadd.xlane.f32.xlu0 %v3449_v62 }
0x1edd   : > { %v3277_v3 = vpop.xlane.xlu0 %3276 }
0x1ede   : > { %v3278_v7 = vmul.f32 0.03125, %v3277_v3 }
0x1ee0   : > { %v3279_v60 = vadd.f32 1e-05, %v3278_v7 }
0x1ee2   : > { %5373 = vrsqrt.f32 %v3279_v60 }
0x1eec   : > { %v5374_v8 = vpop.eup %5373 }
0x1eed   : > { %v3281_v11 = vmul.f32 %v5374_v8, %v3273_v21 }
0x1eef   : > { %v3282_v0 = vmul.f32 %v5813_v63, %v3281_v11  ;;  %v3451_v63 = vpop.xlane.xlu0 %3450 }
0x1ef0   : > { %v3452_v20 = vmul.f32 0.03125, %v3451_v63 }
0x1ef1   : > { %v3283_v14 = vadd.f32 %v5818_v4, %v3282_v0 }
0x1ef2   : > { %v3453_v4 = vadd.f32 1e-05, %v3452_v20 }
0x1ef3   : > { %4990 = vmatpush3.msra.mxu0 %v3283_v14 }
0x1ef4   : > { %4992 = vmatmul.mubr.msk.f32.vlgmr.msra.gmra.mrb[28].mxu0 %vm835_vm4, %v4470_v19  ;;  %5250 = vmatprep.subr.bf16.mxu0 %v5420_v12  ;;  %5375 = vrsqrt.f32 %v3453_v4 }
0x1ef5   : > { %5252 = vmatpush3.bf16.msra.mxu0 %v5842_v22  ;;  %5002 = vmatprep.mubr.msk.f32.mxu0 %vm5421_vm1, %v5422_v15 }
0x1ef6   : > { %5253 = vmatprep.subr.bf16.mxu0 %v5420_v12 }
0x1ef9   : > { %5255 = vmatpush3.bf16.msra.mxu0 %v5848_v27 }
0x1efa   : > { %5256 = vmatprep.subr.bf16.mxu0 %v5420_v12 }
0x1efe   : > { %v5376_v24 = vpop.eup %5375 }
0x1eff   : > { %v3455_v29 = vmul.f32 %v5376_v24, %v3447_v57 }
0x1f01   : > { %v3456_v48 = vmul.f32 %v5402_v30, %v3455_v29 }
0x1f03   : > { %v3457_v32 = vadd.f32 %v5403_v31, %v3456_v48 }
0x1fc7   : > { %v3355_v53 = vpop.f32.mrb[28].mxu0 }
0x1fc8   : > { %v4993_v25 = vpop.f32.mrb[29].mxu0  ;;  %5003 = vmatmul.mubr.msk.f32.vlgmr.msra.gmra.mrb[30].mxu0 %vm647_vm0, %v3355_v53 }
0x1fc9   : > { %5258 = vmatpush3.bf16.msra.mxu0 %v5563_v13  ;;  %5013 = vmatprep.mubr.msk.f32.mxu0 %vm5421_vm1, %v5422_v15 }
0x1fca   : > { %5259 = vmatprep.subr.bf16.mxu0 %v5420_v12 }
0x1fcd   : > { %5261 = vmatpush3.bf16.msra.mxu0 %v5574_v16  ;;  %v5404_v16 = vld [vmem:[%s6223_s5] ss:$0 sm:$0xff] }
0x1fce   : > { %5016 = vmatprep.subr.mxu0 %v5422_v15 }
0x1fd0   : > { %5014 = vmatmul.mubr.msk.f32.vlgmr.msra.gmra.mrb[32].mxu0 %vm647_vm0, %v3457_v32 }
0x1fd1   : > { %5018 = vmatprep.mubr.msk.f32.mxu0 %vm5421_vm1, %v5422_v15 }
0x209b   : > { %v6087_v13 = vpop.f32.mrb[30].mxu0 }
0x209c   : > { %v5004_v33 = vpop.f32.mrb[31].mxu0 }
0x20a3   : > { %v3527_v35 = vpop.f32.mrb[32].mxu0 }
0x20a4   : > { %v3528_v2 = vadd.f32 %v5404_v16, %v3527_v35  ;;  %v5015_v37 = vpop.f32.mrb[33].mxu0  ;;  %v5406_v16 = vld [vmem:[%s6226_s8] ss:$0 sm:$0xff] }
0x20a5   : > { %v5407_v37 = vld [vmem:[%s6227_s9] ss:$0 sm:$0xff] }
0x20a6   : > { %3699 = vrot.lane.b32.xlu0 %v3528_v2, %s5425_s0  ;;  %3532 = vrot.lane.b32.xlu1 %v3528_v2, %s6253_s30 }
0x20aa   : > { %3697 = vrot.lane.b32.xlu1 %v3528_v2, %s6254_s26  ;;  %s6186_s26 = scalar_lea.vmem %s6236_s18, %s6258_s29 }
0x2118   : > { %v3700_v45 = vpop.permute.xlu0 %3699  ;;  %v3533_v47 = vpop.permute.xlu1 %3532 }
0x2119   : > { %5017 = vmatpush3.xpose.msk.msra.mxu0 %vm758_vm2, %v3533_v47  ;;  %5027 = vmatpush3.xpose.msk.msra.mxu1 %vm758_vm2, %v3700_v45 }
0x211a   : > { %5021 = vmatprep.subr.mxu0 %v5422_v15  ;;  %5262 = vmatprep.subr.bf16.mxu1 %v5420_v12 }
0x211c   : > { %5019 = vmatmul.mubr.msk.f32.vlgmr.msra.gmra.mrb[34].mxu0 %vm758_vm2, %v3528_v2  ;;  %v3698_v39 = vpop.permute.xlu1 %3697 }
0x211d   : > { %5029 = vmatmul.mubr.msk.f32.vlgmr.msra.gmra.mrb[34].mxu1 %vm758_vm2, %v3698_v39  ;;  %5023 = vmatprep.mubr.msk.f32.mxu0 %vm5421_vm1, %v5422_v15  ;;  %v5408_v39 = vld [vmem:[%s6229_s11] ss:$0 sm:$0xff] }
0x211e   : > { %5264 = vmatpush3.bf16.msra.mxu1 %v5647_v9  ;;  %5040 = vmatprep.mubr.msk.f32.mxu1 %vm5421_vm1, %v5422_v15 }
0x211f   : > { %5268 = vmatprep.subr.bf16.mxu1 %v5420_v12 }
0x21ef   : > { %v3604_v42 = vpop.f32.mrb[34].mxu0 }
0x21f0   : > { %v3608_v43 = vmul.f32 0.25, %v3604_v42  ;;  %v5020_v46 = vpop.f32.mrb[35].mxu0  ;;  %v3771_v18 = vpop.f32.mrb[34].mxu1 }
0x21f1   : > { %v3775_v28 = vmul.f32 0.25, %v3771_v18  ;;  %v5030_v50 = vpop.f32.mrb[35].mxu1 }
0x21f2   : > { %v3609_v51 = vadd.f32 %v3608_v43, %v5613_v38 }
0x21f3   : > { %v3776_v54 = vadd.f32 %v3775_v28, %v5613_v38 }
0x21f4   : > { %v3610_v21 = vsel %vm835_vm4, %v3609_v51, -inf }
0x21f5   : > { %3611 = vmax.xlane.f32.xlu1 %v3610_v21  ;;  %v3777_v9 = vsel %vm835_vm4, %v3776_v54, -inf }
0x21f6   : > { %3778 = vmax.xlane.f32.xlu0 %v3777_v9 }
0x2282   : > { %v3612_v23 = vpop.xlane.xlu1 %3611 }
0x2283   : > { %v3613_v56 = vsub.f32 %v3609_v51, %v3612_v23  ;;  %v3779_v34 = vpop.xlane.xlu0 %3778 }
0x2284   : > { %v3780_v26 = vsub.f32 %v3776_v54, %v3779_v34 }
0x2285   : > { %v3614_v57 = vmul.f32 1.442695, %v3613_v56  ;;  %v5409_v56 = vld [vmem:[%s6231_s13] ss:$0 sm:$0xff] }
0x2286   : > { %v3781_v59 = vmul.f32 1.442695, %v3780_v26  ;;  %v1610_v26 = vmul.f32 %v5865_v41, %v5865_v41 }
0x2287   : > { %5377 = vpow2.f32 %v3614_v57 }
0x2288   : > { %5379 = vpow2.f32 %v3781_v59  ;;  %v3432_v59 = vmul.f32 %v6087_v13, %v6087_v13 }
0x2291   : > { %v5378_v62 = vpop.eup %5377 }
0x2292   : > { %v5380_v3 = vpop.eup %5379  ;;  %v3616_v7 = vsel %vm835_vm4, %v5378_v62, 0.0 }
0x2293   : > { %3617 = vadd.xlane.f32.xlu0 %v3616_v7  ;;  %v3783_v38 = vsel %vm835_vm4, %v5380_v3, 0.0 }
0x2294   : > { %3784 = vadd.xlane.f32.xlu1 %v3783_v38 }
0x22a5   : > { %3788 = vrot.lane.b32.xlu1 %v3528_v2, %s6255_s21 }
0x22a9   : > { %3621 = vrot.lane.b32.xlu0 %v3528_v2, %s6256_s20 }
0x2320   : > { %v3618_v60 = vpop.xlane.xlu0 %3617 }
0x2321   : > { %5381 = vrcp.f32 %v3618_v60  ;;  %v3785_v8 = vpop.xlane.xlu1 %3784 }
0x2322   : > { %5383 = vrcp.f32 %v3785_v8 }
0x2324   : > { %v3622_v11 = vpop.permute.xlu0 %3621 }
0x2325   : > { %5022 = vmatpush3.msra.mxu0 %v3622_v11  ;;  %v3789_v63 = vpop.permute.xlu1 %3788 }
0x2326   : > { %5031 = vmatprep.subr.mxu0 %v5422_v15 }
0x232b   : > { %v5382_v0 = vpop.eup %5381 }
0x232c   : > { %v3620_v14 = vmul.f32 %v5382_v0, %v5378_v62  ;;  %v5384_v19 = vpop.eup %5383  ;;  %v1612_v62 = vsel %vm1611_vm5, %v1610_v26, 0.0  ;;  %v2521_v0 = vmul.f32 %v5973_v49, %v5973_v49 }
0x232d   : > { %v3787_v20 = vmul.f32 %v5384_v19, %v5380_v3  ;;  %v3433_v3 = vsel %vm1611_vm5, %v3432_v59, 0.0 }
0x232e   : > { %5024 = vmatmul.mubr.msk.f32.vlgmr.msra.gmra.mrb[36].mxu0 %vm835_vm4, %v3620_v14  ;;  %v2522_v19 = vsel %vm1611_vm5, %v2521_v0, 0.0 }
0x232f   : > { %5032 = vmatpush3.msra.mxu0 %v3789_v63  ;;  %5033 = vmatprep.mubr.msk.f32.mxu0 %vm5421_vm1, %v5422_v15 }
0x2330   : > { %5265 = vmatprep.subr.bf16.mxu0 %v5420_v12 }
0x2332   : > { %5034 = vmatmul.mubr.msk.f32.vlgmr.msra.gmra.mrb[38].mxu0 %vm835_vm4, %v3787_v20 }
0x2333   : > { %5267 = vmatpush3.bf16.msra.mxu0 %v5633_v5  ;;  %5047 = vmatprep.mubr.msk.f32.mxu0 %vm5421_vm1, %v5422_v15 }
0x2334   : > { %5274 = vmatprep.subr.bf16.mxu0 %v5420_v12 }
0x2401   : > { %v3693_v4 = vpop.f32.mrb[36].mxu0 }
0x2402   : > { %v5025_v24 = vpop.f32.mrb[37].mxu0  ;;  %5048 = vmatmul.mubr.msk.f32.vlgmr.msra.gmra.mrb[40].mxu0 %vm758_vm2, %v3693_v4 }
0x2403   : > { %5276 = vmatpush3.bf16.msra.mxu0 %v5711_v52  ;;  %5093 = vmatprep.mubr.msk.f32.mxu0 %vm5421_vm1, %v5422_v15 }
0x2404   : > { %5277 = vmatprep.subr.bf16.mxu0 %v5420_v12 }
0x2405   : > { %v3860_v29 = vpop.f32.mrb[38].mxu0 }
0x2406   : > { %v5035_v53 = vpop.f32.mrb[39].mxu0  ;;  %5041 = vmatmul.mubr.msk.f32.vlgmr.msra.gmra.mrb[36].mxu1 %vm758_vm2, %v3860_v29 }
0x2407   : > { %5270 = vmatpush3.bf16.msra.mxu1 %v5676_v36  ;;  %5058 = vmatprep.mubr.msk.f32.mxu1 %vm5421_vm1, %v5422_v15 }
0x2408   : > { %5271 = vmatprep.subr.bf16.mxu1 %v5420_v12  ;;  %5279 = vmatpush3.bf16.msra.mxu0 %v5721_v55 }
0x2409   : > { %5280 = vmatprep.subr.bf16.mxu0 %v5420_v12 }
0x240b   : > { %5273 = vmatpush3.bf16.msra.mxu1 %v5686_v40 }
0x240c   : > { %5282 = vmatpush3.bf16.msra.mxu0 %v5731_v58  ;;  %5096 = vmatprep.subr.mxu1 %v5422_v15 }
0x240d   : > { %5283 = vmatprep.subr.bf16.mxu0 %v5420_v12 }
0x2410   : > { %5285 = vmatpush3.bf16.msra.mxu0 %v5741_v61  ;;  %v5405_v61 = vld [vmem:[%s6225_s7] ss:$0 sm:$0xff] }
0x2411   : > { %5286 = vmatprep.subr.bf16.mxu0 %v5420_v12 }
0x2414   : > { %5288 = vmatpush3.bf16.msra.mxu0 %v5751_v1 }
0x2415   : > { %5289 = vmatprep.subr.bf16.mxu0 %v5420_v12 }
0x2418   : > { %5291 = vmatpush3.bf16.msra.mxu0 %v5761_v6 }
0x2419   : > { %5292 = vmatprep.subr.bf16.mxu0 %v5420_v12 }
0x241c   : > { %5294 = vmatpush3.bf16.msra.mxu0 %v5771_v10 }
0x241d   : > { %5295 = vmatprep.subr.bf16.mxu0 %v5420_v12 }
0x2420   : > { %5297 = vmatpush3.bf16.msra.mxu0 %v5781_v17 }
0x24d5   : > { %v4006_v5 = vpop.f32.mrb[40].mxu0 }
0x24d6   : > { %v5049_v36 = vpop.f32.mrb[41].mxu0 }
0x24d9   : > { %v3933_v40 = vpop.f32.mrb[36].mxu1 }
0x24da   : > { %v4007_v52 = vadd.f32 %v4006_v5, %v3933_v40  ;;  %v5042_v55 = vpop.f32.mrb[37].mxu1 }
0x24dc   : > { %v4010_v58 = vadd.f32 %v4007_v52, %v6052_v44 }
0x24de   : > { %v4011_v1 = vadd.f32 %v5405_v61, %v4010_v58  ;;  %v5410_v61 = vld [vmem:[%s6232_s14] ss:$0 sm:$0xff] }
0x24e0   : > { %v4012_v6 = vsel %vm647_vm0, %v4011_v1, 0.0 }
0x24e1   : > { %4013 = vadd.xlane.f32.xlu1 %v4012_v6  ;;  %v5411_v6 = vld [vmem:[%s6233_s15] ss:$0 sm:$0xff] }
0x256e   : > { %v4014_v10 = vpop.xlane.xlu1 %4013 }
0x256f   : > { %v4015_v25 = vmul.f32 0.03125, %v4014_v10 }
0x2571   : > { %v4016_v30 = vsub.f32 %v4011_v1, %v4015_v25  ;;  %v4486_v25 = vld [vmem:[%s5824_s25 + $0x3] sm:$0x1] }
0x2573   : > { %v4017_v48 = vmul.f32 %v4016_v30, %v4016_v30 }
0x2575   : > { %v4018_v17 = vsel %vm647_vm0, %v4017_v48, 0.0 }
0x2576   : > { %4019 = vadd.xlane.f32.xlu0 %v4018_v17 }
0x2603   : > { %v4020_v31 = vpop.xlane.xlu0 %4019 }
0x2604   : > { %v4021_v32 = vmul.f32 0.03125, %v4020_v31 }
0x2606   : > { %v4022_v33 = vadd.f32 1e-05, %v4021_v32 }
0x2608   : > { %5385 = vrsqrt.f32 %v4022_v33 }
0x2612   : > { %v5386_v44 = vpop.eup %5385 }
0x2613   : > { %v4024_v35 = vmul.f32 %v5386_v44, %v4016_v30 }
0x2615   : > { %v4025_v2 = vmul.f32 %v5406_v16, %v4024_v35 }
0x2617   : > { %v4026_v45 = vadd.f32 %v5407_v37, %v4025_v2 }
0x2619   : > { %5059 = vmatmul.mubr.msk.f32.vlgmr.msra.gmra.mrb[38].mxu1 %vm647_vm0, %v4026_v45 }
0x261a   : > { %5098 = vmatprep.mubr.msk.f32.mxu1 %vm5421_vm1, %v5422_v15 }
0x26ec   : > { %v4096_v47 = vpop.f32.mrb[38].mxu1 }
0x26ed   : > { %v4097_v42 = vadd.f32 %v5408_v39, %v4096_v47  ;;  %v5060_v43 = vpop.f32.mrb[39].mxu1 }
0x26ef   : > { %v4485_v46 = vmul.f32 -1.702, %v4097_v42 }
0x26f1   : > { %v4102_v18 = vmul.f32 1.442695, %v4485_v46 }
0x26f3   : > { %5387 = vpow2.f32 %v4102_v18 }
0x26fd   : > { %v5388_v28 = vpop.eup %5387 }
0x26fe   : > { %v4104_v50 = vadd.f32 1.0, %v5388_v28 }
0x2700   : > { %5389 = vrcp.f32 %v4104_v50 }
0x270a   : > { %v5390_v51 = vpop.eup %5389 }
0x270b   : > { %v4107_v54 = vmul.f32 %v5390_v51, %v4097_v42 }
0x270d   : > { %5094 = vmatmul.mubr.f32.vlgmr.msra.gmra.mrb[42].mxu0 %v4107_v54 }
0x27e0   : > { %v4174_v21 = vpop.f32.mrb[42].mxu0 }
0x27e1   : > { %v4178_v9 = vadd.f32 %v4174_v21, %v4011_v1  ;;  %v5095_v23 = vpop.f32.mrb[43].mxu0 }
0x27e3   : > { %v4179_v34 = vadd.f32 %v5409_v56, %v4178_v9 }
0x27e5   : > { %v4180_v57 = vsel %vm647_vm0, %v4179_v34, 0.0 }
0x27e6   : > { %4181 = vadd.xlane.f32.xlu0 %v4180_v57 }
0x27ea   : > { %1613 = vadd.xlane.f32.xlu0 %v1612_v62 }
0x27ee   : > { %3434 = vadd.xlane.f32.xlu0 %v3433_v3 }
0x2873   : > { %v4182_v7 = vpop.xlane.xlu0 %4181 }
0x2874   : > { %v4183_v38 = vmul.f32 0.03125, %v4182_v7 }
0x2876   : > { %v4184_v60 = vsub.f32 %v4179_v34, %v4183_v38 }
0x2877   : > { %v1614_v8 = vpop.xlane.xlu0 %1613 }
0x2878   : > { %5391 = vrsqrt.f32 %v1614_v8  ;;  %v4185_v11 = vmul.f32 %v4184_v60, %v4184_v60 }
0x287a   : > { %v4186_v14 = vsel %vm647_vm0, %v4185_v11, 0.0 }
0x287b   : > { %4187 = vadd.xlane.f32.xlu1 %v4186_v14  ;;  %v3435_v24 = vpop.xlane.xlu0 %3434 }
0x287c   : > { %5393 = vrsqrt.f32 %v3435_v24 }
0x287f   : > { %2523 = vadd.xlane.f32.xlu1 %v2522_v19 }
0x2882   : > { %v5392_v63 = vpop.eup %5391 }
0x2883   : > { %v1616_v20 = vmul.f32 %v5392_v63, %v5865_v41 }
0x2885   : > { %1617 = vst.msk [vmem:[%s6186_s26] sm:$0x1] %vm1611_vm5, %v1616_v20 }
0x2886   : > { %v5394_v36 = vpop.eup %5393 }
0x2887   : > { %v3437_v41 = vmul.f32 %v5394_v36, %v6087_v13 }
0x2889   : > { %4473 = vst.msk [vmem:[%s6186_s26 + $0x2] sm:$0x1] %vm1611_vm5, %v3437_v41 }
0x2908   : > { %v4188_v4 = vpop.xlane.xlu1 %4187 }
0x2909   : > { %v4189_v29 = vmul.f32 0.03125, %v4188_v4 }
0x290b   : > { %v4190_v53 = vadd.f32 1e-05, %v4189_v29 }
0x290c   : > { %v2524_v5 = vpop.xlane.xlu1 %2523 }
0x290d   : > { %5395 = vrsqrt.f32 %v4190_v53 }
0x290e   : > { %5397 = vrsqrt.f32 %v2524_v5 }
0x2917   : > { %v5396_v40 = vpop.eup %5395 }
0x2918   : > { %v5398_v52 = vpop.eup %5397  ;;  %v4192_v55 = vmul.f32 %v5396_v40, %v4184_v60 }
0x2919   : > { %v2526_v58 = vmul.f32 %v5398_v52, %v5973_v49 }
0x291a   : > { %v4193_v1 = vmul.f32 %v5410_v61, %v4192_v55 }
0x291b   : > { %4457 = vst.msk [vmem:[%s6186_s26 + $0x1] sm:$0x1] %vm1611_vm5, %v2526_v58 }
0x291c   : > { %v4194_v10 = vadd.f32 %v5411_v6, %v4193_v1 }
0x291e   : > { %5097 = vmatpush3.msra.mxu1 %v4194_v10 }
0x291f   : > { %5099 = vmatmul.mubr.msk.f32.vlgmr.msra.gmra.mrb[40].mxu1 %vm835_vm4, %v4486_v25  ;;  %5298 = vmatprep.subr.bf16.mxu1 %v5420_v12 }
0x2920   : > { %5300 = vmatpush3.bf16.msra.mxu1 %v5842_v22  ;;  %5109 = vmatprep.mubr.msk.f32.mxu1 %vm5421_vm1, %v5422_v15 }
0x2921   : > { %5301 = vmatprep.subr.bf16.mxu1 %v5420_v12 }
0x2924   : > { %5303 = vmatpush3.bf16.msra.mxu1 %v5848_v27 }
0x29f2   : > { %v4266_v49 = vpop.f32.mrb[40].mxu1 }
0x29f3   : > { %5110 = vmatmul.mubr.msk.f32.vlgmr.msra.gmra.mrb[42].mxu1 %vm647_vm0, %v4266_v49  ;;  %v5100_v13 = vpop.f32.mrb[41].mxu1 }
0x2ac6   : > { %v4339_v30 = vpop.f32.mrb[42].mxu1 }
0x2ac7   : > { %v4343_v48 = vmul.f32 %v4339_v30, %v4339_v30  ;;  %v5111_v17 = vpop.f32.mrb[43].mxu1 }
0x2ac9   : > { %v4344_v31 = vsel %vm1611_vm5, %v4343_v48, 0.0 }
0x2aca   : > { %4345 = vadd.xlane.f32.xlu1 %v4344_v31 }
0x2b57   : > { %v4346_v32 = vpop.xlane.xlu1 %4345 }
0x2b58   : > { %5399 = vrsqrt.f32 %v4346_v32 }
0x2b62   : > { %v5400_v22 = vpop.eup %5399 }
0x2b63   : > { %v4348_v33 = vmul.f32 %v5400_v22, %v4339_v30 }
0x2b65   : > { %4489 = vst.msk [vmem:[%s6186_s26 + $0x3] sm:$0x1] %vm1611_vm5, %v4348_v33 }
0x2b66 PF: > { %s28_s27 = sadd.s32 1, %s5418_s27  }
0x2b67   : > { %p25_p4 = scmp.ge.s32.totalorder %s28_s27, 4  }
0x2b69   :  { %27 = sbr.rel (!%p25_p4) target bundleno = 4 (0x4), region = 134 }

</bundles_post_ra>
